<compile_context>
chip_gen: v7x
topology: tpu7x:2x2x1
jax: 0.10.0
libtpu: 0.0.40
codegen_flags: <defaults>
</compile_context>

<pallas_src>
import functools

import jax
import jax.numpy as jnp
from jax.experimental import pallas as pl
from jax.experimental.pallas import tpu as pltpu


# ----------------------------------------------------------------------------
# Pallas kernels
# ----------------------------------------------------------------------------
def _deconv_phase_kernel(a_ref, b_ref, shift_ref, o_ref):
    """relu(A @ B + shift); the folded-BN scale is pre-multiplied into B."""
    acc = jnp.dot(a_ref[...], b_ref[...], preferred_element_type=jnp.float32)
    o_ref[...] = jnp.maximum(acc + shift_ref[...], 0.0).astype(o_ref.dtype)


def _deconv_phase_final_kernel(a_ref, b_ref, shift_ref, b2_ref, bias2_ref,
                               o_ref):
    """Last deconv + BN + ReLU with the 1x1 final conv (+bias) fused.

    The second GEMM runs bf16 x bf16 (f32 accumulation) and its output is
    lane-dense (per-phase channels padded so columns are a multiple of 128).
    """
    acc = jnp.dot(a_ref[...], b_ref[...], preferred_element_type=jnp.float32)
    h = jnp.maximum(acc + shift_ref[...], 0.0).astype(jnp.bfloat16)
    out = jnp.dot(h, b2_ref[...], preferred_element_type=jnp.float32)
    o_ref[...] = (out + bias2_ref[...]).astype(o_ref.dtype)


# ----------------------------------------------------------------------------
# Generation-aware tiling
# ----------------------------------------------------------------------------
def _num_tensorcores():
    """TensorCores visible to one pallas_call (megacore chips expose 2)."""
    try:
        kind = jax.devices()[0].device_kind.lower()
    except Exception:
        return 1
    if any(tag in kind for tag in ("v4", "v5p", "v7", "7x")):
        return 2
    return 1


def _pick_tile_m(m, max_tile=4096):
    """Pick (tile_m, grid) for the M axis.

    * single-TC chips (v5e/v6e): 1 grid step whenever M fits one tile (grid
      is a serial loop there; extra steps are pure per-step overhead).
    * megacore chips (v7x/v4/v5p): round step count up to a multiple of the
      TC count so both cores get equal work.
    * 256-aligned tiles when large (fills 256x256 MXU), 16-aligned when small
      (bf16 sublane packing).
    """
    cores = _num_tensorcores()
    steps = max(1, pl.cdiv(m, max_tile))
    if cores > 1:
        steps = ((max(steps, cores) + cores - 1) // cores) * cores
    tile = pl.cdiv(m, steps)
    align = 256 if tile >= 256 else 16
    tile = ((tile + align - 1) // align) * align
    grid = pl.cdiv(m, tile)
    return tile, grid


# ----------------------------------------------------------------------------
# Tiled GEMM wrapper
# ----------------------------------------------------------------------------
def _phase_gemm(a_bf16, b_bf16, shift, *, b2_bf16=None, bias2=None,
                out_dtype=jnp.float32):
    """out = relu(A@B + shift) [ @ B2 + bias2 if given ], tiled over M."""
    m, k = a_bf16.shape
    kb, c = b_bf16.shape
    assert k == kb
    tile_m, grid = _pick_tile_m(m)
    m_pad = tile_m * grid
    if m_pad != m:
        a_bf16 = jnp.pad(a_bf16, ((0, m_pad - m), (0, 0)))

    shift2 = shift.reshape(1, c).astype(jnp.float32)

    in_specs = [
        pl.BlockSpec((tile_m, k), lambda i: (i, 0)),
        pl.BlockSpec((k, c), lambda i: (0, 0)),
        pl.BlockSpec((1, c), lambda i: (0, 0)),
    ]
    args = [a_bf16, b_bf16, shift2]

    if b2_bf16 is None:
        kernel = _deconv_phase_kernel
        c_out = c
    else:
        kernel = _deconv_phase_final_kernel
        c_out = b2_bf16.shape[1]
        in_specs += [
            pl.BlockSpec((c, c_out), lambda i: (0, 0)),
            pl.BlockSpec((1, c_out), lambda i: (0, 0)),
        ]
        args += [b2_bf16, bias2.reshape(1, c_out).astype(jnp.float32)]

    out = pl.pallas_call(
        kernel,
        out_shape=jax.ShapeDtypeStruct((m_pad, c_out), out_dtype),
        grid_spec=pltpu.PrefetchScalarGridSpec(
            num_scalar_prefetch=0,
            grid=(grid,),
            in_specs=in_specs,
            out_specs=pl.BlockSpec((tile_m, c_out), lambda i: (i, 0)),
        ),
        compiler_params=pltpu.CompilerParams(
            dimension_semantics=("parallel",)),
    )(*args)
    return out[:m]


# ----------------------------------------------------------------------------
# ConvTranspose2d(4, stride=2, padding=1, bias=False) + folded BN + ReLU
# via the sub-pixel phase decomposition (optionally fusing the final 1x1 conv)
# ----------------------------------------------------------------------------
def deconv_phase_layer(x_nhwc, w, bn_scale, bn_shift, *,
                       final_w=None, final_b=None):
    """x_nhwc: (N, H, W, Cin); w: PyTorch ConvTranspose2d weight (Cin, Cout, 4, 4).

    Output phase (sy, sx) of patch (i, j) of the 1-padded input lands at output
    pixel (2i - 1 + sy, 2j - 1 + sx) and uses flipped-kernel taps
    a = (1 - sy) + 2*dy, b = (1 - sx) + 2*dx.
    """
    n, h, w_sp, cin = x_nhwc.shape
    cin_w, cout, kh, kw = w.shape
    assert cin == cin_w and (kh, kw) == (4, 4)

    # A (built once, in bf16): 2x2 taps of the 1-padded input, K order (dy,dx,cin)
    x_pad = jnp.pad(x_nhwc.astype(jnp.bfloat16),
                    ((0, 0), (1, 1), (1, 1), (0, 0)))
    taps = [x_pad[:, dy:dy + h + 1, dx:dx + w_sp + 1, :]
            for dy in (0, 1) for dx in (0, 1)]
    a = jnp.concatenate(taps, axis=-1).reshape(n * (h + 1) * (w_sp + 1), 4 * cin)

    # B: phase-packed weights (4*Cin, 4*Cout), columns ordered (sy, sx, cout)
    w_flip = w[:, :, ::-1, ::-1]                       # (Cin, Cout, 4, 4)
    b6 = jnp.zeros((2, 2, cin, 2, 2, cout), jnp.float32)
    for sy in range(2):
        for sx in range(2):
            for dy in range(2):
                for dx in range(2):
                    b6 = b6.at[dy, dx, :, sy, sx, :].set(
                        w_flip[:, :, (1 - sy) + 2 * dy, (1 - sx) + 2 * dx])
    b = b6.reshape(4 * cin, 4 * cout)

    # Fold the BN scale into B's columns (host-side, on tiny weights).
    scale4 = jnp.tile(bn_scale.astype(jnp.float32), 4)
    shift4 = jnp.tile(bn_shift.astype(jnp.float32), 4)
    b = (b * scale4[None, :]).astype(jnp.bfloat16)

    if final_w is None:
        out = _phase_gemm(a, b, shift4, out_dtype=jnp.bfloat16)
        c_eff = cout
        cf = None
    else:
        cf = final_w.shape[0]
        cf_pad = ((cf + 31) // 32) * 32                # 4*cf_pad % 128 == 0
        wf2 = final_w.reshape(cf, cout)                # (Cf, Cprev)
        b2 = jnp.zeros((4 * cout, 4 * cf_pad), jnp.float32)
        for ph in range(4):                            # block-diag over phases
            b2 = b2.at[ph * cout:(ph + 1) * cout,
                       ph * cf_pad:ph * cf_pad + cf].set(wf2.T)
        bias_pad = jnp.concatenate(
            [final_b.astype(jnp.float32), jnp.zeros((cf_pad - cf,), jnp.float32)])
        bias2 = jnp.tile(bias_pad, 4)
        out = _phase_gemm(a, b, shift4, b2_bf16=b2.astype(jnp.bfloat16),
                          bias2=bias2, out_dtype=jnp.float32)
        c_eff = cf_pad

    # depth-to-space + crop: (i, j, sy, sx) -> pixel (2i - 1 + sy, 2j - 1 + sx)
    out = out.reshape(n, h + 1, w_sp + 1, 2, 2, c_eff)
    if cf is not None and c_eff != cf:
        out = out[..., :cf]                            # drop lane-padding chans
        c_eff = cf
    out = out.transpose(0, 1, 3, 2, 4, 5).reshape(
        n, 2 * (h + 1), 2 * (w_sp + 1), c_eff)
    return out[:, 1:2 * h + 1, 1:2 * w_sp + 1, :]


# ----------------------------------------------------------------------------
# Full Heatmap3DHead forward
# ----------------------------------------------------------------------------
@functools.partial(jax.jit, static_argnames=("depth_size",))
def heatmap3d_head_forward(x_nchw, params, depth_size):
    eps = 1e-5
    x = jnp.transpose(x_nchw, (0, 2, 3, 1))            # NCHW -> NHWC
    deconv = params["deconv"]
    wf, bf = params["final"]
    n_layers = len(deconv)
    for li, (w, gamma, beta, mean, var) in enumerate(deconv):
        scale = gamma * jax.lax.rsqrt(var + eps)       # fold BN (eval mode)
        shift = beta - mean * scale
        if li == n_layers - 1:                         # fuse final 1x1 conv here
            x = deconv_phase_layer(x, w, scale, shift, final_w=wf, final_b=bf)
        else:
            x = deconv_phase_layer(x, w, scale, shift)
    n, hh, ww, cf = x.shape
    y = jnp.transpose(x, (0, 3, 1, 2))                 # NHWC -> NCHW
    return y.reshape(n, cf // depth_size, depth_size, hh, ww)


# ----------------------------------------------------------------------------
# Pure-JAX reference (f32) of the PyTorch module in eval mode
# ----------------------------------------------------------------------------
def reference_forward(x_nchw, params, depth_size):
    eps = 1e-5
    x = x_nchw.astype(jnp.float32)
    for (w, gamma, beta, mean, var) in params["deconv"]:
        kh = w.shape[2]
        pad = kh - 1 - 1                               # k - 1 - padding, padding=1
        w_conv = jnp.transpose(w[:, :, ::-1, ::-1], (1, 0, 2, 3))  # (Cout,Cin,kh,kw)
        x = jax.lax.conv_general_dilated(
            x, w_conv, window_strides=(1, 1), padding=((pad, pad), (pad, pad)),
            lhs_dilation=(2, 2), dimension_numbers=("NCHW", "OIHW", "NCHW"))
        scale = gamma / jnp.sqrt(var + eps)
        shift = beta - mean * scale
        x = jnp.maximum(
            x * scale[None, :, None, None] + shift[None, :, None, None], 0.0)
    wf, bf = params["final"]
    wf2 = wf.reshape(wf.shape[0], wf.shape[1])
    x = jnp.einsum("nchw,oc->nohw", x, wf2) + bf[None, :, None, None]
    n, c, hh, ww = x.shape
    return x.reshape(n, c // depth_size, depth_size, hh, ww)


# ----------------------------------------------------------------------------
if __name__ == "__main__":
    key = jax.random.PRNGKey(0)
    keys = jax.random.split(key, 32)
    kidx = 0

    # Small, module-consistent config
    N, Cin, H, W = 2, 16, 8, 8
    depth_size = 8
    num_keypoints = 3
    out_channels = num_keypoints * depth_size          # 24, multiple of depth_size
    deconv_out_channels = (32, 32, 32)
    deconv_kernel_sizes = (4, 4, 4)

    # Deterministic synthetic parameters (no checkpoint)
    params = {"deconv": [], "final": None}
    prev = Cin
    for oc, k in zip(deconv_out_channels, deconv_kernel_sizes):
        w = 0.1 * jax.random.normal(keys[kidx], (prev, oc, k, k), jnp.float32); kidx += 1
        gamma = 1.0 + 0.1 * jax.random.normal(keys[kidx], (oc,), jnp.float32); kidx += 1
        beta = 0.05 * jax.random.normal(keys[kidx], (oc,), jnp.float32); kidx += 1
        mean = 0.02 * jax.random.normal(keys[kidx], (oc,), jnp.float32); kidx += 1
        var = jnp.abs(1.0 + 0.1 * jax.random.normal(keys[kidx], (oc,), jnp.float32)); kidx += 1
        params["deconv"].append((w, gamma, beta, mean, var))
        prev = oc
    wf = 0.1 * jax.random.normal(keys[kidx], (out_channels, prev, 1, 1), jnp.float32); kidx += 1
    bf = 0.01 * jax.random.normal(keys[kidx], (out_channels,), jnp.float32); kidx += 1
    params["final"] = (wf, bf)

    x = jax.random.normal(keys[kidx], (N, Cin, H, W), jnp.float32)

    out = heatmap3d_head_forward(x, params, depth_size=depth_size)
    out = jax.block_until_ready(out)

    # 3 deconvs each double spatial: 8 -> 16 -> 32 -> 64
    assert out.shape == (N, out_channels // depth_size, depth_size, 8 * H, 8 * W), out.shape
    assert out.dtype == jnp.float32

    # Numerical check vs f32 reference (loose tolerance: bf16 GEMM inputs).
    ref = reference_forward(x, params, depth_size)
    err = float(jnp.max(jnp.abs(out - ref)))
    tol = 0.05 * float(jnp.max(jnp.abs(ref))) + 1e-3
    assert err <= tol, (err, tol)

    print("KERNEL_OK")
</pallas_src>

<mosaic_0001>
module attributes {stable_mosaic.version = 11 : i64} {
  func.func @_deconv_phase_kernel(%arg0: i32, %arg1: memref<176x64xbf16, #tpu.memory_space<vmem>>, %arg2: memref<64x128xbf16, #tpu.memory_space<vmem>>, %arg3: memref<1x128xf32, #tpu.memory_space<vmem>>, %arg4: memref<176x128xbf16, #tpu.memory_space<vmem>>) attributes {dimension_semantics = [#tpu.dimension_semantics<parallel>], iteration_bounds = array<i64: 1>, scalar_prefetch = 0 : i64, scratch_operands = 0 : i64, tpu.core_type = #tpu.core_type<tc>, window_params = [{transform_indices = @transform_0, window_bounds = array<i64: 176, 64>}, {pipeline_mode = #tpu.pipeline_mode<synchronous>, transform_indices = @transform_1, window_bounds = array<i64: 64, 128>}, {pipeline_mode = #tpu.pipeline_mode<synchronous>, transform_indices = @transform_2, window_bounds = array<i64: 1, 128>}, {transform_indices = @transform_3, window_bounds = array<i64: 176, 128>}]} {
    %c0 = arith.constant 0 : index
    %c0_0 = arith.constant 0 : index
    %0 = vector.load %arg1[%c0, %c0_0] : memref<176x64xbf16, #tpu.memory_space<vmem>>, vector<176x64xbf16>
    %c0_1 = arith.constant 0 : index
    %c0_2 = arith.constant 0 : index
    %1 = vector.load %arg2[%c0_1, %c0_2] : memref<64x128xbf16, #tpu.memory_space<vmem>>, vector<64x128xbf16>
    %cst = arith.constant dense<0.000000e+00> : vector<176x128xf32>
    %2 = tpu.matmul %0, %1, %cst {dimension_numbers = #tpu.dot_dimension_numbers<[1], [0], [0], [1], [0, 0, 1, 1], [], []>} : vector<176x64xbf16>, vector<64x128xbf16>, vector<176x128xf32> -> vector<176x128xf32>
    %c0_3 = arith.constant 0 : index
    %c0_4 = arith.constant 0 : index
    %3 = vector.load %arg3[%c0_3, %c0_4] : memref<1x128xf32, #tpu.memory_space<vmem>>, vector<1x128xf32>
    %4 = vector.broadcast %3 : vector<1x128xf32> to vector<176x128xf32>
    %5 = arith.addf %2, %4 : vector<176x128xf32>
    %cst_5 = arith.constant 0.000000e+00 : f32
    %6 = vector.broadcast %cst_5 : f32 to vector<176x128xf32>
    %7 = arith.maximumf %5, %6 : vector<176x128xf32>
    %8 = arith.truncf %7 : vector<176x128xf32> to vector<176x128xbf16>
    %c0_6 = arith.constant 0 : index
    %c0_7 = arith.constant 0 : index
    %9 = vector.load %arg4[%c0_6, %c0_7] : memref<176x128xbf16, #tpu.memory_space<vmem>>, vector<176x128xbf16>
    tpu.vector_store %arg4[%c0_6, %c0_7], %8 {strides = array<i32>} : memref<176x128xbf16, #tpu.memory_space<vmem>>, vector<176x128xbf16>,
    return
  }
  func.func @transform_0(%arg0: i32) -> (i32, i32) {
    %c0_i32 = arith.constant 0 : i32
    %c0_i32_0 = arith.constant 0 : i32
    return %arg0, %c0_i32 : i32, i32
  }
  func.func @transform_1(%arg0: i32) -> (i32, i32) {
    %c0_i32 = arith.constant 0 : i32
    %c0_i32_0 = arith.constant 0 : i32
    %c0_i32_1 = arith.constant 0 : i32
    return %c0_i32, %c0_i32_0 : i32, i32
  }
  func.func @transform_2(%arg0: i32) -> (i32, i32) {
    %c0_i32 = arith.constant 0 : i32
    %c0_i32_0 = arith.constant 0 : i32
    %c0_i32_1 = arith.constant 0 : i32
    return %c0_i32, %c0_i32_0 : i32, i32
  }
  func.func @transform_3(%arg0: i32) -> (i32, i32) {
    %c0_i32 = arith.constant 0 : i32
    %c0_i32_0 = arith.constant 0 : i32
    return %arg0, %c0_i32 : i32, i32
  }
}

module attributes {stable_mosaic.version = 11 : i64} {
  func.func @_deconv_phase_kernel(%arg0: i32, %arg1: memref<768x128xbf16, #tpu.memory_space<vmem>>, %arg2: memref<128x128xbf16, #tpu.memory_space<vmem>>, %arg3: memref<1x128xf32, #tpu.memory_space<vmem>>, %arg4: memref<768x128xbf16, #tpu.memory_space<vmem>>) attributes {dimension_semantics = [#tpu.dimension_semantics<parallel>], iteration_bounds = array<i64: 1>, scalar_prefetch = 0 : i64, scratch_operands = 0 : i64, tpu.core_type = #tpu.core_type<tc>, window_params = [{transform_indices = @transform_0, window_bounds = array<i64: 768, 128>}, {pipeline_mode = #tpu.pipeline_mode<synchronous>, transform_indices = @transform_1, window_bounds = array<i64: 128, 128>}, {pipeline_mode = #tpu.pipeline_mode<synchronous>, transform_indices = @transform_2, window_bounds = array<i64: 1, 128>}, {transform_indices = @transform_3, window_bounds = array<i64: 768, 128>}]} {
    %c0 = arith.constant 0 : index
    %c0_0 = arith.constant 0 : index
    %0 = vector.load %arg1[%c0, %c0_0] : memref<768x128xbf16, #tpu.memory_space<vmem>>, vector<768x128xbf16>
    %c0_1 = arith.constant 0 : index
    %c0_2 = arith.constant 0 : index
    %1 = vector.load %arg2[%c0_1, %c0_2] : memref<128x128xbf16, #tpu.memory_space<vmem>>, vector<128x128xbf16>
    %cst = arith.constant dense<0.000000e+00> : vector<768x128xf32>
    %2 = tpu.matmul %0, %1, %cst {dimension_numbers = #tpu.dot_dimension_numbers<[1], [0], [0], [1], [0, 0, 1, 1], [], []>} : vector<768x128xbf16>, vector<128x128xbf16>, vector<768x128xf32> -> vector<768x128xf32>
    %c0_3 = arith.constant 0 : index
    %c0_4 = arith.constant 0 : index
    %3 = vector.load %arg3[%c0_3, %c0_4] : memref<1x128xf32, #tpu.memory_space<vmem>>, vector<1x128xf32>
    %4 = vector.broadcast %3 : vector<1x128xf32> to vector<768x128xf32>
    %5 = arith.addf %2, %4 : vector<768x128xf32>
    %cst_5 = arith.constant 0.000000e+00 : f32
    %6 = vector.broadcast %cst_5 : f32 to vector<768x128xf32>
    %7 = arith.maximumf %5, %6 : vector<768x128xf32>
    %8 = arith.truncf %7 : vector<768x128xf32> to vector<768x128xbf16>
    %c0_6 = arith.constant 0 : index
    %c0_7 = arith.constant 0 : index
    %9 = vector.load %arg4[%c0_6, %c0_7] : memref<768x128xbf16, #tpu.memory_space<vmem>>, vector<768x128xbf16>
    tpu.vector_store %arg4[%c0_6, %c0_7], %8 {strides = array<i32>} : memref<768x128xbf16, #tpu.memory_space<vmem>>, vector<768x128xbf16>,
    return
  }
  func.func @transform_0(%arg0: i32) -> (i32, i32) {
    %c0_i32 = arith.constant 0 : i32
    %c0_i32_0 = arith.constant 0 : i32
    return %arg0, %c0_i32 : i32, i32
  }
  func.func @transform_1(%arg0: i32) -> (i32, i32) {
    %c0_i32 = arith.constant 0 : i32
    %c0_i32_0 = arith.constant 0 : i32
    %c0_i32_1 = arith.constant 0 : i32
    return %c0_i32, %c0_i32_0 : i32, i32
  }
  func.func @transform_2(%arg0: i32) -> (i32, i32) {
    %c0_i32 = arith.constant 0 : i32
    %c0_i32_0 = arith.constant 0 : i32
    %c0_i32_1 = arith.constant 0 : i32
    return %c0_i32, %c0_i32_0 : i32, i32
  }
  func.func @transform_3(%arg0: i32) -> (i32, i32) {
    %c0_i32 = arith.constant 0 : i32
    %c0_i32_0 = arith.constant 0 : i32
    return %arg0, %c0_i32 : i32, i32
  }
}

module attributes {stable_mosaic.version = 11 : i64} {
  func.func @_deconv_phase_final_kernel(%arg0: i32, %arg1: memref<2304x128xbf16, #tpu.memory_space<vmem>>, %arg2: memref<128x128xbf16, #tpu.memory_space<vmem>>, %arg3: memref<1x128xf32, #tpu.memory_space<vmem>>, %arg4: memref<128x128xbf16, #tpu.memory_space<vmem>>, %arg5: memref<1x128xf32, #tpu.memory_space<vmem>>, %arg6: memref<2304x128xf32, #tpu.memory_space<vmem>>) attributes {dimension_semantics = [#tpu.dimension_semantics<parallel>], iteration_bounds = array<i64: 1>, scalar_prefetch = 0 : i64, scratch_operands = 0 : i64, tpu.core_type = #tpu.core_type<tc>, window_params = [{transform_indices = @transform_0, window_bounds = array<i64: 2304, 128>}, {pipeline_mode = #tpu.pipeline_mode<synchronous>, transform_indices = @transform_1, window_bounds = array<i64: 128, 128>}, {pipeline_mode = #tpu.pipeline_mode<synchronous>, transform_indices = @transform_2, window_bounds = array<i64: 1, 128>}, {pipeline_mode = #tpu.pipeline_mode<synchronous>, transform_indices = @transform_3, window_bounds = array<i64: 128, 128>}, {pipeline_mode = #tpu.pipeline_mode<synchronous>, transform_indices = @transform_4, window_bounds = array<i64: 1, 128>}, {transform_indices = @transform_5, window_bounds = array<i64: 2304, 128>}]} {
    %c0 = arith.constant 0 : index
    %c0_0 = arith.constant 0 : index
    %0 = vector.load %arg1[%c0, %c0_0] : memref<2304x128xbf16, #tpu.memory_space<vmem>>, vector<2304x128xbf16>
    %c0_1 = arith.constant 0 : index
    %c0_2 = arith.constant 0 : index
    %1 = vector.load %arg2[%c0_1, %c0_2] : memref<128x128xbf16, #tpu.memory_space<vmem>>, vector<128x128xbf16>
    %cst = arith.constant dense<0.000000e+00> : vector<2304x128xf32>
    %2 = tpu.matmul %0, %1, %cst {dimension_numbers = #tpu.dot_dimension_numbers<[1], [0], [0], [1], [0, 0, 1, 1], [], []>} : vector<2304x128xbf16>, vector<128x128xbf16>, vector<2304x128xf32> -> vector<2304x128xf32>
    %c0_3 = arith.constant 0 : index
    %c0_4 = arith.constant 0 : index
    %3 = vector.load %arg3[%c0_3, %c0_4] : memref<1x128xf32, #tpu.memory_space<vmem>>, vector<1x128xf32>
    %4 = vector.broadcast %3 : vector<1x128xf32> to vector<2304x128xf32>
    %5 = arith.addf %2, %4 : vector<2304x128xf32>
    %cst_5 = arith.constant 0.000000e+00 : f32
    %6 = vector.broadcast %cst_5 : f32 to vector<2304x128xf32>
    %7 = arith.maximumf %5, %6 : vector<2304x128xf32>
    %8 = arith.truncf %7 : vector<2304x128xf32> to vector<2304x128xbf16>
    %c0_6 = arith.constant 0 : index
    %c0_7 = arith.constant 0 : index
    %9 = vector.load %arg4[%c0_6, %c0_7] : memref<128x128xbf16, #tpu.memory_space<vmem>>, vector<128x128xbf16>
    %cst_8 = arith.constant dense<0.000000e+00> : vector<2304x128xf32>
    %10 = tpu.matmul %8, %9, %cst_8 {dimension_numbers = #tpu.dot_dimension_numbers<[1], [0], [0], [1], [0, 0, 1, 1], [], []>} : vector<2304x128xbf16>, vector<128x128xbf16>, vector<2304x128xf32> -> vector<2304x128xf32>
    %c0_9 = arith.constant 0 : index
    %c0_10 = arith.constant 0 : index
    %11 = vector.load %arg5[%c0_9, %c0_10] : memref<1x128xf32, #tpu.memory_space<vmem>>, vector<1x128xf32>
    %12 = vector.broadcast %11 : vector<1x128xf32> to vector<2304x128xf32>
    %13 = arith.addf %10, %12 : vector<2304x128xf32>
    %c0_11 = arith.constant 0 : index
    %c0_12 = arith.constant 0 : index
    %14 = vector.load %arg6[%c0_11, %c0_12] : memref<2304x128xf32, #tpu.memory_space<vmem>>, vector<2304x128xf32>
    tpu.vector_store %arg6[%c0_11, %c0_12], %13 {strides = array<i32>} : memref<2304x128xf32, #tpu.memory_space<vmem>>, vector<2304x128xf32>,
    return
  }
  func.func @transform_0(%arg0: i32) -> (i32, i32) {
    %c0_i32 = arith.constant 0 : i32
    %c0_i32_0 = arith.constant 0 : i32
    return %arg0, %c0_i32 : i32, i32
  }
  func.func @transform_1(%arg0: i32) -> (i32, i32) {
    %c0_i32 = arith.constant 0 : i32
    %c0_i32_0 = arith.constant 0 : i32
    %c0_i32_1 = arith.constant 0 : i32
    return %c0_i32, %c0_i32_0 : i32, i32
  }
  func.func @transform_2(%arg0: i32) -> (i32, i32) {
    %c0_i32 = arith.constant 0 : i32
    %c0_i32_0 = arith.constant 0 : i32
    %c0_i32_1 = arith.constant 0 : i32
    return %c0_i32, %c0_i32_0 : i32, i32
  }
  func.func @transform_3(%arg0: i32) -> (i32, i32) {
    %c0_i32 = arith.constant 0 : i32
    %c0_i32_0 = arith.constant 0 : i32
    %c0_i32_1 = arith.constant 0 : i32
    return %c0_i32, %c0_i32_0 : i32, i32
  }
  func.func @transform_4(%arg0: i32) -> (i32, i32) {
    %c0_i32 = arith.constant 0 : i32
    %c0_i32_0 = arith.constant 0 : i32
    %c0_i32_1 = arith.constant 0 : i32
    return %c0_i32, %c0_i32_0 : i32, i32
  }
  func.func @transform_5(%arg0: i32) -> (i32, i32) {
    %c0_i32 = arith.constant 0 : i32
    %c0_i32_0 = arith.constant 0 : i32
    return %arg0, %c0_i32 : i32, i32
  }
}

</mosaic_0001>

<bundles_post_ra>
// kernel: tile.62
= control target key start
LH: loop header
LB: loop body
LE: loop exit
PB: predicated region body
PF: predicated region fallthrough
CT: control target
= control target key end

     0   :  { %s22_s0 = inlined_call_operand.vmem [shape: f32[32], index: 0, kind: input, shape index: {}]   ;;  %s23_s1 = inlined_call_operand.vmem [shape: f32[4,32], index: 1, kind: output, shape index: {}]  }
   0x1   :  { %v4_v0 = vld [vmem:[%s22_s0] ss:$0 sm:$0xff] }
   0x2   :  { %5 = vst [vmem:[%s23_s1] sm:$0xf] %v4_v0 }

// kernel: tile.68
= control target key start
LH: loop header
LB: loop body
LE: loop exit
PB: predicated region body
PF: predicated region fallthrough
CT: control target
= control target key end

     0   :  { %vm7_vm0 = vcmask 261120   ;;  %s37_s8 = smov 32   ;;  %s38_s9 = smov 64   ;;  %vm13_vm1 = vcmask 1048320   ;;  %vm19_vm2 = vcmask 785920   ;;  %vm25_vm3 = vcmask 523520   ;;  %s55_s0 = inlined_call_operand.vmem [shape: f32[4,32], index: 0, kind: input, shape index: {}]   ;;  %s56_s1 = inlined_call_operand.vmem [shape: f32[1,128], index: 1, kind: output, shape index: {}]  }
   0x1   :  { %v4_v0 = vld [vmem:[%s55_s0] sm:$0xf]  ;;  %s36_s0 = smov 96  }
   0x2   :  { %5 = vst [vmem:[#allocation1] sm:$0xf] %v4_v0 }
   0x9   :  { %v10_v1 = vld [vmem:[#allocation1 + $0x3] sm:$0x1]   ;;  %v22_v2 = vld [vmem:[#allocation1 + $0x1] sm:$0x1]   ;;  %v6_v3 = vld [vmem:[#allocation1] sm:$0x1]  }
   0xa   :  { %11 = vrot.lane.b32.xlu0 %v10_v1, %s36_s0  ;;  %23 = vrot.lane.b32.xlu1 %v22_v2, %s37_s8  ;;  %v16_v4 = vld [vmem:[#allocation1 + $0x2] sm:$0x1]   ;;  %8 = vst.msk [vmem:[#allocation0] sm:$0x1] %vm7_vm0, %v6_v3  }
   0xe   :  { %17 = vrot.lane.b32.xlu0 %v16_v4, %s38_s9 }
  0x7c   :  { %v12_v5 = vpop.permute.xlu0 %11   ;;  %v24_v6 = vpop.permute.xlu1 %23  }
  0x7d   :  { %14 = vst.msk [vmem:[#allocation0] sm:$0x1] %vm13_vm1, %v12_v5  }
  0x80   :  { %v18_v7 = vpop.permute.xlu0 %17  }
  0x81   :  { %20 = vst.msk [vmem:[#allocation0] sm:$0x1] %vm19_vm2, %v18_v7  }
  0x82   :  { %26 = vst.msk [vmem:[#allocation0] sm:$0x1] %vm25_vm3, %v24_v6  }
  0x89   :  { %v30_v8 = vld [vmem:[#allocation0] sm:$0x1] }
  0x8a   :  { %32 = vst [vmem:[%s56_s1] sm:$0x1] %v30_v8 }

// kernel: mul.33
= control target key start
LH: loop header
LB: loop body
LE: loop exit
PB: predicated region body
PF: predicated region fallthrough
CT: control target
= control target key end

     0   :  { %vm7_vm0 = vcmask 261120   ;;  %s37_s8 = smov 32   ;;  %s38_s9 = smov 64   ;;  %vm13_vm1 = vcmask 1048320   ;;  %vm19_vm2 = vcmask 785920   ;;  %vm25_vm3 = vcmask 523520   ;;  %s55_s0 = inlined_call_operand.vmem [shape: f32[4,32], index: 0, kind: input, shape index: {}]   ;;  %s56_s1 = inlined_call_operand.vmem [shape: f32[128], index: 1, kind: output, shape index: {}]  }
   0x1   :  { %v4_v0 = vld [vmem:[%s55_s0] sm:$0xf]  ;;  %s36_s0 = smov 96  }
   0x2   :  { %5 = vst [vmem:[#allocation1] sm:$0xf] %v4_v0 }
   0x9   :  { %v10_v1 = vld [vmem:[#allocation1 + $0x3] sm:$0x1]   ;;  %v22_v2 = vld [vmem:[#allocation1 + $0x1] sm:$0x1]   ;;  %v6_v3 = vld [vmem:[#allocation1] sm:$0x1]  }
   0xa   :  { %11 = vrot.lane.b32.xlu0 %v10_v1, %s36_s0  ;;  %23 = vrot.lane.b32.xlu1 %v22_v2, %s37_s8  ;;  %v16_v4 = vld [vmem:[#allocation1 + $0x2] sm:$0x1]   ;;  %8 = vst.msk [vmem:[#allocation0] sm:$0x1] %vm7_vm0, %v6_v3  }
   0xe   :  { %17 = vrot.lane.b32.xlu0 %v16_v4, %s38_s9 }
  0x7c   :  { %v12_v5 = vpop.permute.xlu0 %11   ;;  %v24_v6 = vpop.permute.xlu1 %23  }
  0x7d   :  { %14 = vst.msk [vmem:[#allocation0] sm:$0x1] %vm13_vm1, %v12_v5  }
  0x80   :  { %v18_v7 = vpop.permute.xlu0 %17  }
  0x81   :  { %20 = vst.msk [vmem:[#allocation0] sm:$0x1] %vm19_vm2, %v18_v7  }
  0x82   :  { %26 = vst.msk [vmem:[#allocation0] sm:$0x1] %vm25_vm3, %v24_v6  }
  0x89   :  { %v30_v8 = vld [vmem:[#allocation0] sm:$0x1] }
  0x8a   :  { %32 = vst [vmem:[%s56_s1] sm:$0x1] %v30_v8 }

// kernel: heatmap3d_head_forward.3
= control target key start
LH: loop header
LB: loop body
LE: loop exit
PB: predicated region body
PF: predicated region fallthrough
CT: control target
= control target key end

     0   :  { %v650_v0 = vmov 0.0   ;;  %vm651_vm0 = vmmov 0   ;;  %vm131_vm1 = vcmask 523264   ;;  %s799_s1 = inlined_call_operand.vmem [shape: bf16[64,128], index: 1, kind: input, shape index: {}]   ;;  %s800_s0 = inlined_call_operand.vmem [shape: bf16[176,64], index: 0, kind: input, shape index: {}]   ;;  %s801_s2 = inlined_call_operand.vmem [shape: f32[1,128], index: 2, kind: input, shape index: {}]   ;;  %s802_s3 = inlined_call_operand.vmem [shape: bf16[176,128], index: 3, kind: output, shape index: {}]  }
   0x1   :  { %573 = vmatprep.subr.bf16.mxu0 %v650_v0  ;;  %v635_v1 = vld [vmem:[%s799_s1] sm:$0xff]   ;;  %625 = vmatprep.subr.bf16.mxu1 %v650_v0  ;;  %v636_v2 = vld [vmem:[%s799_s1 + $0x8] sm:$0xff]   ;;  %v637_v3 = vld [vmem:[%s799_s1 + $0x10] sm:$0xff]  }
   0x2   :  { %581 = vmatprep.mubr.msk.bf16.mxu0 %vm651_vm0, %v650_v0  ;;  %605 = vmatprep.mubr.msk.bf16.mxu1 %vm651_vm0, %v650_v0  ;;  %v638_v4 = vld [vmem:[%s799_s1 + $0x18] sm:$0xff]   ;;  %v639_v5 = vld [vmem:[%s800_s0] sm:$0xff]   ;;  %v640_v6 = vld [vmem:[%s800_s0 + $0x30] sm:$0xff]  }
   0x3   :  { %574 = vmatpush3.bf16.msra.mxu0 %v635_v1  ;;  %629 = vmatpush3.bf16.msra.mxu1 %v635_v1  ;;  %v641_v7 = vld [vmem:[%s800_s0 + $0x8] sm:$0xff]   ;;  %v642_v8 = vld [vmem:[%s800_s0 + $0x38] sm:$0xff]   ;;  %v643_v9 = vld [vmem:[%s800_s0 + $0x10] sm:$0xff]  }
   0x4   :  { %575 = vmatprep.subr.bf16.mxu0 %v650_v0  ;;  %626 = vmatprep.subr.bf16.mxu1 %v650_v0  ;;  %v644_v10 = vld [vmem:[%s800_s0 + $0x40] sm:$0xff]   ;;  %v645_v11 = vld [vmem:[%s800_s0 + $0x18] sm:$0xff]   ;;  %v646_v12 = vld [vmem:[%s800_s0 + $0x48] sm:$0xff]  }
   0x5   :  { %v647_v13 = vld [vmem:[%s800_s0 + $0x20] sm:$0xff]   ;;  %v648_v14 = vld [vmem:[%s800_s0 + $0x50] sm:$0xff]   ;;  %v649_v15 = vld [vmem:[%s800_s0 + $0x28] sm:$0xff]  }
   0x6   :  { %v742_v16 = vld [vmem:[%s801_s2] ss:$0 sm:$0xff] }
   0x7   :  { %576 = vmatpush3.bf16.msra.mxu0 %v636_v2  ;;  %630 = vmatpush3.bf16.msra.mxu1 %v636_v2 }
   0x8   :  { %577 = vmatprep.subr.bf16.mxu0 %v650_v0  ;;  %627 = vmatprep.subr.bf16.mxu1 %v650_v0 }
   0xb   :  { %578 = vmatpush3.bf16.msra.mxu0 %v637_v3  ;;  %631 = vmatpush3.bf16.msra.mxu1 %v637_v3 }
   0xc   :  { %579 = vmatprep.subr.bf16.mxu0 %v650_v0  ;;  %628 = vmatprep.subr.bf16.mxu1 %v650_v0 }
   0xf   :  { %580 = vmatpush3.bf16.msra.mxu0 %v638_v4  ;;  %632 = vmatpush3.bf16.msra.mxu1 %v638_v4 }
  0x12   :  { %582 = vmatmul.mubr.msk.bf16.vlgmr.msra.gmra.mrb[0].mxu0 %vm131_vm1, %v639_v5  ;;  %606 = vmatmul.mubr.msk.bf16.vlgmr.msra.gmra.mrb[0].mxu1 %vm131_vm1, %v640_v6 }
  0x13   :  { %585 = vmatprep.mubr.msk.bf16.mxu0 %vm651_vm0, %v650_v0  ;;  %609 = vmatprep.mubr.msk.bf16.mxu1 %vm651_vm0, %v650_v0 }
  0x1a   :  { %586 = vmatmul.mubr.msk.bf16.gmra.mrb[4].mxu0 %vm131_vm1, %v641_v7  ;;  %610 = vmatmul.mubr.msk.bf16.gmra.mrb[4].mxu1 %vm131_vm1, %v642_v8 }
  0x1b   :  { %589 = vmatprep.mubr.msk.bf16.mxu0 %vm651_vm0, %v650_v0  ;;  %613 = vmatprep.mubr.msk.bf16.mxu1 %vm651_vm0, %v650_v0 }
  0x22   :  { %590 = vmatmul.mubr.msk.bf16.gmra.mrb[8].mxu0 %vm131_vm1, %v643_v9  ;;  %614 = vmatmul.mubr.msk.bf16.gmra.mrb[8].mxu1 %vm131_vm1, %v644_v10 }
  0x23   :  { %593 = vmatprep.mubr.msk.bf16.mxu0 %vm651_vm0, %v650_v0  ;;  %617 = vmatprep.mubr.msk.bf16.mxu1 %vm651_vm0, %v650_v0 }
  0x2a   :  { %594 = vmatmul.mubr.msk.bf16.gmra.mrb[12].mxu0 %vm131_vm1, %v645_v11  ;;  %618 = vmatmul.mubr.msk.bf16.gmra.mrb[12].mxu1 %vm131_vm1, %v646_v12 }
  0x2b   :  { %597 = vmatprep.mubr.msk.bf16.mxu0 %vm651_vm0, %v650_v0  ;;  %621 = vmatprep.mubr.msk.bf16.mxu1 %vm651_vm0, %v650_v0 }
  0x32   :  { %598 = vmatmul.mubr.msk.bf16.gmra.mrb[16].mxu0 %vm131_vm1, %v647_v13  ;;  %622 = vmatmul.mubr.msk.bf16.gmra.mrb[16].mxu1 %vm131_vm1, %v648_v14 }
  0x33   :  { %601 = vmatprep.mubr.msk.bf16.mxu0 %vm651_vm0, %v650_v0 }
  0x3a   :  { %602 = vmatmul.mubr.msk.bf16.gmra.mrb[20].mxu0 %vm131_vm1, %v649_v15 }
  0xe5   :  { %v199_v17 = vpop.f32.mrb[0].mxu0  ;;  %v247_v18 = vpop.f32.mrb[0].mxu1 }
  0xe6   :  { %v200_v19 = vadd.f32 %v742_v16, %v199_v17  ;;  %v583_v20 = vpop.f32.mrb[1].mxu0  ;;  %v248_v21 = vadd.f32 %v742_v16, %v247_v18  ;;  %v607_v22 = vpop.f32.mrb[1].mxu1 }
  0xe7   :  { %v202_v23 = vpop.f32.mrb[2].mxu0  ;;  %v250_v24 = vpop.f32.mrb[2].mxu1 }
  0xe8   :  { %v203_v25 = vadd.f32 %v742_v16, %v202_v23  ;;  %v584_v26 = vpop.f32.mrb[3].mxu0  ;;  %v298_v27 = vmax.f32 %v248_v21, 0.0  ;;  %v251_v28 = vadd.f32 %v742_v16, %v250_v24  ;;  %v608_v29 = vpop.f32.mrb[3].mxu1  ;;  %v286_v30 = vmax.f32 %v200_v19, 0.0 }
  0xea   :  { %v287_v31 = vmax.f32 %v203_v25, 0.0  ;;  %v299_v32 = vmax.f32 %v251_v28, 0.0 }
  0xec   :  { %v496_v33 = vpack.c.bf16 %v287_v31, %v286_v30  ;;  %v526_v34 = vpack.c.bf16 %v299_v32, %v298_v27 }
  0xed   :  { %v207_v35 = vpop.f32.mrb[4].mxu0  ;;  %v255_v36 = vpop.f32.mrb[4].mxu1 }
  0xee   :  { %497 = vst [vmem:[%s802_s3] sm:$0xff] %v496_v33   ;;  %553 = vst [vmem:[%s802_s3 + $0x30] sm:$0xff] %v526_v34   ;;  %v208_v37 = vadd.f32 %v742_v16, %v207_v35  ;;  %v587_v38 = vpop.f32.mrb[5].mxu0  ;;  %v256_v39 = vadd.f32 %v742_v16, %v255_v36  ;;  %v611_v40 = vpop.f32.mrb[5].mxu1 }
  0xef   :  { %v210_v41 = vpop.f32.mrb[6].mxu0  ;;  %v258_v42 = vpop.f32.mrb[6].mxu1 }
  0xf0   :  { %v211_v43 = vadd.f32 %v742_v16, %v210_v41  ;;  %v588_v44 = vpop.f32.mrb[7].mxu0  ;;  %v300_v45 = vmax.f32 %v256_v39, 0.0  ;;  %v259_v46 = vadd.f32 %v742_v16, %v258_v42  ;;  %v612_v47 = vpop.f32.mrb[7].mxu1  ;;  %v288_v48 = vmax.f32 %v208_v37, 0.0 }
  0xf2   :  { %v289_v49 = vmax.f32 %v211_v43, 0.0  ;;  %v301_v50 = vmax.f32 %v259_v46, 0.0 }
  0xf4   :  { %v501_v51 = vpack.c.bf16 %v289_v49, %v288_v48  ;;  %v531_v52 = vpack.c.bf16 %v301_v50, %v300_v45 }
  0xf5   :  { %v215_v53 = vpop.f32.mrb[8].mxu0  ;;  %v263_v54 = vpop.f32.mrb[8].mxu1 }
  0xf6   :  { %548 = vst [vmem:[%s802_s3 + $0x8] sm:$0xff] %v501_v51   ;;  %554 = vst [vmem:[%s802_s3 + $0x38] sm:$0xff] %v531_v52   ;;  %v216_v55 = vadd.f32 %v742_v16, %v215_v53  ;;  %v591_v56 = vpop.f32.mrb[9].mxu0  ;;  %v264_v57 = vadd.f32 %v742_v16, %v263_v54  ;;  %v615_v58 = vpop.f32.mrb[9].mxu1 }
  0xf7   :  { %v218_v59 = vpop.f32.mrb[10].mxu0  ;;  %v266_v60 = vpop.f32.mrb[10].mxu1 }
  0xf8   :  { %v219_v61 = vadd.f32 %v742_v16, %v218_v59  ;;  %v592_v62 = vpop.f32.mrb[11].mxu0  ;;  %v302_v63 = vmax.f32 %v264_v57, 0.0  ;;  %v267_v0 = vadd.f32 %v742_v16, %v266_v60  ;;  %v616_v1 = vpop.f32.mrb[11].mxu1  ;;  %v290_v2 = vmax.f32 %v216_v55, 0.0 }
  0xfa   :  { %v291_v3 = vmax.f32 %v219_v61, 0.0  ;;  %v303_v4 = vmax.f32 %v267_v0, 0.0 }
  0xfc   :  { %v506_v5 = vpack.c.bf16 %v291_v3, %v290_v2  ;;  %v536_v6 = vpack.c.bf16 %v303_v4, %v302_v63 }
  0xfd   :  { %v223_v7 = vpop.f32.mrb[12].mxu0  ;;  %v271_v8 = vpop.f32.mrb[12].mxu1 }
  0xfe   :  { %549 = vst [vmem:[%s802_s3 + $0x10] sm:$0xff] %v506_v5   ;;  %555 = vst [vmem:[%s802_s3 + $0x40] sm:$0xff] %v536_v6   ;;  %v224_v9 = vadd.f32 %v742_v16, %v223_v7  ;;  %v595_v10 = vpop.f32.mrb[13].mxu0  ;;  %v272_v11 = vadd.f32 %v742_v16, %v271_v8  ;;  %v619_v12 = vpop.f32.mrb[13].mxu1 }
  0xff   :  { %v226_v13 = vpop.f32.mrb[14].mxu0  ;;  %v274_v14 = vpop.f32.mrb[14].mxu1 }
 0x100   :  { %v227_v15 = vadd.f32 %v742_v16, %v226_v13  ;;  %v596_v17 = vpop.f32.mrb[15].mxu0  ;;  %v304_v18 = vmax.f32 %v272_v11, 0.0  ;;  %v275_v19 = vadd.f32 %v742_v16, %v274_v14  ;;  %v620_v20 = vpop.f32.mrb[15].mxu1  ;;  %v292_v21 = vmax.f32 %v224_v9, 0.0 }
 0x102   :  { %v293_v22 = vmax.f32 %v227_v15, 0.0  ;;  %v305_v23 = vmax.f32 %v275_v19, 0.0 }
 0x104   :  { %v511_v24 = vpack.c.bf16 %v293_v22, %v292_v21  ;;  %v541_v25 = vpack.c.bf16 %v305_v23, %v304_v18 }
 0x105   :  { %v231_v26 = vpop.f32.mrb[16].mxu0  ;;  %v279_v27 = vpop.f32.mrb[16].mxu1 }
 0x106   :  { %550 = vst [vmem:[%s802_s3 + $0x18] sm:$0xff] %v511_v24   ;;  %556 = vst [vmem:[%s802_s3 + $0x48] sm:$0xff] %v541_v25   ;;  %v232_v28 = vadd.f32 %v742_v16, %v231_v26  ;;  %v599_v29 = vpop.f32.mrb[17].mxu0  ;;  %v280_v30 = vadd.f32 %v742_v16, %v279_v27  ;;  %v623_v31 = vpop.f32.mrb[17].mxu1 }
 0x107   :  { %v234_v32 = vpop.f32.mrb[18].mxu0  ;;  %v282_v33 = vpop.f32.mrb[18].mxu1 }
 0x108   :  { %v235_v34 = vadd.f32 %v742_v16, %v234_v32  ;;  %v600_v35 = vpop.f32.mrb[19].mxu0  ;;  %v306_v36 = vmax.f32 %v280_v30, 0.0  ;;  %v283_v37 = vadd.f32 %v742_v16, %v282_v33  ;;  %v624_v38 = vpop.f32.mrb[19].mxu1  ;;  %v294_v39 = vmax.f32 %v232_v28, 0.0 }
 0x10a   :  { %v295_v40 = vmax.f32 %v235_v34, 0.0  ;;  %v307_v41 = vmax.f32 %v283_v37, 0.0 }
 0x10c   :  { %v516_v42 = vpack.c.bf16 %v295_v40, %v294_v39  ;;  %v546_v43 = vpack.c.bf16 %v307_v41, %v306_v36 }
 0x10d   :  { %v239_v44 = vpop.f32.mrb[20].mxu0 }
 0x10e   :  { %551 = vst [vmem:[%s802_s3 + $0x20] sm:$0xff] %v516_v42   ;;  %557 = vst [vmem:[%s802_s3 + $0x50] sm:$0xff] %v546_v43   ;;  %v240_v45 = vadd.f32 %v742_v16, %v239_v44  ;;  %v603_v46 = vpop.f32.mrb[21].mxu0 }
 0x10f   :  { %v242_v47 = vpop.f32.mrb[22].mxu0 }
 0x110   :  { %v243_v48 = vadd.f32 %v742_v16, %v242_v47  ;;  %v604_v49 = vpop.f32.mrb[23].mxu0  ;;  %v296_v50 = vmax.f32 %v240_v45, 0.0 }
 0x112   :  { %v297_v51 = vmax.f32 %v243_v48, 0.0 }
 0x114   :  { %v521_v52 = vpack.c.bf16 %v297_v51, %v296_v50 }
 0x116   :  { %552 = vst [vmem:[%s802_s3 + $0x28] sm:$0xff] %v521_v52  }

// kernel: heatmap3d_head_forward.4
= control target key start
LH: loop header
LB: loop body
LE: loop exit
PB: predicated region body
PF: predicated region fallthrough
CT: control target
= control target key end

     0   :  { %s2676_s1 = inlined_call_operand.vmem [shape: bf16[128,128], index: 1, kind: input, shape index: {}]   ;;  %s2677_s0 = inlined_call_operand.vmem [shape: bf16[768,128], index: 0, kind: input, shape index: {}]   ;;  %s2678_s2 = inlined_call_operand.vmem [shape: f32[1,128], index: 2, kind: input, shape index: {}]   ;;  %s2679_s3 = inlined_call_operand.vmem [shape: bf16[768,128], index: 3, kind: output, shape index: {}]  }
   0x1   :  { %v2187_v0 = vld [vmem:[%s2676_s1] sm:$0xff]   ;;  %v2188_v1 = vld [vmem:[%s2676_s1 + $0x8] sm:$0xff]   ;;  %v2189_v2 = vld [vmem:[%s2676_s1 + $0x10] sm:$0xff]  }
   0x2   :  { %2059 = vmatprep.subr.bf16.mxu0 %v2187_v0  ;;  %2171 = vmatprep.subr.bf16.mxu1 %v2187_v0  ;;  %v2190_v3 = vld [vmem:[%s2676_s1 + $0x18] sm:$0xff]   ;;  %v2195_v4 = vld [vmem:[%s2677_s0] sm:$0xff]   ;;  %v2192_v7 = vld [vmem:[%s2676_s1 + $0x28] sm:$0xff]  }
   0x3   :  { %2060 = vmatpush3.bf16.msra.mxu0 %v2187_v0  ;;  %2179 = vmatpush3.bf16.msra.mxu1 %v2187_v0  ;;  %v2196_v5 = vld [vmem:[%s2677_s0 + $0xc0] sm:$0xff]   ;;  %v2193_v8 = vld [vmem:[%s2676_s1 + $0x30] sm:$0xff]   ;;  %v2194_v9 = vld [vmem:[%s2676_s1 + $0x38] sm:$0xff]  }
   0x4   :  { %2061 = vmatprep.subr.bf16.mxu0 %v2188_v1  ;;  %2172 = vmatprep.subr.bf16.mxu1 %v2188_v1  ;;  %v2191_v6 = vld [vmem:[%s2676_s1 + $0x20] sm:$0xff]   ;;  %v2197_v10 = vld [vmem:[%s2677_s0 + $0x8] sm:$0xff]   ;;  %v2199_v12 = vld [vmem:[%s2677_s0 + $0x10] sm:$0xff]  }
   0x5   :  { %2075 = vmatprep.mubr.bf16.mxu0 %v2195_v4  ;;  %2123 = vmatprep.mubr.bf16.mxu1 %v2196_v5  ;;  %v2198_v11 = vld [vmem:[%s2677_s0 + $0xc8] sm:$0xff]   ;;  %v2200_v13 = vld [vmem:[%s2677_s0 + $0xd0] sm:$0xff]   ;;  %v2201_v14 = vld [vmem:[%s2677_s0 + $0x18] sm:$0xff]  }
   0x6   :  { %v2202_v15 = vld [vmem:[%s2677_s0 + $0xd8] sm:$0xff]   ;;  %v2203_v16 = vld [vmem:[%s2677_s0 + $0x20] sm:$0xff]   ;;  %v2205_v18 = vld [vmem:[%s2677_s0 + $0x28] sm:$0xff]  }
   0x7   :  { %2062 = vmatpush3.bf16.msra.mxu0 %v2188_v1  ;;  %2180 = vmatpush3.bf16.msra.mxu1 %v2188_v1  ;;  %v2204_v17 = vld [vmem:[%s2677_s0 + $0xe0] sm:$0xff]   ;;  %v2206_v19 = vld [vmem:[%s2677_s0 + $0xe8] sm:$0xff]   ;;  %v2207_v20 = vld [vmem:[%s2677_s0 + $0x30] sm:$0xff]  }
   0x8   :  { %2063 = vmatprep.subr.bf16.mxu0 %v2189_v2  ;;  %2173 = vmatprep.subr.bf16.mxu1 %v2189_v2  ;;  %v2208_v21 = vld [vmem:[%s2677_s0 + $0xf0] sm:$0xff]   ;;  %v2209_v22 = vld [vmem:[%s2677_s0 + $0x38] sm:$0xff]   ;;  %v2211_v24 = vld [vmem:[%s2677_s0 + $0x40] sm:$0xff]  }
   0x9   :  { %v2210_v23 = vld [vmem:[%s2677_s0 + $0xf8] sm:$0xff]   ;;  %v2212_v25 = vld [vmem:[%s2677_s0 + $0x100] sm:$0xff]   ;;  %v2213_v26 = vld [vmem:[%s2677_s0 + $0x48] sm:$0xff]  }
   0xa   :  { %v2214_v27 = vld [vmem:[%s2677_s0 + $0x108] sm:$0xff]   ;;  %v2215_v28 = vld [vmem:[%s2677_s0 + $0x50] sm:$0xff]   ;;  %v2217_v30 = vld [vmem:[%s2677_s0 + $0x58] sm:$0xff]  }
   0xb   :  { %2064 = vmatpush3.bf16.msra.mxu0 %v2189_v2  ;;  %2181 = vmatpush3.bf16.msra.mxu1 %v2189_v2  ;;  %v2216_v29 = vld [vmem:[%s2677_s0 + $0x110] sm:$0xff]   ;;  %v2218_v31 = vld [vmem:[%s2677_s0 + $0x118] sm:$0xff]   ;;  %v2219_v32 = vld [vmem:[%s2677_s0 + $0x60] sm:$0xff]  }
   0xc   :  { %2065 = vmatprep.subr.bf16.mxu0 %v2190_v3  ;;  %2174 = vmatprep.subr.bf16.mxu1 %v2190_v3  ;;  %v2220_v33 = vld [vmem:[%s2677_s0 + $0x120] sm:$0xff]   ;;  %v2221_v34 = vld [vmem:[%s2677_s0 + $0x68] sm:$0xff]   ;;  %v2223_v36 = vld [vmem:[%s2677_s0 + $0x70] sm:$0xff]  }
   0xd   :  { %v2222_v35 = vld [vmem:[%s2677_s0 + $0x128] sm:$0xff]   ;;  %v2224_v37 = vld [vmem:[%s2677_s0 + $0x130] sm:$0xff]   ;;  %v2225_v38 = vld [vmem:[%s2677_s0 + $0x78] sm:$0xff]  }
   0xe   :  { %v2226_v39 = vld [vmem:[%s2677_s0 + $0x138] sm:$0xff]   ;;  %v2227_v40 = vld [vmem:[%s2677_s0 + $0x80] sm:$0xff]   ;;  %v2229_v42 = vld [vmem:[%s2677_s0 + $0x88] sm:$0xff]  }
   0xf   :  { %2066 = vmatpush3.bf16.msra.mxu0 %v2190_v3  ;;  %2182 = vmatpush3.bf16.msra.mxu1 %v2190_v3  ;;  %v2228_v41 = vld [vmem:[%s2677_s0 + $0x140] sm:$0xff]   ;;  %v2230_v43 = vld [vmem:[%s2677_s0 + $0x148] sm:$0xff]   ;;  %v2231_v44 = vld [vmem:[%s2677_s0 + $0x90] sm:$0xff]  }
  0x10   :  { %2067 = vmatprep.subr.bf16.mxu0 %v2191_v6  ;;  %2175 = vmatprep.subr.bf16.mxu1 %v2191_v6  ;;  %v2232_v45 = vld [vmem:[%s2677_s0 + $0x150] sm:$0xff]   ;;  %v2233_v46 = vld [vmem:[%s2677_s0 + $0x98] sm:$0xff]   ;;  %v2235_v48 = vld [vmem:[%s2677_s0 + $0xa0] sm:$0xff]  }
  0x11   :  { %v2234_v47 = vld [vmem:[%s2677_s0 + $0x158] sm:$0xff]   ;;  %v2236_v49 = vld [vmem:[%s2677_s0 + $0x160] sm:$0xff]   ;;  %v2237_v50 = vld [vmem:[%s2677_s0 + $0xa8] sm:$0xff]  }
  0x12   :  { %v2238_v51 = vld [vmem:[%s2677_s0 + $0x168] sm:$0xff]   ;;  %v2239_v52 = vld [vmem:[%s2677_s0 + $0xb0] sm:$0xff]   ;;  %v2241_v54 = vld [vmem:[%s2677_s0 + $0xb8] sm:$0xff]  }
  0x13   :  { %2068 = vmatpush3.bf16.msra.mxu0 %v2191_v6  ;;  %2183 = vmatpush3.bf16.msra.mxu1 %v2191_v6  ;;  %v2240_v53 = vld [vmem:[%s2677_s0 + $0x170] sm:$0xff]   ;;  %v2242_v55 = vld [vmem:[%s2677_s0 + $0x178] sm:$0xff]   ;;  %v2434_v56 = vld [vmem:[%s2678_s2] ss:$0 sm:$0xff] }
  0x14   :  { %2069 = vmatprep.subr.bf16.mxu0 %v2192_v7  ;;  %2176 = vmatprep.subr.bf16.mxu1 %v2192_v7 }
  0x17   :  { %2070 = vmatpush3.bf16.msra.mxu0 %v2192_v7  ;;  %2184 = vmatpush3.bf16.msra.mxu1 %v2192_v7 }
  0x18   :  { %2071 = vmatprep.subr.bf16.mxu0 %v2193_v8  ;;  %2177 = vmatprep.subr.bf16.mxu1 %v2193_v8 }
  0x1b   :  { %2072 = vmatpush3.bf16.msra.mxu0 %v2193_v8  ;;  %2185 = vmatpush3.bf16.msra.mxu1 %v2193_v8 }
  0x1c   :  { %2073 = vmatprep.subr.bf16.mxu0 %v2194_v9  ;;  %2178 = vmatprep.subr.bf16.mxu1 %v2194_v9 }
  0x1f   :  { %2074 = vmatpush3.bf16.msra.mxu0 %v2194_v9  ;;  %2186 = vmatpush3.bf16.msra.mxu1 %v2194_v9 }
  0x22   :  { %2076 = vmatmul.mubr.bf16.vlgmr.msra.gmra.mrb[0].mxu0 %v2197_v10  ;;  %2124 = vmatmul.mubr.bf16.vlgmr.msra.gmra.mrb[0].mxu1 %v2198_v11 }
  0x23   :  { %2079 = vmatprep.mubr.bf16.mxu0 %v2199_v12  ;;  %2127 = vmatprep.mubr.bf16.mxu1 %v2200_v13 }
  0x2a   :  { %2080 = vmatmul.mubr.bf16.gmra.mrb[4].mxu0 %v2201_v14  ;;  %2128 = vmatmul.mubr.bf16.gmra.mrb[4].mxu1 %v2202_v15 }
  0x2b   :  { %2083 = vmatprep.mubr.bf16.mxu0 %v2203_v16  ;;  %2131 = vmatprep.mubr.bf16.mxu1 %v2204_v17 }
  0x32   :  { %2084 = vmatmul.mubr.bf16.gmra.mrb[8].mxu0 %v2205_v18  ;;  %2132 = vmatmul.mubr.bf16.gmra.mrb[8].mxu1 %v2206_v19 }
  0x33   :  { %2087 = vmatprep.mubr.bf16.mxu0 %v2207_v20  ;;  %2135 = vmatprep.mubr.bf16.mxu1 %v2208_v21 }
  0x3a   :  { %2088 = vmatmul.mubr.bf16.gmra.mrb[12].mxu0 %v2209_v22  ;;  %2136 = vmatmul.mubr.bf16.gmra.mrb[12].mxu1 %v2210_v23 }
  0x3b   :  { %2091 = vmatprep.mubr.bf16.mxu0 %v2211_v24  ;;  %2139 = vmatprep.mubr.bf16.mxu1 %v2212_v25 }
  0x42   :  { %2092 = vmatmul.mubr.bf16.gmra.mrb[16].mxu0 %v2213_v26  ;;  %2140 = vmatmul.mubr.bf16.gmra.mrb[16].mxu1 %v2214_v27 }
  0x43   :  { %2095 = vmatprep.mubr.bf16.mxu0 %v2215_v28  ;;  %2143 = vmatprep.mubr.bf16.mxu1 %v2216_v29 }
  0x4a   :  { %2096 = vmatmul.mubr.bf16.gmra.mrb[20].mxu0 %v2217_v30  ;;  %2144 = vmatmul.mubr.bf16.gmra.mrb[20].mxu1 %v2218_v31 }
  0x4b   :  { %2099 = vmatprep.mubr.bf16.mxu0 %v2219_v32  ;;  %2147 = vmatprep.mubr.bf16.mxu1 %v2220_v33 }
  0x52   :  { %2100 = vmatmul.mubr.bf16.gmra.mrb[24].mxu0 %v2221_v34  ;;  %2148 = vmatmul.mubr.bf16.gmra.mrb[24].mxu1 %v2222_v35 }
  0x53   :  { %2103 = vmatprep.mubr.bf16.mxu0 %v2223_v36  ;;  %2151 = vmatprep.mubr.bf16.mxu1 %v2224_v37 }
  0x5a   :  { %2104 = vmatmul.mubr.bf16.gmra.mrb[28].mxu0 %v2225_v38  ;;  %2152 = vmatmul.mubr.bf16.gmra.mrb[28].mxu1 %v2226_v39 }
  0x5b   :  { %2107 = vmatprep.mubr.bf16.mxu0 %v2227_v40  ;;  %2155 = vmatprep.mubr.bf16.mxu1 %v2228_v41 }
  0x62   :  { %2108 = vmatmul.mubr.bf16.gmra.mrb[32].mxu0 %v2229_v42  ;;  %2156 = vmatmul.mubr.bf16.gmra.mrb[32].mxu1 %v2230_v43 }
  0x63   :  { %2111 = vmatprep.mubr.bf16.mxu0 %v2231_v44  ;;  %2159 = vmatprep.mubr.bf16.mxu1 %v2232_v45 }
  0x6a   :  { %2112 = vmatmul.mubr.bf16.gmra.mrb[36].mxu0 %v2233_v46  ;;  %2160 = vmatmul.mubr.bf16.gmra.mrb[36].mxu1 %v2234_v47 }
  0x6b   :  { %2115 = vmatprep.mubr.bf16.mxu0 %v2235_v48  ;;  %2163 = vmatprep.mubr.bf16.mxu1 %v2236_v49 }
  0x72   :  { %2116 = vmatmul.mubr.bf16.gmra.mrb[40].mxu0 %v2237_v50  ;;  %2164 = vmatmul.mubr.bf16.gmra.mrb[40].mxu1 %v2238_v51 }
  0x73   :  { %2119 = vmatprep.mubr.bf16.mxu0 %v2239_v52  ;;  %2167 = vmatprep.mubr.bf16.mxu1 %v2240_v53 }
  0x7a   :  { %2120 = vmatmul.mubr.bf16.gmra.mrb[44].mxu0 %v2241_v54  ;;  %2168 = vmatmul.mubr.bf16.gmra.mrb[44].mxu1 %v2242_v55 }
  0xf5   :  { %v2077_v57 = vpop.f32.mrb[0].mxu0  ;;  %v2125_v58 = vpop.f32.mrb[0].mxu1 }
  0xf6   :  { %v513_v59 = vadd.f32 %v2077_v57, %v2434_v56  ;;  %v705_v60 = vadd.f32 %v2125_v58, %v2434_v56  ;;  %v504_v61 = vpop.f32.mrb[1].mxu0  ;;  %v696_v62 = vpop.f32.mrb[1].mxu1 }
  0xf7   :  { %v505_v63 = vadd.f32 %v2434_v56, %v504_v61  ;;  %v697_v0 = vadd.f32 %v2434_v56, %v696_v62  ;;  %v2078_v1 = vpop.f32.mrb[2].mxu0  ;;  %v2126_v2 = vpop.f32.mrb[2].mxu1 }
  0xf8   :  { %v516_v3 = vadd.f32 %v2078_v1, %v2434_v56  ;;  %v708_v4 = vadd.f32 %v2126_v2, %v2434_v56  ;;  %v507_v5 = vpop.f32.mrb[3].mxu0  ;;  %v699_v6 = vpop.f32.mrb[3].mxu1  ;;  %v889_v9 = vmax.f32 %v513_v59, 0.0  ;;  %v937_v10 = vmax.f32 %v705_v60, 0.0 }
  0xf9   :  { %v508_v7 = vadd.f32 %v2434_v56, %v507_v5  ;;  %v700_v8 = vadd.f32 %v2434_v56, %v699_v6  ;;  %v887_v13 = vmax.f32 %v505_v63, 0.0  ;;  %v935_v14 = vmax.f32 %v697_v0, 0.0 }
  0xfa   :  { %v890_v11 = vmax.f32 %v516_v3, 0.0  ;;  %v938_v12 = vmax.f32 %v708_v4, 0.0 }
  0xfb   :  { %v888_v15 = vmax.f32 %v508_v7, 0.0  ;;  %v936_v16 = vmax.f32 %v700_v8, 0.0 }
  0xfc   :  { %v1724_v17 = vpack.c.bf16 %v890_v11, %v889_v9  ;;  %v1844_v18 = vpack.c.bf16 %v938_v12, %v937_v10 }
  0xfd   :  { %v1719_v19 = vpack.c.bf16 %v888_v15, %v887_v13  ;;  %v1839_v20 = vpack.c.bf16 %v936_v16, %v935_v14  ;;  %v2081_v21 = vpop.f32.mrb[4].mxu0  ;;  %v2129_v22 = vpop.f32.mrb[4].mxu1 }
  0xfe   :  { %1956 = vst [vmem:[%s2679_s3 + $0x8] sm:$0xff] %v1724_v17   ;;  %1980 = vst [vmem:[%s2679_s3 + $0xc8] sm:$0xff] %v1844_v18   ;;  %v529_v23 = vadd.f32 %v2081_v21, %v2434_v56  ;;  %v721_v24 = vadd.f32 %v2129_v22, %v2434_v56  ;;  %v520_v25 = vpop.f32.mrb[5].mxu0  ;;  %v712_v26 = vpop.f32.mrb[5].mxu1 }
  0xff   :  { %1720 = vst [vmem:[%s2679_s3] sm:$0xff] %v1719_v19   ;;  %1979 = vst [vmem:[%s2679_s3 + $0xc0] sm:$0xff] %v1839_v20   ;;  %v521_v27 = vadd.f32 %v2434_v56, %v520_v25  ;;  %v713_v28 = vadd.f32 %v2434_v56, %v712_v26  ;;  %v2082_v29 = vpop.f32.mrb[6].mxu0  ;;  %v2130_v30 = vpop.f32.mrb[6].mxu1 }
 0x100   :  { %v532_v31 = vadd.f32 %v2082_v29, %v2434_v56  ;;  %v724_v32 = vadd.f32 %v2130_v30, %v2434_v56  ;;  %v523_v33 = vpop.f32.mrb[7].mxu0  ;;  %v715_v34 = vpop.f32.mrb[7].mxu1  ;;  %v893_v37 = vmax.f32 %v529_v23, 0.0  ;;  %v941_v38 = vmax.f32 %v721_v24, 0.0 }
 0x101   :  { %v524_v35 = vadd.f32 %v2434_v56, %v523_v33  ;;  %v716_v36 = vadd.f32 %v2434_v56, %v715_v34  ;;  %v891_v41 = vmax.f32 %v521_v27, 0.0  ;;  %v939_v42 = vmax.f32 %v713_v28, 0.0 }
 0x102   :  { %v894_v39 = vmax.f32 %v532_v31, 0.0  ;;  %v942_v40 = vmax.f32 %v724_v32, 0.0 }
 0x103   :  { %v892_v43 = vmax.f32 %v524_v35, 0.0  ;;  %v940_v44 = vmax.f32 %v716_v36, 0.0 }
 0x104   :  { %v1734_v45 = vpack.c.bf16 %v894_v39, %v893_v37  ;;  %v1854_v46 = vpack.c.bf16 %v942_v40, %v941_v38 }
 0x105   :  { %v1729_v47 = vpack.c.bf16 %v892_v43, %v891_v41  ;;  %v1849_v48 = vpack.c.bf16 %v940_v44, %v939_v42  ;;  %v2085_v49 = vpop.f32.mrb[8].mxu0  ;;  %v2133_v50 = vpop.f32.mrb[8].mxu1 }
 0x106   :  { %1958 = vst [vmem:[%s2679_s3 + $0x18] sm:$0xff] %v1734_v45   ;;  %1982 = vst [vmem:[%s2679_s3 + $0xd8] sm:$0xff] %v1854_v46   ;;  %v545_v51 = vadd.f32 %v2085_v49, %v2434_v56  ;;  %v737_v52 = vadd.f32 %v2133_v50, %v2434_v56  ;;  %v536_v53 = vpop.f32.mrb[9].mxu0  ;;  %v728_v54 = vpop.f32.mrb[9].mxu1 }
 0x107   :  { %1957 = vst [vmem:[%s2679_s3 + $0x10] sm:$0xff] %v1729_v47   ;;  %1981 = vst [vmem:[%s2679_s3 + $0xd0] sm:$0xff] %v1849_v48   ;;  %v537_v55 = vadd.f32 %v2434_v56, %v536_v53  ;;  %v729_v57 = vadd.f32 %v2434_v56, %v728_v54  ;;  %v2086_v58 = vpop.f32.mrb[10].mxu0  ;;  %v2134_v59 = vpop.f32.mrb[10].mxu1 }
 0x108   :  { %v548_v60 = vadd.f32 %v2086_v58, %v2434_v56  ;;  %v740_v61 = vadd.f32 %v2134_v59, %v2434_v56  ;;  %v539_v62 = vpop.f32.mrb[11].mxu0  ;;  %v731_v63 = vpop.f32.mrb[11].mxu1  ;;  %v897_v2 = vmax.f32 %v545_v51, 0.0  ;;  %v945_v3 = vmax.f32 %v737_v52, 0.0 }
 0x109   :  { %v540_v0 = vadd.f32 %v2434_v56, %v539_v62  ;;  %v732_v1 = vadd.f32 %v2434_v56, %v731_v63  ;;  %v895_v6 = vmax.f32 %v537_v55, 0.0  ;;  %v943_v7 = vmax.f32 %v729_v57, 0.0 }
 0x10a   :  { %v898_v4 = vmax.f32 %v548_v60, 0.0  ;;  %v946_v5 = vmax.f32 %v740_v61, 0.0 }
 0x10b   :  { %v896_v8 = vmax.f32 %v540_v0, 0.0  ;;  %v944_v9 = vmax.f32 %v732_v1, 0.0 }
 0x10c   :  { %v1744_v10 = vpack.c.bf16 %v898_v4, %v897_v2  ;;  %v1864_v11 = vpack.c.bf16 %v946_v5, %v945_v3 }
 0x10d   :  { %v1739_v12 = vpack.c.bf16 %v896_v8, %v895_v6  ;;  %v1859_v13 = vpack.c.bf16 %v944_v9, %v943_v7  ;;  %v2089_v14 = vpop.f32.mrb[12].mxu0  ;;  %v2137_v15 = vpop.f32.mrb[12].mxu1 }
 0x10e   :  { %1960 = vst [vmem:[%s2679_s3 + $0x28] sm:$0xff] %v1744_v10   ;;  %1984 = vst [vmem:[%s2679_s3 + $0xe8] sm:$0xff] %v1864_v11   ;;  %v561_v16 = vadd.f32 %v2089_v14, %v2434_v56  ;;  %v753_v17 = vadd.f32 %v2137_v15, %v2434_v56  ;;  %v552_v18 = vpop.f32.mrb[13].mxu0  ;;  %v744_v19 = vpop.f32.mrb[13].mxu1 }
 0x10f   :  { %1959 = vst [vmem:[%s2679_s3 + $0x20] sm:$0xff] %v1739_v12   ;;  %1983 = vst [vmem:[%s2679_s3 + $0xe0] sm:$0xff] %v1859_v13   ;;  %v553_v20 = vadd.f32 %v2434_v56, %v552_v18  ;;  %v745_v21 = vadd.f32 %v2434_v56, %v744_v19  ;;  %v2090_v22 = vpop.f32.mrb[14].mxu0  ;;  %v2138_v23 = vpop.f32.mrb[14].mxu1 }
 0x110   :  { %v564_v24 = vadd.f32 %v2090_v22, %v2434_v56  ;;  %v756_v25 = vadd.f32 %v2138_v23, %v2434_v56  ;;  %v555_v26 = vpop.f32.mrb[15].mxu0  ;;  %v747_v27 = vpop.f32.mrb[15].mxu1  ;;  %v901_v30 = vmax.f32 %v561_v16, 0.0  ;;  %v949_v31 = vmax.f32 %v753_v17, 0.0 }
 0x111   :  { %v556_v28 = vadd.f32 %v2434_v56, %v555_v26  ;;  %v748_v29 = vadd.f32 %v2434_v56, %v747_v27  ;;  %v899_v34 = vmax.f32 %v553_v20, 0.0  ;;  %v947_v35 = vmax.f32 %v745_v21, 0.0 }
 0x112   :  { %v902_v32 = vmax.f32 %v564_v24, 0.0  ;;  %v950_v33 = vmax.f32 %v756_v25, 0.0 }
 0x113   :  { %v900_v36 = vmax.f32 %v556_v28, 0.0  ;;  %v948_v37 = vmax.f32 %v748_v29, 0.0 }
 0x114   :  { %v1754_v38 = vpack.c.bf16 %v902_v32, %v901_v30  ;;  %v1874_v39 = vpack.c.bf16 %v950_v33, %v949_v31 }
 0x115   :  { %v1749_v40 = vpack.c.bf16 %v900_v36, %v899_v34  ;;  %v1869_v41 = vpack.c.bf16 %v948_v37, %v947_v35  ;;  %v2093_v42 = vpop.f32.mrb[16].mxu0  ;;  %v2141_v43 = vpop.f32.mrb[16].mxu1 }
 0x116   :  { %1962 = vst [vmem:[%s2679_s3 + $0x38] sm:$0xff] %v1754_v38   ;;  %1986 = vst [vmem:[%s2679_s3 + $0xf8] sm:$0xff] %v1874_v39   ;;  %v577_v44 = vadd.f32 %v2093_v42, %v2434_v56  ;;  %v769_v45 = vadd.f32 %v2141_v43, %v2434_v56  ;;  %v568_v46 = vpop.f32.mrb[17].mxu0  ;;  %v760_v47 = vpop.f32.mrb[17].mxu1 }
 0x117   :  { %1961 = vst [vmem:[%s2679_s3 + $0x30] sm:$0xff] %v1749_v40   ;;  %1985 = vst [vmem:[%s2679_s3 + $0xf0] sm:$0xff] %v1869_v41   ;;  %v569_v48 = vadd.f32 %v2434_v56, %v568_v46  ;;  %v761_v49 = vadd.f32 %v2434_v56, %v760_v47  ;;  %v2094_v50 = vpop.f32.mrb[18].mxu0  ;;  %v2142_v51 = vpop.f32.mrb[18].mxu1 }
 0x118   :  { %v580_v52 = vadd.f32 %v2094_v50, %v2434_v56  ;;  %v772_v53 = vadd.f32 %v2142_v51, %v2434_v56  ;;  %v571_v54 = vpop.f32.mrb[19].mxu0  ;;  %v763_v55 = vpop.f32.mrb[19].mxu1  ;;  %v905_v59 = vmax.f32 %v577_v44, 0.0  ;;  %v953_v60 = vmax.f32 %v769_v45, 0.0 }
 0x119   :  { %v572_v57 = vadd.f32 %v2434_v56, %v571_v54  ;;  %v764_v58 = vadd.f32 %v2434_v56, %v763_v55  ;;  %v903_v63 = vmax.f32 %v569_v48, 0.0  ;;  %v951_v0 = vmax.f32 %v761_v49, 0.0 }
 0x11a   :  { %v906_v61 = vmax.f32 %v580_v52, 0.0  ;;  %v954_v62 = vmax.f32 %v772_v53, 0.0 }
 0x11b   :  { %v904_v1 = vmax.f32 %v572_v57, 0.0  ;;  %v952_v2 = vmax.f32 %v764_v58, 0.0 }
 0x11c   :  { %v1764_v3 = vpack.c.bf16 %v906_v61, %v905_v59  ;;  %v1884_v4 = vpack.c.bf16 %v954_v62, %v953_v60 }
 0x11d   :  { %v1759_v5 = vpack.c.bf16 %v904_v1, %v903_v63  ;;  %v1879_v6 = vpack.c.bf16 %v952_v2, %v951_v0  ;;  %v2097_v7 = vpop.f32.mrb[20].mxu0  ;;  %v2145_v8 = vpop.f32.mrb[20].mxu1 }
 0x11e   :  { %1964 = vst [vmem:[%s2679_s3 + $0x48] sm:$0xff] %v1764_v3   ;;  %1988 = vst [vmem:[%s2679_s3 + $0x108] sm:$0xff] %v1884_v4   ;;  %v593_v9 = vadd.f32 %v2097_v7, %v2434_v56  ;;  %v785_v10 = vadd.f32 %v2145_v8, %v2434_v56  ;;  %v584_v11 = vpop.f32.mrb[21].mxu0  ;;  %v776_v12 = vpop.f32.mrb[21].mxu1 }
 0x11f   :  { %1963 = vst [vmem:[%s2679_s3 + $0x40] sm:$0xff] %v1759_v5   ;;  %1987 = vst [vmem:[%s2679_s3 + $0x100] sm:$0xff] %v1879_v6   ;;  %v585_v13 = vadd.f32 %v2434_v56, %v584_v11  ;;  %v777_v14 = vadd.f32 %v2434_v56, %v776_v12  ;;  %v2098_v15 = vpop.f32.mrb[22].mxu0  ;;  %v2146_v16 = vpop.f32.mrb[22].mxu1 }
 0x120   :  { %v596_v17 = vadd.f32 %v2098_v15, %v2434_v56  ;;  %v788_v18 = vadd.f32 %v2146_v16, %v2434_v56  ;;  %v587_v19 = vpop.f32.mrb[23].mxu0  ;;  %v779_v20 = vpop.f32.mrb[23].mxu1  ;;  %v909_v23 = vmax.f32 %v593_v9, 0.0  ;;  %v957_v24 = vmax.f32 %v785_v10, 0.0 }
 0x121   :  { %v588_v21 = vadd.f32 %v2434_v56, %v587_v19  ;;  %v780_v22 = vadd.f32 %v2434_v56, %v779_v20  ;;  %v907_v27 = vmax.f32 %v585_v13, 0.0  ;;  %v955_v28 = vmax.f32 %v777_v14, 0.0 }
 0x122   :  { %v910_v25 = vmax.f32 %v596_v17, 0.0  ;;  %v958_v26 = vmax.f32 %v788_v18, 0.0 }
 0x123   :  { %v908_v29 = vmax.f32 %v588_v21, 0.0  ;;  %v956_v30 = vmax.f32 %v780_v22, 0.0 }
 0x124   :  { %v1774_v31 = vpack.c.bf16 %v910_v25, %v909_v23  ;;  %v1894_v32 = vpack.c.bf16 %v958_v26, %v957_v24 }
 0x125   :  { %v1769_v33 = vpack.c.bf16 %v908_v29, %v907_v27  ;;  %v1889_v34 = vpack.c.bf16 %v956_v30, %v955_v28  ;;  %v2101_v35 = vpop.f32.mrb[24].mxu0  ;;  %v2149_v36 = vpop.f32.mrb[24].mxu1 }
 0x126   :  { %1966 = vst [vmem:[%s2679_s3 + $0x58] sm:$0xff] %v1774_v31   ;;  %1990 = vst [vmem:[%s2679_s3 + $0x118] sm:$0xff] %v1894_v32   ;;  %v609_v37 = vadd.f32 %v2101_v35, %v2434_v56  ;;  %v801_v38 = vadd.f32 %v2149_v36, %v2434_v56  ;;  %v600_v39 = vpop.f32.mrb[25].mxu0  ;;  %v792_v40 = vpop.f32.mrb[25].mxu1 }
 0x127   :  { %1965 = vst [vmem:[%s2679_s3 + $0x50] sm:$0xff] %v1769_v33   ;;  %1989 = vst [vmem:[%s2679_s3 + $0x110] sm:$0xff] %v1889_v34   ;;  %v601_v41 = vadd.f32 %v2434_v56, %v600_v39  ;;  %v793_v42 = vadd.f32 %v2434_v56, %v792_v40  ;;  %v2102_v43 = vpop.f32.mrb[26].mxu0  ;;  %v2150_v44 = vpop.f32.mrb[26].mxu1 }
 0x128   :  { %v612_v45 = vadd.f32 %v2102_v43, %v2434_v56  ;;  %v804_v46 = vadd.f32 %v2150_v44, %v2434_v56  ;;  %v603_v47 = vpop.f32.mrb[27].mxu0  ;;  %v795_v48 = vpop.f32.mrb[27].mxu1  ;;  %v913_v51 = vmax.f32 %v609_v37, 0.0  ;;  %v961_v52 = vmax.f32 %v801_v38, 0.0 }
 0x129   :  { %v604_v49 = vadd.f32 %v2434_v56, %v603_v47  ;;  %v796_v50 = vadd.f32 %v2434_v56, %v795_v48  ;;  %v911_v55 = vmax.f32 %v601_v41, 0.0  ;;  %v959_v57 = vmax.f32 %v793_v42, 0.0 }
 0x12a   :  { %v914_v53 = vmax.f32 %v612_v45, 0.0  ;;  %v962_v54 = vmax.f32 %v804_v46, 0.0 }
 0x12b   :  { %v912_v58 = vmax.f32 %v604_v49, 0.0  ;;  %v960_v59 = vmax.f32 %v796_v50, 0.0 }
 0x12c   :  { %v1784_v60 = vpack.c.bf16 %v914_v53, %v913_v51  ;;  %v1904_v61 = vpack.c.bf16 %v962_v54, %v961_v52 }
 0x12d   :  { %v1779_v62 = vpack.c.bf16 %v912_v58, %v911_v55  ;;  %v1899_v63 = vpack.c.bf16 %v960_v59, %v959_v57  ;;  %v2105_v0 = vpop.f32.mrb[28].mxu0  ;;  %v2153_v1 = vpop.f32.mrb[28].mxu1 }
 0x12e   :  { %1968 = vst [vmem:[%s2679_s3 + $0x68] sm:$0xff] %v1784_v60   ;;  %1992 = vst [vmem:[%s2679_s3 + $0x128] sm:$0xff] %v1904_v61   ;;  %v625_v2 = vadd.f32 %v2105_v0, %v2434_v56  ;;  %v817_v3 = vadd.f32 %v2153_v1, %v2434_v56  ;;  %v616_v4 = vpop.f32.mrb[29].mxu0  ;;  %v808_v5 = vpop.f32.mrb[29].mxu1 }
 0x12f   :  { %1967 = vst [vmem:[%s2679_s3 + $0x60] sm:$0xff] %v1779_v62   ;;  %1991 = vst [vmem:[%s2679_s3 + $0x120] sm:$0xff] %v1899_v63   ;;  %v617_v6 = vadd.f32 %v2434_v56, %v616_v4  ;;  %v809_v7 = vadd.f32 %v2434_v56, %v808_v5  ;;  %v2106_v8 = vpop.f32.mrb[30].mxu0  ;;  %v2154_v9 = vpop.f32.mrb[30].mxu1 }
 0x130   :  { %v628_v10 = vadd.f32 %v2106_v8, %v2434_v56  ;;  %v820_v11 = vadd.f32 %v2154_v9, %v2434_v56  ;;  %v619_v12 = vpop.f32.mrb[31].mxu0  ;;  %v811_v13 = vpop.f32.mrb[31].mxu1  ;;  %v917_v16 = vmax.f32 %v625_v2, 0.0  ;;  %v965_v17 = vmax.f32 %v817_v3, 0.0 }
 0x131   :  { %v620_v14 = vadd.f32 %v2434_v56, %v619_v12  ;;  %v812_v15 = vadd.f32 %v2434_v56, %v811_v13  ;;  %v915_v20 = vmax.f32 %v617_v6, 0.0  ;;  %v963_v21 = vmax.f32 %v809_v7, 0.0 }
 0x132   :  { %v918_v18 = vmax.f32 %v628_v10, 0.0  ;;  %v966_v19 = vmax.f32 %v820_v11, 0.0 }
 0x133   :  { %v916_v22 = vmax.f32 %v620_v14, 0.0  ;;  %v964_v23 = vmax.f32 %v812_v15, 0.0 }
 0x134   :  { %v1794_v24 = vpack.c.bf16 %v918_v18, %v917_v16  ;;  %v1914_v25 = vpack.c.bf16 %v966_v19, %v965_v17 }
 0x135   :  { %v1789_v26 = vpack.c.bf16 %v916_v22, %v915_v20  ;;  %v1909_v27 = vpack.c.bf16 %v964_v23, %v963_v21  ;;  %v2109_v28 = vpop.f32.mrb[32].mxu0  ;;  %v2157_v29 = vpop.f32.mrb[32].mxu1 }
 0x136   :  { %1970 = vst [vmem:[%s2679_s3 + $0x78] sm:$0xff] %v1794_v24   ;;  %1994 = vst [vmem:[%s2679_s3 + $0x138] sm:$0xff] %v1914_v25   ;;  %v641_v30 = vadd.f32 %v2109_v28, %v2434_v56  ;;  %v833_v31 = vadd.f32 %v2157_v29, %v2434_v56  ;;  %v632_v32 = vpop.f32.mrb[33].mxu0  ;;  %v824_v33 = vpop.f32.mrb[33].mxu1 }
 0x137   :  { %1969 = vst [vmem:[%s2679_s3 + $0x70] sm:$0xff] %v1789_v26   ;;  %1993 = vst [vmem:[%s2679_s3 + $0x130] sm:$0xff] %v1909_v27   ;;  %v633_v34 = vadd.f32 %v2434_v56, %v632_v32  ;;  %v825_v35 = vadd.f32 %v2434_v56, %v824_v33  ;;  %v2110_v36 = vpop.f32.mrb[34].mxu0  ;;  %v2158_v37 = vpop.f32.mrb[34].mxu1 }
 0x138   :  { %v644_v38 = vadd.f32 %v2110_v36, %v2434_v56  ;;  %v836_v39 = vadd.f32 %v2158_v37, %v2434_v56  ;;  %v635_v40 = vpop.f32.mrb[35].mxu0  ;;  %v827_v41 = vpop.f32.mrb[35].mxu1  ;;  %v921_v44 = vmax.f32 %v641_v30, 0.0  ;;  %v969_v45 = vmax.f32 %v833_v31, 0.0 }
 0x139   :  { %v636_v42 = vadd.f32 %v2434_v56, %v635_v40  ;;  %v828_v43 = vadd.f32 %v2434_v56, %v827_v41  ;;  %v919_v48 = vmax.f32 %v633_v34, 0.0  ;;  %v967_v49 = vmax.f32 %v825_v35, 0.0 }
 0x13a   :  { %v922_v46 = vmax.f32 %v644_v38, 0.0  ;;  %v970_v47 = vmax.f32 %v836_v39, 0.0 }
 0x13b   :  { %v920_v50 = vmax.f32 %v636_v42, 0.0  ;;  %v968_v51 = vmax.f32 %v828_v43, 0.0 }
 0x13c   :  { %v1804_v52 = vpack.c.bf16 %v922_v46, %v921_v44  ;;  %v1924_v53 = vpack.c.bf16 %v970_v47, %v969_v45 }
 0x13d   :  { %v1799_v54 = vpack.c.bf16 %v920_v50, %v919_v48  ;;  %v1919_v55 = vpack.c.bf16 %v968_v51, %v967_v49  ;;  %v2113_v57 = vpop.f32.mrb[36].mxu0  ;;  %v2161_v58 = vpop.f32.mrb[36].mxu1 }
 0x13e   :  { %1972 = vst [vmem:[%s2679_s3 + $0x88] sm:$0xff] %v1804_v52   ;;  %1996 = vst [vmem:[%s2679_s3 + $0x148] sm:$0xff] %v1924_v53   ;;  %v657_v59 = vadd.f32 %v2113_v57, %v2434_v56  ;;  %v849_v60 = vadd.f32 %v2161_v58, %v2434_v56  ;;  %v648_v61 = vpop.f32.mrb[37].mxu0  ;;  %v840_v62 = vpop.f32.mrb[37].mxu1 }
 0x13f   :  { %1971 = vst [vmem:[%s2679_s3 + $0x80] sm:$0xff] %v1799_v54   ;;  %1995 = vst [vmem:[%s2679_s3 + $0x140] sm:$0xff] %v1919_v55   ;;  %v649_v63 = vadd.f32 %v2434_v56, %v648_v61  ;;  %v841_v0 = vadd.f32 %v2434_v56, %v840_v62  ;;  %v2114_v1 = vpop.f32.mrb[38].mxu0  ;;  %v2162_v2 = vpop.f32.mrb[38].mxu1 }
 0x140   :  { %v660_v3 = vadd.f32 %v2114_v1, %v2434_v56  ;;  %v852_v4 = vadd.f32 %v2162_v2, %v2434_v56  ;;  %v651_v5 = vpop.f32.mrb[39].mxu0  ;;  %v843_v6 = vpop.f32.mrb[39].mxu1  ;;  %v925_v9 = vmax.f32 %v657_v59, 0.0  ;;  %v973_v10 = vmax.f32 %v849_v60, 0.0 }
 0x141   :  { %v652_v7 = vadd.f32 %v2434_v56, %v651_v5  ;;  %v844_v8 = vadd.f32 %v2434_v56, %v843_v6  ;;  %v923_v13 = vmax.f32 %v649_v63, 0.0  ;;  %v971_v14 = vmax.f32 %v841_v0, 0.0 }
 0x142   :  { %v926_v11 = vmax.f32 %v660_v3, 0.0  ;;  %v974_v12 = vmax.f32 %v852_v4, 0.0 }
 0x143   :  { %v924_v15 = vmax.f32 %v652_v7, 0.0  ;;  %v972_v16 = vmax.f32 %v844_v8, 0.0 }
 0x144   :  { %v1814_v17 = vpack.c.bf16 %v926_v11, %v925_v9  ;;  %v1934_v18 = vpack.c.bf16 %v974_v12, %v973_v10 }
 0x145   :  { %v1809_v19 = vpack.c.bf16 %v924_v15, %v923_v13  ;;  %v1929_v20 = vpack.c.bf16 %v972_v16, %v971_v14  ;;  %v2117_v21 = vpop.f32.mrb[40].mxu0  ;;  %v2165_v22 = vpop.f32.mrb[40].mxu1 }
 0x146   :  { %1974 = vst [vmem:[%s2679_s3 + $0x98] sm:$0xff] %v1814_v17   ;;  %1998 = vst [vmem:[%s2679_s3 + $0x158] sm:$0xff] %v1934_v18   ;;  %v673_v23 = vadd.f32 %v2117_v21, %v2434_v56  ;;  %v865_v24 = vadd.f32 %v2165_v22, %v2434_v56  ;;  %v664_v25 = vpop.f32.mrb[41].mxu0  ;;  %v856_v26 = vpop.f32.mrb[41].mxu1 }
 0x147   :  { %1973 = vst [vmem:[%s2679_s3 + $0x90] sm:$0xff] %v1809_v19   ;;  %1997 = vst [vmem:[%s2679_s3 + $0x150] sm:$0xff] %v1929_v20   ;;  %v665_v27 = vadd.f32 %v2434_v56, %v664_v25  ;;  %v857_v28 = vadd.f32 %v2434_v56, %v856_v26  ;;  %v2118_v29 = vpop.f32.mrb[42].mxu0  ;;  %v2166_v30 = vpop.f32.mrb[42].mxu1 }
 0x148   :  { %v676_v31 = vadd.f32 %v2118_v29, %v2434_v56  ;;  %v868_v32 = vadd.f32 %v2166_v30, %v2434_v56  ;;  %v667_v33 = vpop.f32.mrb[43].mxu0  ;;  %v859_v34 = vpop.f32.mrb[43].mxu1  ;;  %v929_v37 = vmax.f32 %v673_v23, 0.0  ;;  %v977_v38 = vmax.f32 %v865_v24, 0.0 }
 0x149   :  { %v668_v35 = vadd.f32 %v2434_v56, %v667_v33  ;;  %v860_v36 = vadd.f32 %v2434_v56, %v859_v34  ;;  %v927_v41 = vmax.f32 %v665_v27, 0.0  ;;  %v975_v42 = vmax.f32 %v857_v28, 0.0 }
 0x14a   :  { %v930_v39 = vmax.f32 %v676_v31, 0.0  ;;  %v978_v40 = vmax.f32 %v868_v32, 0.0 }
 0x14b   :  { %v928_v43 = vmax.f32 %v668_v35, 0.0  ;;  %v976_v44 = vmax.f32 %v860_v36, 0.0 }
 0x14c   :  { %v1824_v45 = vpack.c.bf16 %v930_v39, %v929_v37  ;;  %v1944_v46 = vpack.c.bf16 %v978_v40, %v977_v38 }
 0x14d   :  { %v1819_v47 = vpack.c.bf16 %v928_v43, %v927_v41  ;;  %v1939_v48 = vpack.c.bf16 %v976_v44, %v975_v42  ;;  %v2121_v49 = vpop.f32.mrb[44].mxu0  ;;  %v2169_v50 = vpop.f32.mrb[44].mxu1 }
 0x14e   :  { %1976 = vst [vmem:[%s2679_s3 + $0xa8] sm:$0xff] %v1824_v45   ;;  %2000 = vst [vmem:[%s2679_s3 + $0x168] sm:$0xff] %v1944_v46   ;;  %v689_v51 = vadd.f32 %v2121_v49, %v2434_v56  ;;  %v881_v52 = vadd.f32 %v2169_v50, %v2434_v56  ;;  %v680_v53 = vpop.f32.mrb[45].mxu0  ;;  %v872_v54 = vpop.f32.mrb[45].mxu1 }
 0x14f   :  { %1975 = vst [vmem:[%s2679_s3 + $0xa0] sm:$0xff] %v1819_v47   ;;  %1999 = vst [vmem:[%s2679_s3 + $0x160] sm:$0xff] %v1939_v48   ;;  %v681_v55 = vadd.f32 %v2434_v56, %v680_v53  ;;  %v873_v57 = vadd.f32 %v2434_v56, %v872_v54  ;;  %v2122_v58 = vpop.f32.mrb[46].mxu0  ;;  %v2170_v59 = vpop.f32.mrb[46].mxu1 }
 0x150   :  { %v692_v60 = vadd.f32 %v2122_v58, %v2434_v56  ;;  %v884_v61 = vadd.f32 %v2170_v59, %v2434_v56  ;;  %v683_v62 = vpop.f32.mrb[47].mxu0  ;;  %v875_v63 = vpop.f32.mrb[47].mxu1  ;;  %v933_v2 = vmax.f32 %v689_v51, 0.0  ;;  %v981_v3 = vmax.f32 %v881_v52, 0.0 }
 0x151   :  { %v684_v0 = vadd.f32 %v2434_v56, %v683_v62  ;;  %v876_v1 = vadd.f32 %v2434_v56, %v875_v63  ;;  %v931_v6 = vmax.f32 %v681_v55, 0.0  ;;  %v979_v7 = vmax.f32 %v873_v57, 0.0 }
 0x152   :  { %v934_v4 = vmax.f32 %v692_v60, 0.0  ;;  %v982_v5 = vmax.f32 %v884_v61, 0.0 }
 0x153   :  { %v932_v8 = vmax.f32 %v684_v0, 0.0  ;;  %v980_v9 = vmax.f32 %v876_v1, 0.0 }
 0x154   :  { %v1834_v10 = vpack.c.bf16 %v934_v4, %v933_v2  ;;  %v1954_v11 = vpack.c.bf16 %v982_v5, %v981_v3 }
 0x155   :  { %v1829_v12 = vpack.c.bf16 %v932_v8, %v931_v6  ;;  %v1949_v13 = vpack.c.bf16 %v980_v9, %v979_v7 }
 0x156   :  { %1978 = vst [vmem:[%s2679_s3 + $0xb8] sm:$0xff] %v1834_v10   ;;  %2002 = vst [vmem:[%s2679_s3 + $0x178] sm:$0xff] %v1954_v11  }
 0x157   :  { %1977 = vst [vmem:[%s2679_s3 + $0xb0] sm:$0xff] %v1829_v12   ;;  %2001 = vst [vmem:[%s2679_s3 + $0x170] sm:$0xff] %v1949_v13  }

// kernel: heatmap3d_head_forward.5
= control target key start
LH: loop header
LB: loop body
LE: loop exit
PB: predicated region body
PF: predicated region fallthrough
CT: control target
= control target key end

     0   :  { %s7639_s1 = inlined_call_operand.vmem [shape: bf16[128,128], index: 1, kind: input, shape index: {}]   ;;  %s7640_s0 = inlined_call_operand.vmem [shape: bf16[2304,128], index: 0, kind: input, shape index: {}]   ;;  %s7641_s3 = inlined_call_operand.vmem [shape: bf16[128,128], index: 3, kind: input, shape index: {}]   ;;  %s7642_s2 = inlined_call_operand.vmem [shape: f32[1,128], index: 2, kind: input, shape index: {}]   ;;  %s7643_s4 = inlined_call_operand.vmem [shape: f32[1,128], index: 4, kind: input, shape index: {}]   ;;  %s7644_s5 = inlined_call_operand.vmem [shape: f32[2304,128], index: 5, kind: output, shape index: {}]  }
   0x1   :  { %v5483_v0 = vld [vmem:[%s7639_s1] sm:$0xff]   ;;  %v5484_v1 = vld [vmem:[%s7639_s1 + $0x8] sm:$0xff]   ;;  %v5485_v2 = vld [vmem:[%s7639_s1 + $0x10] sm:$0xff]  }
   0x2   :  { %4875 = vmatprep.subr.bf16.mxu0 %v5483_v0  ;;  %v5486_v3 = vld [vmem:[%s7639_s1 + $0x18] sm:$0xff]   ;;  %v5491_v4 = vld [vmem:[%s7640_s0] sm:$0xff]   ;;  %v5488_v6 = vld [vmem:[%s7639_s1 + $0x28] sm:$0xff]  }
   0x3   :  { %4876 = vmatpush3.bf16.msra.mxu0 %v5483_v0  ;;  %4891 = vmatprep.mubr.bf16.mxu0 %v5491_v4  ;;  %v5487_v5 = vld [vmem:[%s7639_s1 + $0x20] sm:$0xff]   ;;  %v5489_v7 = vld [vmem:[%s7639_s1 + $0x30] sm:$0xff]   ;;  %v5490_v8 = vld [vmem:[%s7639_s1 + $0x38] sm:$0xff]  }
   0x4   :  { %4877 = vmatprep.subr.bf16.mxu0 %v5484_v1  ;;  %v5492_v9 = vld [vmem:[%s7640_s0 + $0x8] sm:$0xff]   ;;  %v5493_v10 = vld [vmem:[%s7640_s0 + $0x10] sm:$0xff]   ;;  %v5494_v11 = vld [vmem:[%s7640_s0 + $0x18] sm:$0xff]  }
   0x5   :  { %v5495_v12 = vld [vmem:[%s7640_s0 + $0x20] sm:$0xff]   ;;  %v5496_v13 = vld [vmem:[%s7640_s0 + $0x28] sm:$0xff]   ;;  %v5497_v14 = vld [vmem:[%s7640_s0 + $0x30] sm:$0xff]  }
   0x6   :  { %v5498_v15 = vld [vmem:[%s7640_s0 + $0x38] sm:$0xff]   ;;  %v5499_v16 = vld [vmem:[%s7640_s0 + $0x40] sm:$0xff]   ;;  %v5500_v17 = vld [vmem:[%s7640_s0 + $0x48] sm:$0xff]  }
   0x7   :  { %4878 = vmatpush3.bf16.msra.mxu0 %v5484_v1  ;;  %v5501_v18 = vld [vmem:[%s7640_s0 + $0x50] sm:$0xff]   ;;  %v5502_v19 = vld [vmem:[%s7640_s0 + $0x58] sm:$0xff]   ;;  %v5503_v20 = vld [vmem:[%s7640_s0 + $0x60] sm:$0xff]  }
   0x8   :  { %4879 = vmatprep.subr.bf16.mxu0 %v5485_v2  ;;  %v5504_v21 = vld [vmem:[%s7640_s0 + $0x68] sm:$0xff]   ;;  %v5505_v22 = vld [vmem:[%s7640_s0 + $0x70] sm:$0xff]   ;;  %v5506_v23 = vld [vmem:[%s7640_s0 + $0x78] sm:$0xff]  }
   0x9   :  { %v5507_v24 = vld [vmem:[%s7640_s0 + $0x80] sm:$0xff]   ;;  %v5508_v26 = vld [vmem:[%s7640_s0 + $0x88] sm:$0xff]   ;;  %v5509_v27 = vld [vmem:[%s7640_s0 + $0x90] sm:$0xff]  }
   0xa   :  { %v5539_v25 = vld [vmem:[%s7641_s3] sm:$0xff]   ;;  %v5542_v28 = vld [vmem:[%s7641_s3 + $0x8] sm:$0xff]   ;;  %v5543_v29 = vld [vmem:[%s7641_s3 + $0x10] sm:$0xff]  }
   0xb   :  { %4880 = vmatpush3.bf16.msra.mxu0 %v5485_v2  ;;  %5179 = vmatprep.subr.bf16.mxu1 %v5539_v25  ;;  %v5510_v30 = vld [vmem:[%s7640_s0 + $0x98] sm:$0xff]   ;;  %v5511_v31 = vld [vmem:[%s7640_s0 + $0xa0] sm:$0xff]   ;;  %v5512_v34 = vld [vmem:[%s7640_s0 + $0xa8] sm:$0xff]  }
   0xc   :  { %4881 = vmatprep.subr.bf16.mxu0 %v5486_v3  ;;  %5180 = vmatpush3.bf16.msra.mxu1 %v5539_v25  ;;  %v5546_v32 = vld [vmem:[%s7641_s3 + $0x18] sm:$0xff]   ;;  %v5547_v33 = vld [vmem:[%s7641_s3 + $0x20] sm:$0xff]   ;;  %v5513_v35 = vld [vmem:[%s7640_s0 + $0xb0] sm:$0xff]  }
   0xd   :  { %5181 = vmatprep.subr.bf16.mxu1 %v5542_v28  ;;  %v5550_v36 = vld [vmem:[%s7641_s3 + $0x28] sm:$0xff]   ;;  %v5514_v37 = vld [vmem:[%s7640_s0 + $0xb8] sm:$0xff]   ;;  %v5551_v38 = vld [vmem:[%s7641_s3 + $0x30] sm:$0xff]  }
   0xe   :  { %v5515_v39 = vld [vmem:[%s7640_s0 + $0xc0] sm:$0xff]   ;;  %v5554_v40 = vld [vmem:[%s7641_s3 + $0x38] sm:$0xff]   ;;  %v5516_v41 = vld [vmem:[%s7640_s0 + $0xc8] sm:$0xff]  }
   0xf   :  { %4882 = vmatpush3.bf16.msra.mxu0 %v5486_v3  ;;  %v5517_v42 = vld [vmem:[%s7640_s0 + $0xd0] sm:$0xff]   ;;  %v5518_v43 = vld [vmem:[%s7640_s0 + $0xd8] sm:$0xff]   ;;  %v5519_v44 = vld [vmem:[%s7640_s0 + $0xe0] sm:$0xff]  }
  0x10   :  { %4883 = vmatprep.subr.bf16.mxu0 %v5487_v5  ;;  %5182 = vmatpush3.bf16.msra.mxu1 %v5542_v28  ;;  %v5520_v45 = vld [vmem:[%s7640_s0 + $0xe8] sm:$0xff]   ;;  %v5521_v46 = vld [vmem:[%s7640_s0 + $0xf0] sm:$0xff]   ;;  %v5522_v47 = vld [vmem:[%s7640_s0 + $0xf8] sm:$0xff]  }
  0x11   :  { %5183 = vmatprep.subr.bf16.mxu1 %v5543_v29  ;;  %v5523_v48 = vld [vmem:[%s7640_s0 + $0x100] sm:$0xff]   ;;  %v5524_v49 = vld [vmem:[%s7640_s0 + $0x108] sm:$0xff]   ;;  %v5525_v50 = vld [vmem:[%s7640_s0 + $0x110] sm:$0xff]  }
  0x12   :  { %v5526_v51 = vld [vmem:[%s7640_s0 + $0x118] sm:$0xff]   ;;  %v5527_v52 = vld [vmem:[%s7640_s0 + $0x120] sm:$0xff]   ;;  %v5528_v53 = vld [vmem:[%s7640_s0 + $0x128] sm:$0xff]  }
  0x13   :  { %4884 = vmatpush3.bf16.msra.mxu0 %v5487_v5  ;;  %v5529_v54 = vld [vmem:[%s7640_s0 + $0x130] sm:$0xff]   ;;  %v5530_v55 = vld [vmem:[%s7640_s0 + $0x138] sm:$0xff]   ;;  %v5531_v56 = vld [vmem:[%s7640_s0 + $0x140] sm:$0xff]  }
  0x14   :  { %4885 = vmatprep.subr.bf16.mxu0 %v5488_v6  ;;  %5184 = vmatpush3.bf16.msra.mxu1 %v5543_v29  ;;  %v5532_v57 = vld [vmem:[%s7640_s0 + $0x148] sm:$0xff]   ;;  %v5533_v58 = vld [vmem:[%s7640_s0 + $0x150] sm:$0xff]   ;;  %v5534_v59 = vld [vmem:[%s7640_s0 + $0x158] sm:$0xff]  }
  0x15   :  { %5185 = vmatprep.subr.bf16.mxu1 %v5546_v32  ;;  %v5535_v60 = vld [vmem:[%s7640_s0 + $0x160] sm:$0xff]   ;;  %v5536_v61 = vld [vmem:[%s7640_s0 + $0x168] sm:$0xff]   ;;  %v5537_v62 = vld [vmem:[%s7640_s0 + $0x170] sm:$0xff]  }
  0x16   :  { %v5538_v63 = vld [vmem:[%s7640_s0 + $0x178] sm:$0xff]   ;;  %v5540_v0 = vld [vmem:[%s7640_s0 + $0x180] sm:$0xff]   ;;  %v5541_v1 = vld [vmem:[%s7640_s0 + $0x188] sm:$0xff]  }
  0x17   :  { %4886 = vmatpush3.bf16.msra.mxu0 %v5488_v6  ;;  %v5544_v2 = vld [vmem:[%s7640_s0 + $0x190] sm:$0xff]   ;;  %v5545_v3 = vld [vmem:[%s7640_s0 + $0x198] sm:$0xff]   ;;  %v5548_v4 = vld [vmem:[%s7640_s0 + $0x1a0] sm:$0xff]  }
  0x18   :  { %4887 = vmatprep.subr.bf16.mxu0 %v5489_v7  ;;  %5186 = vmatpush3.bf16.msra.mxu1 %v5546_v32  ;;  %v5549_v5 = vld [vmem:[%s7640_s0 + $0x1a8] sm:$0xff]   ;;  %v5552_v6 = vld [vmem:[%s7640_s0 + $0x1b0] sm:$0xff]  }
  0x19   :  { %5187 = vmatprep.subr.bf16.mxu1 %v5547_v33 }
  0x1b   :  { %4888 = vmatpush3.bf16.msra.mxu0 %v5489_v7  ;;  %v5895_v7 = vld [vmem:[%s7642_s2] ss:$0 sm:$0xff] }
  0x1c   :  { %4889 = vmatprep.subr.bf16.mxu0 %v5490_v8  ;;  %5188 = vmatpush3.bf16.msra.mxu1 %v5547_v33 }
  0x1d   :  { %5189 = vmatprep.subr.bf16.mxu1 %v5550_v36 }
  0x1f   :  { %4890 = vmatpush3.bf16.msra.mxu0 %v5490_v8 }
  0x20   :  { %5190 = vmatpush3.bf16.msra.mxu1 %v5550_v36 }
  0x21   :  { %5191 = vmatprep.subr.bf16.mxu1 %v5551_v38 }
  0x22   :  { %4892 = vmatmul.mubr.bf16.vlgmr.msra.gmra.mrb[0].mxu0 %v5492_v9 }
  0x23   :  { %4895 = vmatprep.mubr.bf16.mxu0 %v5493_v10 }
  0x24   :  { %5192 = vmatpush3.bf16.msra.mxu1 %v5551_v38 }
  0x25   :  { %5193 = vmatprep.subr.bf16.mxu1 %v5554_v40 }
  0x28   :  { %5194 = vmatpush3.bf16.msra.mxu1 %v5554_v40 }
  0x2a   :  { %4896 = vmatmul.mubr.bf16.gmra.mrb[4].mxu0 %v5494_v11  ;;  %v5553_v11 = vld [vmem:[%s7640_s0 + $0x1b8] sm:$0xff]  }
  0x2b   :  { %4899 = vmatprep.mubr.bf16.mxu0 %v5495_v12 }
  0x32   :  { %4900 = vmatmul.mubr.bf16.gmra.mrb[8].mxu0 %v5496_v13 }
  0x33   :  { %4903 = vmatprep.mubr.bf16.mxu0 %v5497_v14  ;;  %v5555_v14 = vld [vmem:[%s7640_s0 + $0x1c0] sm:$0xff]  }
  0x3a   :  { %4904 = vmatmul.mubr.bf16.gmra.mrb[12].mxu0 %v5498_v15 }
  0x3b   :  { %4907 = vmatprep.mubr.bf16.mxu0 %v5499_v16 }
  0x42   :  { %4908 = vmatmul.mubr.bf16.gmra.mrb[16].mxu0 %v5500_v17 }
  0x43   :  { %4911 = vmatprep.mubr.bf16.mxu0 %v5501_v18 }
  0x4a   :  { %4912 = vmatmul.mubr.bf16.gmra.mrb[20].mxu0 %v5502_v19 }
  0x4b   :  { %4915 = vmatprep.mubr.bf16.mxu0 %v5503_v20 }
  0x52   :  { %4916 = vmatmul.mubr.bf16.gmra.mrb[24].mxu0 %v5504_v21 }
  0x53   :  { %4919 = vmatprep.mubr.bf16.mxu0 %v5505_v22 }
  0x5a   :  { %4920 = vmatmul.mubr.bf16.gmra.mrb[28].mxu0 %v5506_v23 }
  0x5b   :  { %4923 = vmatprep.mubr.bf16.mxu0 %v5507_v24 }
  0x62   :  { %4924 = vmatmul.mubr.bf16.gmra.mrb[32].mxu0 %v5508_v26 }
  0x63   :  { %4927 = vmatprep.mubr.bf16.mxu0 %v5509_v27  ;;  %v5556_v27 = vld [vmem:[%s7640_s0 + $0x1c8] sm:$0xff]  }
  0x6a   :  { %4928 = vmatmul.mubr.bf16.gmra.mrb[36].mxu0 %v5510_v30  ;;  %v5557_v30 = vld [vmem:[%s7640_s0 + $0x1d0] sm:$0xff]  }
  0x6b   :  { %4931 = vmatprep.mubr.bf16.mxu0 %v5511_v31 }
  0x72   :  { %4932 = vmatmul.mubr.bf16.gmra.mrb[40].mxu0 %v5512_v34 }
  0x73   :  { %4935 = vmatprep.mubr.bf16.mxu0 %v5513_v35 }
  0x7a   :  { %4936 = vmatmul.mubr.bf16.gmra.mrb[44].mxu0 %v5514_v37 }
  0x7b   :  { %4939 = vmatprep.mubr.bf16.mxu0 %v5515_v39 }
  0x82   :  { %4940 = vmatmul.mubr.bf16.gmra.mrb[48].mxu0 %v5516_v41 }
  0x83   :  { %4943 = vmatprep.mubr.bf16.mxu0 %v5517_v42 }
  0x8a   :  { %4944 = vmatmul.mubr.bf16.gmra.mrb[52].mxu0 %v5518_v43  ;;  %v5558_v43 = vld [vmem:[%s7640_s0 + $0x1d8] sm:$0xff]  }
  0x8b   :  { %4947 = vmatprep.mubr.bf16.mxu0 %v5519_v44 }
  0x92   :  { %4948 = vmatmul.mubr.bf16.gmra.mrb[56].mxu0 %v5520_v45 }
  0x93   :  { %4951 = vmatprep.mubr.bf16.mxu0 %v5521_v46  ;;  %v5559_v46 = vld [vmem:[%s7640_s0 + $0x1e0] sm:$0xff]  }
  0x9a   :  { %4952 = vmatmul.mubr.bf16.gmra.mrb[60].mxu0 %v5522_v47 }
  0x9b   :  { %4955 = vmatprep.mubr.bf16.mxu0 %v5523_v48 }
  0xa2   :  { %4956 = vmatmul.mubr.bf16.gmra.mrb[64].mxu0 %v5524_v49 }
  0xa3   :  { %4959 = vmatprep.mubr.bf16.mxu0 %v5525_v50 }
  0xaa   :  { %4960 = vmatmul.mubr.bf16.gmra.mrb[68].mxu0 %v5526_v51 }
  0xab   :  { %4963 = vmatprep.mubr.bf16.mxu0 %v5527_v52 }
  0xb2   :  { %4964 = vmatmul.mubr.bf16.gmra.mrb[72].mxu0 %v5528_v53 }
  0xb3   :  { %4967 = vmatprep.mubr.bf16.mxu0 %v5529_v54 }
  0xba   :  { %4968 = vmatmul.mubr.bf16.gmra.mrb[76].mxu0 %v5530_v55 }
  0xbb   :  { %4971 = vmatprep.mubr.bf16.mxu0 %v5531_v56 }
  0xc2   :  { %4972 = vmatmul.mubr.bf16.gmra.mrb[80].mxu0 %v5532_v57 }
  0xc3   :  { %4975 = vmatprep.mubr.bf16.mxu0 %v5533_v58 }
  0xca   :  { %4976 = vmatmul.mubr.bf16.gmra.mrb[84].mxu0 %v5534_v59  ;;  %v5560_v59 = vld [vmem:[%s7640_s0 + $0x1e8] sm:$0xff]  }
  0xcb   :  { %4979 = vmatprep.mubr.bf16.mxu0 %v5535_v60 }
  0xd2   :  { %4980 = vmatmul.mubr.bf16.gmra.mrb[88].mxu0 %v5536_v61 }
  0xd3   :  { %4983 = vmatprep.mubr.bf16.mxu0 %v5537_v62  ;;  %v5561_v62 = vld [vmem:[%s7640_s0 + $0x1f0] sm:$0xff]  }
  0xda   :  { %4984 = vmatmul.mubr.bf16.gmra.mrb[92].mxu0 %v5538_v63 }
  0xdb   :  { %4987 = vmatprep.mubr.bf16.mxu0 %v5540_v0 }
  0xe2   :  { %4988 = vmatmul.mubr.bf16.gmra.mrb[96].mxu0 %v5541_v1 }
  0xe3   :  { %4991 = vmatprep.mubr.bf16.mxu0 %v5544_v2 }
  0xea   :  { %4992 = vmatmul.mubr.bf16.gmra.mrb[100].mxu0 %v5545_v3 }
  0xeb   :  { %4995 = vmatprep.mubr.bf16.mxu0 %v5548_v4 }
  0xf2   :  { %4996 = vmatmul.mubr.bf16.gmra.mrb[104].mxu0 %v5549_v5 }
  0xf3   :  { %4999 = vmatprep.mubr.bf16.mxu0 %v5552_v6 }
  0xf5   :  { %v4893_v8 = vpop.f32.mrb[0].mxu0 }
  0xf6   :  { %v1287_v9 = vadd.f32 %v4893_v8, %v5895_v7  ;;  %v1278_v10 = vpop.f32.mrb[1].mxu0 }
  0xf7   :  { %v4894_v12 = vpop.f32.mrb[2].mxu0  ;;  %v1279_v13 = vadd.f32 %v5895_v7, %v1278_v10 }
  0xf8   :  { %v1290_v15 = vadd.f32 %v4894_v12, %v5895_v7  ;;  %v1281_v16 = vpop.f32.mrb[3].mxu0  ;;  %v2431_v18 = vmax.f32 %v1287_v9, 0.0  ;;  %v5562_v12 = vld [vmem:[%s7640_s0 + $0x1f8] sm:$0xff]  }
  0xf9   :  { %v1282_v17 = vadd.f32 %v5895_v7, %v1281_v16  ;;  %v2429_v20 = vmax.f32 %v1279_v13, 0.0 }
  0xfa   :  { %v2432_v19 = vmax.f32 %v1290_v15, 0.0  ;;  %5000 = vmatmul.mubr.bf16.gmra.mrb[108].mxu0 %v5553_v11  ;;  %v5563_v15 = vld [vmem:[%s7640_s0 + $0x200] sm:$0xff]  }
  0xfb   :  { %v2430_v21 = vmax.f32 %v1282_v17, 0.0  ;;  %5003 = vmatprep.mubr.bf16.mxu0 %v5555_v14 }
  0xfc   :  { %v2718_v22 = vpack.c.bf16 %v2432_v19, %v2431_v18 }
  0xfd   :  { %v4897_v23 = vpop.f32.mrb[4].mxu0  ;;  %v2717_v24 = vpack.c.bf16 %v2430_v21, %v2429_v20 }
  0xfe   :  { %v1303_v25 = vadd.f32 %v4897_v23, %v5895_v7  ;;  %v1294_v26 = vpop.f32.mrb[5].mxu0 }
  0xff   :  { %v1295_v28 = vadd.f32 %v5895_v7, %v1294_v26  ;;  %v4898_v29 = vpop.f32.mrb[6].mxu0  ;;  %5195 = vmatprep.mubr.bf16.mxu1 %v2717_v24 }
 0x100   :  { %v1306_v31 = vadd.f32 %v4898_v29, %v5895_v7  ;;  %v1297_v32 = vpop.f32.mrb[7].mxu0  ;;  %5196 = vmatmul.mubr.bf16.vlgmr.msra.gmra.mrb[0].mxu1 %v2718_v22  ;;  %v2435_v34 = vmax.f32 %v1303_v25, 0.0 }
 0x101   :  { %v1298_v33 = vadd.f32 %v5895_v7, %v1297_v32  ;;  %v2433_v36 = vmax.f32 %v1295_v28, 0.0  ;;  %v5564_v28 = vld [vmem:[%s7640_s0 + $0x208] sm:$0xff]  }
 0x102   :  { %v2436_v35 = vmax.f32 %v1306_v31, 0.0  ;;  %5004 = vmatmul.mubr.bf16.gmra.mrb[112].mxu0 %v5556_v27  ;;  %v5565_v31 = vld [vmem:[%s7640_s0 + $0x210] sm:$0xff]  }
 0x103   :  { %v2434_v37 = vmax.f32 %v1298_v33, 0.0  ;;  %5007 = vmatprep.mubr.bf16.mxu0 %v5557_v30 }
 0x104   :  { %v2720_v38 = vpack.c.bf16 %v2436_v35, %v2435_v34 }
 0x105   :  { %v4901_v39 = vpop.f32.mrb[8].mxu0  ;;  %v2719_v40 = vpack.c.bf16 %v2434_v37, %v2433_v36 }
 0x106   :  { %v1319_v41 = vadd.f32 %v4901_v39, %v5895_v7  ;;  %v1310_v42 = vpop.f32.mrb[9].mxu0 }
 0x107   :  { %v1311_v44 = vadd.f32 %v5895_v7, %v1310_v42  ;;  %v4902_v45 = vpop.f32.mrb[10].mxu0  ;;  %5199 = vmatprep.mubr.bf16.mxu1 %v2719_v40 }
 0x108   :  { %v1322_v47 = vadd.f32 %v4902_v45, %v5895_v7  ;;  %v1313_v48 = vpop.f32.mrb[11].mxu0  ;;  %5200 = vmatmul.mubr.bf16.gmra.mrb[4].mxu1 %v2720_v38  ;;  %v2439_v50 = vmax.f32 %v1319_v41, 0.0 }
 0x109   :  { %v1314_v49 = vadd.f32 %v5895_v7, %v1313_v48  ;;  %v2437_v52 = vmax.f32 %v1311_v44, 0.0  ;;  %v5566_v44 = vld [vmem:[%s7640_s0 + $0x218] sm:$0xff]  }
 0x10a   :  { %v2440_v51 = vmax.f32 %v1322_v47, 0.0  ;;  %5008 = vmatmul.mubr.bf16.gmra.mrb[116].mxu0 %v5558_v43  ;;  %v5567_v47 = vld [vmem:[%s7640_s0 + $0x220] sm:$0xff]  }
 0x10b   :  { %v2438_v53 = vmax.f32 %v1314_v49, 0.0  ;;  %5011 = vmatprep.mubr.bf16.mxu0 %v5559_v46 }
 0x10c   :  { %v2722_v54 = vpack.c.bf16 %v2440_v51, %v2439_v50 }
 0x10d   :  { %v4905_v55 = vpop.f32.mrb[12].mxu0  ;;  %v2721_v56 = vpack.c.bf16 %v2438_v53, %v2437_v52 }
 0x10e   :  { %v1335_v57 = vadd.f32 %v4905_v55, %v5895_v7  ;;  %v1326_v58 = vpop.f32.mrb[13].mxu0 }
 0x10f   :  { %v1327_v60 = vadd.f32 %v5895_v7, %v1326_v58  ;;  %v4906_v61 = vpop.f32.mrb[14].mxu0  ;;  %5203 = vmatprep.mubr.bf16.mxu1 %v2721_v56 }
 0x110   :  { %v1338_v63 = vadd.f32 %v4906_v61, %v5895_v7  ;;  %v1329_v0 = vpop.f32.mrb[15].mxu0  ;;  %5204 = vmatmul.mubr.bf16.gmra.mrb[8].mxu1 %v2722_v54  ;;  %v2443_v2 = vmax.f32 %v1335_v57, 0.0 }
 0x111   :  { %v1330_v1 = vadd.f32 %v5895_v7, %v1329_v0  ;;  %v2441_v4 = vmax.f32 %v1327_v60, 0.0  ;;  %v5568_v60 = vld [vmem:[%s7640_s0 + $0x228] sm:$0xff]  }
 0x112   :  { %v2444_v3 = vmax.f32 %v1338_v63, 0.0  ;;  %5012 = vmatmul.mubr.bf16.gmra.mrb[120].mxu0 %v5560_v59  ;;  %v5569_v63 = vld [vmem:[%s7640_s0 + $0x230] sm:$0xff]  }
 0x113   :  { %v2442_v5 = vmax.f32 %v1330_v1, 0.0  ;;  %5015 = vmatprep.mubr.bf16.mxu0 %v5561_v62 }
 0x114   :  { %v2724_v6 = vpack.c.bf16 %v2444_v3, %v2443_v2 }
 0x115   :  { %v4909_v8 = vpop.f32.mrb[16].mxu0  ;;  %v2723_v9 = vpack.c.bf16 %v2442_v5, %v2441_v4 }
 0x116   :  { %v1351_v10 = vadd.f32 %v4909_v8, %v5895_v7  ;;  %v1342_v11 = vpop.f32.mrb[17].mxu0 }
 0x117   :  { %v1343_v13 = vadd.f32 %v5895_v7, %v1342_v11  ;;  %v4910_v14 = vpop.f32.mrb[18].mxu0  ;;  %5207 = vmatprep.mubr.bf16.mxu1 %v2723_v9 }
 0x118   :  { %v1354_v16 = vadd.f32 %v4910_v14, %v5895_v7  ;;  %v1345_v17 = vpop.f32.mrb[19].mxu0  ;;  %5208 = vmatmul.mubr.bf16.gmra.mrb[12].mxu1 %v2724_v6  ;;  %v2447_v19 = vmax.f32 %v1351_v10, 0.0 }
 0x119   :  { %v1346_v18 = vadd.f32 %v5895_v7, %v1345_v17  ;;  %v2445_v21 = vmax.f32 %v1343_v13, 0.0  ;;  %v5570_v13 = vld [vmem:[%s7640_s0 + $0x238] sm:$0xff]  }
 0x11a   :  { %v2448_v20 = vmax.f32 %v1354_v16, 0.0  ;;  %5016 = vmatmul.mubr.bf16.gmra.mrb[124].mxu0 %v5562_v12  ;;  %v5571_v16 = vld [vmem:[%s7640_s0 + $0x240] sm:$0xff]  }
 0x11b   :  { %v2446_v22 = vmax.f32 %v1346_v18, 0.0  ;;  %5019 = vmatprep.mubr.bf16.mxu0 %v5563_v15 }
 0x11c   :  { %v2726_v23 = vpack.c.bf16 %v2448_v20, %v2447_v19 }
 0x11d   :  { %v4913_v24 = vpop.f32.mrb[20].mxu0  ;;  %v2725_v25 = vpack.c.bf16 %v2446_v22, %v2445_v21 }
 0x11e   :  { %v1367_v26 = vadd.f32 %v4913_v24, %v5895_v7  ;;  %v1358_v27 = vpop.f32.mrb[21].mxu0 }
 0x11f   :  { %v1359_v29 = vadd.f32 %v5895_v7, %v1358_v27  ;;  %v4914_v30 = vpop.f32.mrb[22].mxu0  ;;  %5211 = vmatprep.mubr.bf16.mxu1 %v2725_v25 }
 0x120   :  { %v1370_v32 = vadd.f32 %v4914_v30, %v5895_v7  ;;  %v1361_v33 = vpop.f32.mrb[23].mxu0  ;;  %5212 = vmatmul.mubr.bf16.gmra.mrb[16].mxu1 %v2726_v23  ;;  %v2451_v35 = vmax.f32 %v1367_v26, 0.0 }
 0x121   :  { %v1362_v34 = vadd.f32 %v5895_v7, %v1361_v33  ;;  %v2449_v37 = vmax.f32 %v1359_v29, 0.0  ;;  %v5572_v29 = vld [vmem:[%s7640_s0 + $0x248] sm:$0xff]  }
 0x122   :  { %v2452_v36 = vmax.f32 %v1370_v32, 0.0  ;;  %5020 = vmatmul.mubr.bf16.gmra.mrb[128].mxu0 %v5564_v28  ;;  %v5573_v32 = vld [vmem:[%s7640_s0 + $0x250] sm:$0xff]  }
 0x123   :  { %v2450_v38 = vmax.f32 %v1362_v34, 0.0  ;;  %5023 = vmatprep.mubr.bf16.mxu0 %v5565_v31 }
 0x124   :  { %v2728_v39 = vpack.c.bf16 %v2452_v36, %v2451_v35 }
 0x125   :  { %v4917_v40 = vpop.f32.mrb[24].mxu0  ;;  %v2727_v41 = vpack.c.bf16 %v2450_v38, %v2449_v37 }
 0x126   :  { %v1383_v42 = vadd.f32 %v4917_v40, %v5895_v7  ;;  %v1374_v43 = vpop.f32.mrb[25].mxu0 }
 0x127   :  { %v1375_v45 = vadd.f32 %v5895_v7, %v1374_v43  ;;  %v4918_v46 = vpop.f32.mrb[26].mxu0  ;;  %5215 = vmatprep.mubr.bf16.mxu1 %v2727_v41 }
 0x128   :  { %v1386_v48 = vadd.f32 %v4918_v46, %v5895_v7  ;;  %v1377_v49 = vpop.f32.mrb[27].mxu0  ;;  %5216 = vmatmul.mubr.bf16.gmra.mrb[20].mxu1 %v2728_v39  ;;  %v2455_v51 = vmax.f32 %v1383_v42, 0.0 }
 0x129   :  { %v1378_v50 = vadd.f32 %v5895_v7, %v1377_v49  ;;  %v2453_v53 = vmax.f32 %v1375_v45, 0.0  ;;  %v5574_v45 = vld [vmem:[%s7640_s0 + $0x258] sm:$0xff]  }
 0x12a   :  { %v2456_v52 = vmax.f32 %v1386_v48, 0.0  ;;  %5024 = vmatmul.mubr.bf16.gmra.mrb[132].mxu0 %v5566_v44  ;;  %v5575_v48 = vld [vmem:[%s7640_s0 + $0x260] sm:$0xff]  }
 0x12b   :  { %v2454_v54 = vmax.f32 %v1378_v50, 0.0  ;;  %5027 = vmatprep.mubr.bf16.mxu0 %v5567_v47 }
 0x12c   :  { %v2730_v55 = vpack.c.bf16 %v2456_v52, %v2455_v51 }
 0x12d   :  { %v4921_v56 = vpop.f32.mrb[28].mxu0  ;;  %v2729_v57 = vpack.c.bf16 %v2454_v54, %v2453_v53 }
 0x12e   :  { %v1399_v58 = vadd.f32 %v4921_v56, %v5895_v7  ;;  %v1390_v59 = vpop.f32.mrb[29].mxu0 }
 0x12f   :  { %v1391_v61 = vadd.f32 %v5895_v7, %v1390_v59  ;;  %v4922_v62 = vpop.f32.mrb[30].mxu0  ;;  %5219 = vmatprep.mubr.bf16.mxu1 %v2729_v57 }
 0x130   :  { %v1402_v0 = vadd.f32 %v4922_v62, %v5895_v7  ;;  %v1393_v1 = vpop.f32.mrb[31].mxu0  ;;  %5220 = vmatmul.mubr.bf16.gmra.mrb[24].mxu1 %v2730_v55  ;;  %v2459_v3 = vmax.f32 %v1399_v58, 0.0 }
 0x131   :  { %v1394_v2 = vadd.f32 %v5895_v7, %v1393_v1  ;;  %v2457_v5 = vmax.f32 %v1391_v61, 0.0  ;;  %v5576_v61 = vld [vmem:[%s7640_s0 + $0x268] sm:$0xff]  }
 0x132   :  { %v2460_v4 = vmax.f32 %v1402_v0, 0.0  ;;  %5028 = vmatmul.mubr.bf16.gmra.mrb[136].mxu0 %v5568_v60  ;;  %v5577_v0 = vld [vmem:[%s7640_s0 + $0x270] sm:$0xff]  }
 0x133   :  { %v2458_v6 = vmax.f32 %v1394_v2, 0.0  ;;  %5031 = vmatprep.mubr.bf16.mxu0 %v5569_v63 }
 0x134   :  { %v2732_v8 = vpack.c.bf16 %v2460_v4, %v2459_v3 }
 0x135   :  { %v4925_v9 = vpop.f32.mrb[32].mxu0  ;;  %v2731_v10 = vpack.c.bf16 %v2458_v6, %v2457_v5 }
 0x136   :  { %v1415_v11 = vadd.f32 %v4925_v9, %v5895_v7  ;;  %v1406_v12 = vpop.f32.mrb[33].mxu0 }
 0x137   :  { %v1407_v14 = vadd.f32 %v5895_v7, %v1406_v12  ;;  %v4926_v15 = vpop.f32.mrb[34].mxu0  ;;  %5223 = vmatprep.mubr.bf16.mxu1 %v2731_v10 }
 0x138   :  { %v1418_v17 = vadd.f32 %v4926_v15, %v5895_v7  ;;  %v1409_v18 = vpop.f32.mrb[35].mxu0  ;;  %5224 = vmatmul.mubr.bf16.gmra.mrb[28].mxu1 %v2732_v8  ;;  %v2463_v20 = vmax.f32 %v1415_v11, 0.0 }
 0x139   :  { %v1410_v19 = vadd.f32 %v5895_v7, %v1409_v18  ;;  %v2461_v22 = vmax.f32 %v1407_v14, 0.0  ;;  %v5578_v14 = vld [vmem:[%s7640_s0 + $0x278] sm:$0xff]  }
 0x13a   :  { %v2464_v21 = vmax.f32 %v1418_v17, 0.0  ;;  %5032 = vmatmul.mubr.bf16.gmra.mrb[140].mxu0 %v5570_v13  ;;  %v5579_v17 = vld [vmem:[%s7640_s0 + $0x280] sm:$0xff]  }
 0x13b   :  { %v2462_v23 = vmax.f32 %v1410_v19, 0.0  ;;  %5035 = vmatprep.mubr.bf16.mxu0 %v5571_v16 }
 0x13c   :  { %v2734_v24 = vpack.c.bf16 %v2464_v21, %v2463_v20 }
 0x13d   :  { %v2733_v25 = vpack.c.bf16 %v2462_v23, %v2461_v22  ;;  %v4929_v26 = vpop.f32.mrb[36].mxu0 }
 0x13e   :  { %v1431_v27 = vadd.f32 %v4929_v26, %v5895_v7  ;;  %v1422_v28 = vpop.f32.mrb[37].mxu0 }
 0x13f   :  { %v1423_v30 = vadd.f32 %v5895_v7, %v1422_v28  ;;  %v4930_v31 = vpop.f32.mrb[38].mxu0  ;;  %5227 = vmatprep.mubr.bf16.mxu1 %v2733_v25 }
 0x140   :  { %v1434_v33 = vadd.f32 %v4930_v31, %v5895_v7  ;;  %v1425_v34 = vpop.f32.mrb[39].mxu0  ;;  %5228 = vmatmul.mubr.bf16.gmra.mrb[32].mxu1 %v2734_v24  ;;  %v2467_v36 = vmax.f32 %v1431_v27, 0.0 }
 0x141   :  { %v1426_v35 = vadd.f32 %v5895_v7, %v1425_v34  ;;  %v2465_v38 = vmax.f32 %v1423_v30, 0.0  ;;  %v5580_v30 = vld [vmem:[%s7640_s0 + $0x288] sm:$0xff]  }
 0x142   :  { %v2468_v37 = vmax.f32 %v1434_v33, 0.0  ;;  %5036 = vmatmul.mubr.bf16.gmra.mrb[144].mxu0 %v5572_v29  ;;  %v5581_v33 = vld [vmem:[%s7640_s0 + $0x290] sm:$0xff]  }
 0x143   :  { %v2466_v39 = vmax.f32 %v1426_v35, 0.0  ;;  %5039 = vmatprep.mubr.bf16.mxu0 %v5573_v32 }
 0x144   :  { %v2736_v40 = vpack.c.bf16 %v2468_v37, %v2467_v36 }
 0x145   :  { %v2735_v41 = vpack.c.bf16 %v2466_v39, %v2465_v38  ;;  %v4933_v42 = vpop.f32.mrb[40].mxu0 }
 0x146   :  { %v1447_v43 = vadd.f32 %v4933_v42, %v5895_v7  ;;  %v1438_v44 = vpop.f32.mrb[41].mxu0 }
 0x147   :  { %v1439_v46 = vadd.f32 %v5895_v7, %v1438_v44  ;;  %v4934_v47 = vpop.f32.mrb[42].mxu0  ;;  %5231 = vmatprep.mubr.bf16.mxu1 %v2735_v41 }
 0x148   :  { %v1450_v49 = vadd.f32 %v4934_v47, %v5895_v7  ;;  %v1441_v50 = vpop.f32.mrb[43].mxu0  ;;  %5232 = vmatmul.mubr.bf16.gmra.mrb[36].mxu1 %v2736_v40  ;;  %v2471_v52 = vmax.f32 %v1447_v43, 0.0 }
 0x149   :  { %v1442_v51 = vadd.f32 %v5895_v7, %v1441_v50  ;;  %v2469_v54 = vmax.f32 %v1439_v46, 0.0  ;;  %v5582_v46 = vld [vmem:[%s7640_s0 + $0x298] sm:$0xff]  }
 0x14a   :  { %v2472_v53 = vmax.f32 %v1450_v49, 0.0  ;;  %5040 = vmatmul.mubr.bf16.gmra.mrb[148].mxu0 %v5574_v45  ;;  %v5583_v49 = vld [vmem:[%s7640_s0 + $0x2a0] sm:$0xff]  }
 0x14b   :  { %v2470_v55 = vmax.f32 %v1442_v51, 0.0  ;;  %5043 = vmatprep.mubr.bf16.mxu0 %v5575_v48 }
 0x14c   :  { %v2738_v56 = vpack.c.bf16 %v2472_v53, %v2471_v52 }
 0x14d   :  { %v2737_v57 = vpack.c.bf16 %v2470_v55, %v2469_v54  ;;  %v4937_v58 = vpop.f32.mrb[44].mxu0 }
 0x14e   :  { %v1463_v59 = vadd.f32 %v4937_v58, %v5895_v7  ;;  %v1454_v60 = vpop.f32.mrb[45].mxu0 }
 0x14f   :  { %v1455_v62 = vadd.f32 %v5895_v7, %v1454_v60  ;;  %v4938_v63 = vpop.f32.mrb[46].mxu0  ;;  %5235 = vmatprep.mubr.bf16.mxu1 %v2737_v57 }
 0x150   :  { %v1466_v1 = vadd.f32 %v4938_v63, %v5895_v7  ;;  %v1457_v2 = vpop.f32.mrb[47].mxu0  ;;  %5236 = vmatmul.mubr.bf16.gmra.mrb[40].mxu1 %v2738_v56  ;;  %v2475_v4 = vmax.f32 %v1463_v59, 0.0 }
 0x151   :  { %v1458_v3 = vadd.f32 %v5895_v7, %v1457_v2  ;;  %v2473_v6 = vmax.f32 %v1455_v62, 0.0  ;;  %v5584_v62 = vld [vmem:[%s7640_s0 + $0x2a8] sm:$0xff]  }
 0x152   :  { %v2476_v5 = vmax.f32 %v1466_v1, 0.0  ;;  %5044 = vmatmul.mubr.bf16.gmra.mrb[152].mxu0 %v5576_v61  ;;  %v5585_v1 = vld [vmem:[%s7640_s0 + $0x2b0] sm:$0xff]  }
 0x153   :  { %v2474_v8 = vmax.f32 %v1458_v3, 0.0  ;;  %5047 = vmatprep.mubr.bf16.mxu0 %v5577_v0 }
 0x154   :  { %v2740_v9 = vpack.c.bf16 %v2476_v5, %v2475_v4 }
 0x155   :  { %v2739_v10 = vpack.c.bf16 %v2474_v8, %v2473_v6  ;;  %v4941_v11 = vpop.f32.mrb[48].mxu0 }
 0x156   :  { %v1479_v12 = vadd.f32 %v4941_v11, %v5895_v7  ;;  %v1470_v13 = vpop.f32.mrb[49].mxu0 }
 0x157   :  { %v1471_v15 = vadd.f32 %v5895_v7, %v1470_v13  ;;  %v4942_v16 = vpop.f32.mrb[50].mxu0  ;;  %5239 = vmatprep.mubr.bf16.mxu1 %v2739_v10 }
 0x158   :  { %v1482_v18 = vadd.f32 %v4942_v16, %v5895_v7  ;;  %v1473_v19 = vpop.f32.mrb[51].mxu0  ;;  %5240 = vmatmul.mubr.bf16.gmra.mrb[44].mxu1 %v2740_v9  ;;  %v2479_v21 = vmax.f32 %v1479_v12, 0.0 }
 0x159   :  { %v1474_v20 = vadd.f32 %v5895_v7, %v1473_v19  ;;  %v2477_v23 = vmax.f32 %v1471_v15, 0.0  ;;  %v5586_v15 = vld [vmem:[%s7640_s0 + $0x2b8] sm:$0xff]  }
 0x15a   :  { %v2480_v22 = vmax.f32 %v1482_v18, 0.0  ;;  %5048 = vmatmul.mubr.bf16.gmra.mrb[156].mxu0 %v5578_v14  ;;  %v5587_v18 = vld [vmem:[%s7640_s0 + $0x2c0] sm:$0xff]  }
 0x15b   :  { %v2478_v24 = vmax.f32 %v1474_v20, 0.0  ;;  %5051 = vmatprep.mubr.bf16.mxu0 %v5579_v17 }
 0x15c   :  { %v2742_v25 = vpack.c.bf16 %v2480_v22, %v2479_v21 }
 0x15d   :  { %v2741_v26 = vpack.c.bf16 %v2478_v24, %v2477_v23  ;;  %v4945_v27 = vpop.f32.mrb[52].mxu0 }
 0x15e   :  { %v1495_v28 = vadd.f32 %v4945_v27, %v5895_v7  ;;  %v1486_v29 = vpop.f32.mrb[53].mxu0 }
 0x15f   :  { %v1487_v31 = vadd.f32 %v5895_v7, %v1486_v29  ;;  %v4946_v32 = vpop.f32.mrb[54].mxu0  ;;  %5243 = vmatprep.mubr.bf16.mxu1 %v2741_v26 }
 0x160   :  { %v1498_v34 = vadd.f32 %v4946_v32, %v5895_v7  ;;  %v1489_v35 = vpop.f32.mrb[55].mxu0  ;;  %5244 = vmatmul.mubr.bf16.gmra.mrb[48].mxu1 %v2742_v25  ;;  %v2483_v37 = vmax.f32 %v1495_v28, 0.0 }
 0x161   :  { %v1490_v36 = vadd.f32 %v5895_v7, %v1489_v35  ;;  %v2481_v39 = vmax.f32 %v1487_v31, 0.0  ;;  %v5588_v31 = vld [vmem:[%s7640_s0 + $0x2c8] sm:$0xff]  }
 0x162   :  { %v2484_v38 = vmax.f32 %v1498_v34, 0.0  ;;  %5052 = vmatmul.mubr.bf16.gmra.mrb[160].mxu0 %v5580_v30  ;;  %v5589_v34 = vld [vmem:[%s7640_s0 + $0x2d0] sm:$0xff]  }
 0x163   :  { %v2482_v40 = vmax.f32 %v1490_v36, 0.0  ;;  %5055 = vmatprep.mubr.bf16.mxu0 %v5581_v33 }
 0x164   :  { %v2744_v41 = vpack.c.bf16 %v2484_v38, %v2483_v37 }
 0x165   :  { %v2743_v42 = vpack.c.bf16 %v2482_v40, %v2481_v39  ;;  %v4949_v43 = vpop.f32.mrb[56].mxu0 }
 0x166   :  { %v1511_v44 = vadd.f32 %v4949_v43, %v5895_v7  ;;  %v1502_v45 = vpop.f32.mrb[57].mxu0 }
 0x167   :  { %v1503_v47 = vadd.f32 %v5895_v7, %v1502_v45  ;;  %v4950_v48 = vpop.f32.mrb[58].mxu0  ;;  %5247 = vmatprep.mubr.bf16.mxu1 %v2743_v42 }
 0x168   :  { %v1514_v50 = vadd.f32 %v4950_v48, %v5895_v7  ;;  %v1505_v51 = vpop.f32.mrb[59].mxu0  ;;  %5248 = vmatmul.mubr.bf16.gmra.mrb[52].mxu1 %v2744_v41  ;;  %v2487_v53 = vmax.f32 %v1511_v44, 0.0 }
 0x169   :  { %v1506_v52 = vadd.f32 %v5895_v7, %v1505_v51  ;;  %v2485_v55 = vmax.f32 %v1503_v47, 0.0  ;;  %v5590_v47 = vld [vmem:[%s7640_s0 + $0x2d8] sm:$0xff]  }
 0x16a   :  { %v2488_v54 = vmax.f32 %v1514_v50, 0.0  ;;  %5056 = vmatmul.mubr.bf16.gmra.mrb[164].mxu0 %v5582_v46  ;;  %v5591_v50 = vld [vmem:[%s7640_s0 + $0x2e0] sm:$0xff]  }
 0x16b   :  { %v2486_v56 = vmax.f32 %v1506_v52, 0.0  ;;  %5059 = vmatprep.mubr.bf16.mxu0 %v5583_v49 }
 0x16c   :  { %v2746_v57 = vpack.c.bf16 %v2488_v54, %v2487_v53 }
 0x16d   :  { %v2745_v58 = vpack.c.bf16 %v2486_v56, %v2485_v55  ;;  %v4953_v59 = vpop.f32.mrb[60].mxu0 }
 0x16e   :  { %v1527_v60 = vadd.f32 %v4953_v59, %v5895_v7  ;;  %v1518_v61 = vpop.f32.mrb[61].mxu0 }
 0x16f   :  { %v1519_v63 = vadd.f32 %v5895_v7, %v1518_v61  ;;  %v4954_v0 = vpop.f32.mrb[62].mxu0  ;;  %5251 = vmatprep.mubr.bf16.mxu1 %v2745_v58 }
 0x170   :  { %v1530_v2 = vadd.f32 %v4954_v0, %v5895_v7  ;;  %v1521_v3 = vpop.f32.mrb[63].mxu0  ;;  %5252 = vmatmul.mubr.bf16.gmra.mrb[56].mxu1 %v2746_v57  ;;  %v2491_v5 = vmax.f32 %v1527_v60, 0.0 }
 0x171   :  { %v1522_v4 = vadd.f32 %v5895_v7, %v1521_v3  ;;  %v2489_v8 = vmax.f32 %v1519_v63, 0.0  ;;  %v5592_v63 = vld [vmem:[%s7640_s0 + $0x2e8] sm:$0xff]  }
 0x172   :  { %v2492_v6 = vmax.f32 %v1530_v2, 0.0  ;;  %5060 = vmatmul.mubr.bf16.gmra.mrb[168].mxu0 %v5584_v62  ;;  %v5593_v2 = vld [vmem:[%s7640_s0 + $0x2f0] sm:$0xff]  }
 0x173   :  { %v2490_v9 = vmax.f32 %v1522_v4, 0.0  ;;  %5063 = vmatprep.mubr.bf16.mxu0 %v5585_v1 }
 0x174   :  { %v2748_v10 = vpack.c.bf16 %v2492_v6, %v2491_v5 }
 0x175   :  { %v2747_v11 = vpack.c.bf16 %v2490_v9, %v2489_v8  ;;  %v4957_v12 = vpop.f32.mrb[64].mxu0 }
 0x176   :  { %v1543_v13 = vadd.f32 %v4957_v12, %v5895_v7  ;;  %v1534_v14 = vpop.f32.mrb[65].mxu0 }
 0x177   :  { %v1535_v16 = vadd.f32 %v5895_v7, %v1534_v14  ;;  %v4958_v17 = vpop.f32.mrb[66].mxu0  ;;  %5255 = vmatprep.mubr.bf16.mxu1 %v2747_v11 }
 0x178   :  { %v1546_v19 = vadd.f32 %v4958_v17, %v5895_v7  ;;  %v1537_v20 = vpop.f32.mrb[67].mxu0  ;;  %5256 = vmatmul.mubr.bf16.gmra.mrb[60].mxu1 %v2748_v10  ;;  %v2495_v22 = vmax.f32 %v1543_v13, 0.0 }
 0x179   :  { %v1538_v21 = vadd.f32 %v5895_v7, %v1537_v20  ;;  %v2493_v24 = vmax.f32 %v1535_v16, 0.0  ;;  %v5594_v16 = vld [vmem:[%s7640_s0 + $0x2f8] sm:$0xff]  }
 0x17a   :  { %v2496_v23 = vmax.f32 %v1546_v19, 0.0  ;;  %5064 = vmatmul.mubr.bf16.gmra.mrb[172].mxu0 %v5586_v15  ;;  %v5595_v19 = vld [vmem:[%s7640_s0 + $0x300] sm:$0xff]  }
 0x17b   :  { %v2494_v25 = vmax.f32 %v1538_v21, 0.0  ;;  %5067 = vmatprep.mubr.bf16.mxu0 %v5587_v18 }
 0x17c   :  { %v2750_v26 = vpack.c.bf16 %v2496_v23, %v2495_v22 }
 0x17d   :  { %v2749_v27 = vpack.c.bf16 %v2494_v25, %v2493_v24  ;;  %v4961_v28 = vpop.f32.mrb[68].mxu0 }
 0x17e   :  { %v1559_v29 = vadd.f32 %v4961_v28, %v5895_v7  ;;  %v1550_v30 = vpop.f32.mrb[69].mxu0 }
 0x17f   :  { %v1551_v32 = vadd.f32 %v5895_v7, %v1550_v30  ;;  %v4962_v33 = vpop.f32.mrb[70].mxu0  ;;  %5259 = vmatprep.mubr.bf16.mxu1 %v2749_v27 }
 0x180   :  { %v1562_v35 = vadd.f32 %v4962_v33, %v5895_v7  ;;  %v1553_v36 = vpop.f32.mrb[71].mxu0  ;;  %5260 = vmatmul.mubr.bf16.gmra.mrb[64].mxu1 %v2750_v26  ;;  %v2499_v38 = vmax.f32 %v1559_v29, 0.0 }
 0x181   :  { %v1554_v37 = vadd.f32 %v5895_v7, %v1553_v36  ;;  %v2497_v40 = vmax.f32 %v1551_v32, 0.0  ;;  %v5596_v32 = vld [vmem:[%s7640_s0 + $0x308] sm:$0xff]  }
 0x182   :  { %v2500_v39 = vmax.f32 %v1562_v35, 0.0  ;;  %5068 = vmatmul.mubr.bf16.gmra.mrb[176].mxu0 %v5588_v31  ;;  %v5597_v35 = vld [vmem:[%s7640_s0 + $0x310] sm:$0xff]  }
 0x183   :  { %v2498_v41 = vmax.f32 %v1554_v37, 0.0  ;;  %5071 = vmatprep.mubr.bf16.mxu0 %v5589_v34 }
 0x184   :  { %v2752_v42 = vpack.c.bf16 %v2500_v39, %v2499_v38 }
 0x185   :  { %v2751_v43 = vpack.c.bf16 %v2498_v41, %v2497_v40  ;;  %v4965_v44 = vpop.f32.mrb[72].mxu0 }
 0x186   :  { %v1575_v45 = vadd.f32 %v4965_v44, %v5895_v7  ;;  %v1566_v46 = vpop.f32.mrb[73].mxu0 }
 0x187   :  { %v1567_v48 = vadd.f32 %v5895_v7, %v1566_v46  ;;  %v4966_v49 = vpop.f32.mrb[74].mxu0  ;;  %5263 = vmatprep.mubr.bf16.mxu1 %v2751_v43 }
 0x188   :  { %v1578_v51 = vadd.f32 %v4966_v49, %v5895_v7  ;;  %v1569_v52 = vpop.f32.mrb[75].mxu0  ;;  %5264 = vmatmul.mubr.bf16.gmra.mrb[68].mxu1 %v2752_v42  ;;  %v2503_v54 = vmax.f32 %v1575_v45, 0.0 }
 0x189   :  { %v1570_v53 = vadd.f32 %v5895_v7, %v1569_v52  ;;  %v2501_v56 = vmax.f32 %v1567_v48, 0.0  ;;  %v5598_v48 = vld [vmem:[%s7640_s0 + $0x318] sm:$0xff]  }
 0x18a   :  { %v2504_v55 = vmax.f32 %v1578_v51, 0.0  ;;  %5072 = vmatmul.mubr.bf16.gmra.mrb[180].mxu0 %v5590_v47  ;;  %v5599_v51 = vld [vmem:[%s7640_s0 + $0x320] sm:$0xff]  }
 0x18b   :  { %v2502_v57 = vmax.f32 %v1570_v53, 0.0  ;;  %5075 = vmatprep.mubr.bf16.mxu0 %v5591_v50 }
 0x18c   :  { %v2754_v58 = vpack.c.bf16 %v2504_v55, %v2503_v54 }
 0x18d   :  { %v2753_v59 = vpack.c.bf16 %v2502_v57, %v2501_v56  ;;  %v4969_v60 = vpop.f32.mrb[76].mxu0 }
 0x18e   :  { %v1591_v61 = vadd.f32 %v4969_v60, %v5895_v7  ;;  %v1582_v62 = vpop.f32.mrb[77].mxu0 }
 0x18f   :  { %v1583_v0 = vadd.f32 %v5895_v7, %v1582_v62  ;;  %v4970_v1 = vpop.f32.mrb[78].mxu0  ;;  %5267 = vmatprep.mubr.bf16.mxu1 %v2753_v59 }
 0x190   :  { %v1594_v3 = vadd.f32 %v4970_v1, %v5895_v7  ;;  %v1585_v4 = vpop.f32.mrb[79].mxu0  ;;  %5268 = vmatmul.mubr.bf16.gmra.mrb[72].mxu1 %v2754_v58  ;;  %v2507_v6 = vmax.f32 %v1591_v61, 0.0 }
 0x191   :  { %v1586_v5 = vadd.f32 %v5895_v7, %v1585_v4  ;;  %v2505_v9 = vmax.f32 %v1583_v0, 0.0  ;;  %v5600_v0 = vld [vmem:[%s7640_s0 + $0x328] sm:$0xff]  }
 0x192   :  { %v2508_v8 = vmax.f32 %v1594_v3, 0.0  ;;  %5076 = vmatmul.mubr.bf16.gmra.mrb[184].mxu0 %v5592_v63  ;;  %v5601_v3 = vld [vmem:[%s7640_s0 + $0x330] sm:$0xff]  }
 0x193   :  { %v2506_v10 = vmax.f32 %v1586_v5, 0.0  ;;  %5079 = vmatprep.mubr.bf16.mxu0 %v5593_v2 }
 0x194   :  { %v2756_v11 = vpack.c.bf16 %v2508_v8, %v2507_v6 }
 0x195   :  { %v2755_v12 = vpack.c.bf16 %v2506_v10, %v2505_v9  ;;  %v4973_v13 = vpop.f32.mrb[80].mxu0 }
 0x196   :  { %v1607_v14 = vadd.f32 %v4973_v13, %v5895_v7  ;;  %v1598_v15 = vpop.f32.mrb[81].mxu0 }
 0x197   :  { %v1599_v17 = vadd.f32 %v5895_v7, %v1598_v15  ;;  %v4974_v18 = vpop.f32.mrb[82].mxu0  ;;  %5271 = vmatprep.mubr.bf16.mxu1 %v2755_v12 }
 0x198   :  { %v1610_v20 = vadd.f32 %v4974_v18, %v5895_v7  ;;  %v1601_v21 = vpop.f32.mrb[83].mxu0  ;;  %5272 = vmatmul.mubr.bf16.gmra.mrb[76].mxu1 %v2756_v11  ;;  %v2511_v23 = vmax.f32 %v1607_v14, 0.0 }
 0x199   :  { %v1602_v22 = vadd.f32 %v5895_v7, %v1601_v21  ;;  %v2509_v25 = vmax.f32 %v1599_v17, 0.0  ;;  %v5602_v17 = vld [vmem:[%s7640_s0 + $0x338] sm:$0xff]  }
 0x19a   :  { %v2512_v24 = vmax.f32 %v1610_v20, 0.0  ;;  %5080 = vmatmul.mubr.bf16.gmra.mrb[188].mxu0 %v5594_v16  ;;  %v5603_v20 = vld [vmem:[%s7640_s0 + $0x340] sm:$0xff]  }
 0x19b   :  { %v2510_v26 = vmax.f32 %v1602_v22, 0.0  ;;  %5083 = vmatprep.mubr.bf16.mxu0 %v5595_v19 }
 0x19c   :  { %v2758_v27 = vpack.c.bf16 %v2512_v24, %v2511_v23 }
 0x19d   :  { %v2757_v28 = vpack.c.bf16 %v2510_v26, %v2509_v25  ;;  %v4977_v29 = vpop.f32.mrb[84].mxu0 }
 0x19e   :  { %v1623_v30 = vadd.f32 %v4977_v29, %v5895_v7  ;;  %v1614_v31 = vpop.f32.mrb[85].mxu0 }
 0x19f   :  { %v1615_v33 = vadd.f32 %v5895_v7, %v1614_v31  ;;  %v4978_v34 = vpop.f32.mrb[86].mxu0  ;;  %5275 = vmatprep.mubr.bf16.mxu1 %v2757_v28 }
 0x1a0   :  { %v1626_v36 = vadd.f32 %v4978_v34, %v5895_v7  ;;  %v1617_v37 = vpop.f32.mrb[87].mxu0  ;;  %5276 = vmatmul.mubr.bf16.gmra.mrb[80].mxu1 %v2758_v27  ;;  %v2515_v39 = vmax.f32 %v1623_v30, 0.0 }
 0x1a1   :  { %v1618_v38 = vadd.f32 %v5895_v7, %v1617_v37  ;;  %v2513_v41 = vmax.f32 %v1615_v33, 0.0  ;;  %v5604_v33 = vld [vmem:[%s7640_s0 + $0x348] sm:$0xff]  }
 0x1a2   :  { %v2516_v40 = vmax.f32 %v1626_v36, 0.0  ;;  %5084 = vmatmul.mubr.bf16.gmra.mrb[192].mxu0 %v5596_v32  ;;  %v5605_v36 = vld [vmem:[%s7640_s0 + $0x350] sm:$0xff]  }
 0x1a3   :  { %v2514_v42 = vmax.f32 %v1618_v38, 0.0  ;;  %5087 = vmatprep.mubr.bf16.mxu0 %v5597_v35 }
 0x1a4   :  { %v2760_v43 = vpack.c.bf16 %v2516_v40, %v2515_v39 }
 0x1a5   :  { %v2759_v44 = vpack.c.bf16 %v2514_v42, %v2513_v41  ;;  %v4981_v45 = vpop.f32.mrb[88].mxu0 }
 0x1a6   :  { %v1639_v46 = vadd.f32 %v4981_v45, %v5895_v7  ;;  %v1630_v47 = vpop.f32.mrb[89].mxu0 }
 0x1a7   :  { %v1631_v49 = vadd.f32 %v5895_v7, %v1630_v47  ;;  %v4982_v50 = vpop.f32.mrb[90].mxu0  ;;  %5279 = vmatprep.mubr.bf16.mxu1 %v2759_v44  ;;  %v6160_v47 = vld [vmem:[%s7642_s2] ss:$0 sm:$0xff] }
 0x1a8   :  { %v1642_v52 = vadd.f32 %v4982_v50, %v5895_v7  ;;  %v1633_v53 = vpop.f32.mrb[91].mxu0  ;;  %5280 = vmatmul.mubr.bf16.gmra.mrb[84].mxu1 %v2760_v43  ;;  %v2519_v55 = vmax.f32 %v1639_v46, 0.0 }
 0x1a9   :  { %v1634_v54 = vadd.f32 %v5895_v7, %v1633_v53  ;;  %v2517_v57 = vmax.f32 %v1631_v49, 0.0 }
 0x1aa   :  { %v2520_v56 = vmax.f32 %v1642_v52, 0.0  ;;  %5088 = vmatmul.mubr.bf16.gmra.mrb[196].mxu0 %v5598_v48  ;;  %v5607_v52 = vld [vmem:[%s7640_s0 + $0x360] sm:$0xff]  }
 0x1ab   :  { %v2518_v58 = vmax.f32 %v1634_v54, 0.0  ;;  %5091 = vmatprep.mubr.bf16.mxu0 %v5599_v51 }
 0x1ac   :  { %v2762_v59 = vpack.c.bf16 %v2520_v56, %v2519_v55 }
 0x1ad   :  { %v2761_v60 = vpack.c.bf16 %v2518_v58, %v2517_v57  ;;  %v4985_v61 = vpop.f32.mrb[92].mxu0 }
 0x1ae   :  { %v1655_v62 = vadd.f32 %v4985_v61, %v5895_v7  ;;  %v1646_v63 = vpop.f32.mrb[93].mxu0 }
 0x1af   :  { %v1647_v1 = vadd.f32 %v5895_v7, %v1646_v63  ;;  %v4986_v2 = vpop.f32.mrb[94].mxu0  ;;  %5283 = vmatprep.mubr.bf16.mxu1 %v2761_v60 }
 0x1b0   :  { %v1658_v4 = vadd.f32 %v4986_v2, %v5895_v7  ;;  %v1649_v5 = vpop.f32.mrb[95].mxu0  ;;  %5284 = vmatmul.mubr.bf16.gmra.mrb[88].mxu1 %v2762_v59  ;;  %v2523_v8 = vmax.f32 %v1655_v62, 0.0 }
 0x1b1   :  { %v1650_v6 = vadd.f32 %v5895_v7, %v1649_v5  ;;  %v2521_v10 = vmax.f32 %v1647_v1, 0.0  ;;  %v5608_v1 = vld [vmem:[%s7640_s0 + $0x368] sm:$0xff]  }
 0x1b2   :  { %v2524_v9 = vmax.f32 %v1658_v4, 0.0  ;;  %5092 = vmatmul.mubr.bf16.gmra.mrb[200].mxu0 %v5600_v0  ;;  %v5609_v4 = vld [vmem:[%s7640_s0 + $0x370] sm:$0xff]  }
 0x1b3   :  { %v2522_v11 = vmax.f32 %v1650_v6, 0.0  ;;  %5095 = vmatprep.mubr.bf16.mxu0 %v5601_v3 }
 0x1b4   :  { %v2764_v12 = vpack.c.bf16 %v2524_v9, %v2523_v8  ;;  %v6185_v9 = vld [vmem:[%s7643_s4] ss:$0 sm:$0xff] }
 0x1b5   :  { %v2763_v13 = vpack.c.bf16 %v2522_v11, %v2521_v10  ;;  %v4989_v14 = vpop.f32.mrb[96].mxu0 }
 0x1b6   :  { %v1671_v15 = vadd.f32 %v4989_v14, %v5895_v7  ;;  %v1662_v16 = vpop.f32.mrb[97].mxu0 }
 0x1b7   :  { %v1663_v18 = vadd.f32 %v5895_v7, %v1662_v16  ;;  %v4990_v19 = vpop.f32.mrb[98].mxu0  ;;  %5287 = vmatprep.mubr.bf16.mxu1 %v2763_v13 }
 0x1b8   :  { %v1674_v21 = vadd.f32 %v4990_v19, %v5895_v7  ;;  %v1665_v22 = vpop.f32.mrb[99].mxu0  ;;  %5288 = vmatmul.mubr.bf16.gmra.mrb[92].mxu1 %v2764_v12  ;;  %v2527_v24 = vmax.f32 %v1671_v15, 0.0 }
 0x1b9   :  { %v1666_v23 = vadd.f32 %v5895_v7, %v1665_v22  ;;  %v2525_v26 = vmax.f32 %v1663_v18, 0.0 }
 0x1ba   :  { %v2528_v25 = vmax.f32 %v1674_v21, 0.0  ;;  %5096 = vmatmul.mubr.bf16.gmra.mrb[204].mxu0 %v5602_v17 }
 0x1bb   :  { %v2526_v27 = vmax.f32 %v1666_v23, 0.0  ;;  %5099 = vmatprep.mubr.bf16.mxu0 %v5603_v20 }
 0x1bc   :  { %v2766_v28 = vpack.c.bf16 %v2528_v25, %v2527_v24 }
 0x1bd   :  { %v2765_v29 = vpack.c.bf16 %v2526_v27, %v2525_v26  ;;  %v4993_v30 = vpop.f32.mrb[100].mxu0  ;;  %v5610_v26 = vld [vmem:[%s7640_s0 + $0x378] sm:$0xff]  }
 0x1be   :  { %v1687_v31 = vadd.f32 %v4993_v30, %v5895_v7  ;;  %v1678_v32 = vpop.f32.mrb[101].mxu0  ;;  %v5611_v30 = vld [vmem:[%s7640_s0 + $0x380] sm:$0xff]  }
 0x1bf   :  { %v1679_v34 = vadd.f32 %v5895_v7, %v1678_v32  ;;  %v4994_v35 = vpop.f32.mrb[102].mxu0  ;;  %5291 = vmatprep.mubr.bf16.mxu1 %v2765_v29 }
 0x1c0   :  { %v1690_v37 = vadd.f32 %v4994_v35, %v5895_v7  ;;  %v1681_v38 = vpop.f32.mrb[103].mxu0  ;;  %5292 = vmatmul.mubr.bf16.gmra.mrb[96].mxu1 %v2766_v28  ;;  %v2531_v40 = vmax.f32 %v1687_v31, 0.0 }
 0x1c1   :  { %v1682_v39 = vadd.f32 %v5895_v7, %v1681_v38  ;;  %v2529_v42 = vmax.f32 %v1679_v34, 0.0  ;;  %v5606_v7 = vld [vmem:[%s7640_s0 + $0x358] sm:$0xff]  }
 0x1c2   :  { %v2532_v41 = vmax.f32 %v1690_v37, 0.0  ;;  %5100 = vmatmul.mubr.bf16.gmra.mrb[208].mxu0 %v5604_v33 }
 0x1c3   :  { %v2530_v43 = vmax.f32 %v1682_v39, 0.0  ;;  %5103 = vmatprep.mubr.bf16.mxu0 %v5605_v36 }
 0x1c4   :  { %v2768_v44 = vpack.c.bf16 %v2532_v41, %v2531_v40 }
 0x1c5   :  { %v2767_v45 = vpack.c.bf16 %v2530_v43, %v2529_v42  ;;  %v4997_v46 = vpop.f32.mrb[104].mxu0 }
 0x1c6   :  { %v1703_v48 = vadd.f32 %v6160_v47, %v4997_v46  ;;  %v1694_v49 = vpop.f32.mrb[105].mxu0 }
 0x1c7   :  { %v1695_v50 = vadd.f32 %v6160_v47, %v1694_v49  ;;  %v4998_v51 = vpop.f32.mrb[106].mxu0  ;;  %5295 = vmatprep.mubr.bf16.mxu1 %v2767_v45 }
 0x1c8   :  { %v1706_v53 = vadd.f32 %v6160_v47, %v4998_v51  ;;  %v1697_v54 = vpop.f32.mrb[107].mxu0  ;;  %5296 = vmatmul.mubr.bf16.gmra.mrb[100].mxu1 %v2768_v44  ;;  %v2535_v56 = vmax.f32 %v1703_v48, 0.0 }
 0x1c9   :  { %v1698_v55 = vadd.f32 %v6160_v47, %v1697_v54  ;;  %v2533_v58 = vmax.f32 %v1695_v50, 0.0  ;;  %v5612_v50 = vld [vmem:[%s7640_s0 + $0x388] sm:$0xff]   ;;  %v5613_v54 = vld [vmem:[%s7640_s0 + $0x390] sm:$0xff]  }
 0x1ca   :  { %v2536_v57 = vmax.f32 %v1706_v53, 0.0  ;;  %5104 = vmatmul.mubr.bf16.gmra.mrb[212].mxu0 %v5606_v7 }
 0x1cb   :  { %v2534_v59 = vmax.f32 %v1698_v55, 0.0  ;;  %5107 = vmatprep.mubr.bf16.mxu0 %v5607_v52 }
 0x1cc   :  { %v2770_v60 = vpack.c.bf16 %v2536_v57, %v2535_v56 }
 0x1cd   :  { %v2769_v61 = vpack.c.bf16 %v2534_v59, %v2533_v58  ;;  %v5001_v62 = vpop.f32.mrb[108].mxu0 }
 0x1ce   :  { %v1719_v63 = vadd.f32 %v6160_v47, %v5001_v62  ;;  %v1710_v0 = vpop.f32.mrb[109].mxu0 }
 0x1cf   :  { %v1711_v2 = vadd.f32 %v6160_v47, %v1710_v0  ;;  %v5002_v3 = vpop.f32.mrb[110].mxu0  ;;  %5299 = vmatprep.mubr.bf16.mxu1 %v2769_v61 }
 0x1d0   :  { %v1722_v5 = vadd.f32 %v6160_v47, %v5002_v3  ;;  %v1713_v6 = vpop.f32.mrb[111].mxu0  ;;  %5300 = vmatmul.mubr.bf16.gmra.mrb[104].mxu1 %v2770_v60  ;;  %v2539_v10 = vmax.f32 %v1719_v63, 0.0 }
 0x1d1   :  { %v1714_v8 = vadd.f32 %v6160_v47, %v1713_v6  ;;  %v2537_v12 = vmax.f32 %v1711_v2, 0.0 }
 0x1d2   :  { %v2540_v11 = vmax.f32 %v1722_v5, 0.0  ;;  %5108 = vmatmul.mubr.bf16.gmra.mrb[216].mxu0 %v5608_v1 }
 0x1d3   :  { %v2538_v13 = vmax.f32 %v1714_v8, 0.0  ;;  %v5197_v14 = vpop.f32.mrb[0].mxu1  ;;  %5111 = vmatprep.mubr.bf16.mxu0 %v5609_v4 }
 0x1d4   :  { %v2772_v15 = vpack.c.bf16 %v2540_v11, %v2539_v10  ;;  %v2975_v16 = vadd.f32 %v5197_v14, %v6185_v9  ;;  %v2966_v17 = vpop.f32.mrb[1].mxu1 }
 0x1d5   :  { %v2771_v18 = vpack.c.bf16 %v2538_v13, %v2537_v12  ;;  %v2967_v19 = vadd.f32 %v6185_v9, %v2966_v17  ;;  %v5005_v20 = vpop.f32.mrb[112].mxu0  ;;  %v5198_v21 = vpop.f32.mrb[2].mxu1  ;;  %v5614_v12 = vld [vmem:[%s7640_s0 + $0x398] sm:$0xff]  }
 0x1d6   :  { %4119 = vst [vmem:[%s7644_s5 + $0x10] sm:$0xff] %v2975_v16  ;;  %v1735_v22 = vadd.f32 %v6160_v47, %v5005_v20  ;;  %v2978_v23 = vadd.f32 %v5198_v21, %v6185_v9  ;;  %v1726_v24 = vpop.f32.mrb[113].mxu0  ;;  %v2969_v25 = vpop.f32.mrb[3].mxu1  ;;  %v5615_v16 = vld [vmem:[%s7640_s0 + $0x3a0] sm:$0xff]  }
 0x1d7   :  { %4117 = vst [vmem:[%s7644_s5] sm:$0xff] %v2967_v19  ;;  %v1727_v27 = vadd.f32 %v6160_v47, %v1726_v24  ;;  %v2970_v28 = vadd.f32 %v6185_v9, %v2969_v25  ;;  %v5006_v29 = vpop.f32.mrb[114].mxu0  ;;  %5303 = vmatprep.mubr.bf16.mxu1 %v2771_v18 }
 0x1d8   :  { %4120 = vst [vmem:[%s7644_s5 + $0x18] sm:$0xff] %v2978_v23  ;;  %v1738_v31 = vadd.f32 %v6160_v47, %v5006_v29  ;;  %v1729_v32 = vpop.f32.mrb[115].mxu0  ;;  %5304 = vmatmul.mubr.bf16.gmra.mrb[108].mxu1 %v2772_v15  ;;  %v2543_v34 = vmax.f32 %v1735_v22, 0.0 }
 0x1d9   :  { %4118 = vst [vmem:[%s7644_s5 + $0x8] sm:$0xff] %v2970_v28  ;;  %v1730_v33 = vadd.f32 %v6160_v47, %v1729_v32  ;;  %v2541_v36 = vmax.f32 %v1727_v27, 0.0 }
 0x1da   :  { %v2544_v35 = vmax.f32 %v1738_v31, 0.0  ;;  %5112 = vmatmul.mubr.bf16.gmra.mrb[220].mxu0 %v5610_v26 }
 0x1db   :  { %v2542_v37 = vmax.f32 %v1730_v33, 0.0  ;;  %v5201_v38 = vpop.f32.mrb[4].mxu1  ;;  %5115 = vmatprep.mubr.bf16.mxu0 %v5611_v30 }
 0x1dc   :  { %v2774_v39 = vpack.c.bf16 %v2544_v35, %v2543_v34  ;;  %v2991_v40 = vadd.f32 %v5201_v38, %v6185_v9  ;;  %v2982_v41 = vpop.f32.mrb[5].mxu1 }
 0x1dd   :  { %v2773_v42 = vpack.c.bf16 %v2542_v37, %v2541_v36  ;;  %v2983_v43 = vadd.f32 %v6185_v9, %v2982_v41  ;;  %v5009_v44 = vpop.f32.mrb[116].mxu0  ;;  %v5202_v45 = vpop.f32.mrb[6].mxu1  ;;  %v5616_v36 = vld [vmem:[%s7640_s0 + $0x3a8] sm:$0xff]  }
 0x1de   :  { %4123 = vst [vmem:[%s7644_s5 + $0x30] sm:$0xff] %v2991_v40  ;;  %v1751_v46 = vadd.f32 %v6160_v47, %v5009_v44  ;;  %v2994_v48 = vadd.f32 %v5202_v45, %v6185_v9  ;;  %v1742_v49 = vpop.f32.mrb[117].mxu0  ;;  %v2985_v7 = vpop.f32.mrb[7].mxu1  ;;  %v5617_v40 = vld [vmem:[%s7640_s0 + $0x3b0] sm:$0xff]  }
 0x1df   :  { %4121 = vst [vmem:[%s7644_s5 + $0x20] sm:$0xff] %v2983_v43  ;;  %v1743_v51 = vadd.f32 %v6160_v47, %v1742_v49  ;;  %v2986_v52 = vadd.f32 %v6185_v9, %v2985_v7  ;;  %v5010_v53 = vpop.f32.mrb[118].mxu0  ;;  %5307 = vmatprep.mubr.bf16.mxu1 %v2773_v42 }
 0x1e0   :  { %4124 = vst [vmem:[%s7644_s5 + $0x38] sm:$0xff] %v2994_v48  ;;  %v1754_v55 = vadd.f32 %v6160_v47, %v5010_v53  ;;  %v1745_v56 = vpop.f32.mrb[119].mxu0  ;;  %5308 = vmatmul.mubr.bf16.gmra.mrb[112].mxu1 %v2774_v39  ;;  %v2547_v58 = vmax.f32 %v1751_v46, 0.0 }
 0x1e1   :  { %4122 = vst [vmem:[%s7644_s5 + $0x28] sm:$0xff] %v2986_v52  ;;  %v1746_v57 = vadd.f32 %v6160_v47, %v1745_v56  ;;  %v2545_v60 = vmax.f32 %v1743_v51, 0.0 }
 0x1e2   :  { %v2548_v59 = vmax.f32 %v1754_v55, 0.0  ;;  %5116 = vmatmul.mubr.bf16.gmra.mrb[224].mxu0 %v5612_v50 }
 0x1e3   :  { %v2546_v61 = vmax.f32 %v1746_v57, 0.0  ;;  %v5205_v62 = vpop.f32.mrb[8].mxu1  ;;  %5119 = vmatprep.mubr.bf16.mxu0 %v5613_v54 }
 0x1e4   :  { %v2776_v63 = vpack.c.bf16 %v2548_v59, %v2547_v58  ;;  %v3007_v0 = vadd.f32 %v5205_v62, %v6185_v9  ;;  %v2998_v1 = vpop.f32.mrb[9].mxu1 }
 0x1e5   :  { %v2775_v2 = vpack.c.bf16 %v2546_v61, %v2545_v60  ;;  %v2999_v3 = vadd.f32 %v6185_v9, %v2998_v1  ;;  %v5013_v4 = vpop.f32.mrb[120].mxu0  ;;  %v5206_v5 = vpop.f32.mrb[10].mxu1  ;;  %v5618_v60 = vld [vmem:[%s7640_s0 + $0x3b8] sm:$0xff]  }
 0x1e6   :  { %4127 = vst [vmem:[%s7644_s5 + $0x50] sm:$0xff] %v3007_v0  ;;  %v1767_v6 = vadd.f32 %v6160_v47, %v5013_v4  ;;  %v3010_v8 = vadd.f32 %v5206_v5, %v6185_v9  ;;  %v1758_v10 = vpop.f32.mrb[121].mxu0  ;;  %v3001_v11 = vpop.f32.mrb[11].mxu1  ;;  %v5619_v0 = vld [vmem:[%s7640_s0 + $0x3c0] sm:$0xff]  }
 0x1e7   :  { %4125 = vst [vmem:[%s7644_s5 + $0x40] sm:$0xff] %v2999_v3  ;;  %v1759_v13 = vadd.f32 %v6160_v47, %v1758_v10  ;;  %v3002_v14 = vadd.f32 %v6185_v9, %v3001_v11  ;;  %v5014_v15 = vpop.f32.mrb[122].mxu0  ;;  %5311 = vmatprep.mubr.bf16.mxu1 %v2775_v2 }
 0x1e8   :  { %4128 = vst [vmem:[%s7644_s5 + $0x58] sm:$0xff] %v3010_v8  ;;  %v1770_v17 = vadd.f32 %v6160_v47, %v5014_v15  ;;  %v1761_v18 = vpop.f32.mrb[123].mxu0  ;;  %5312 = vmatmul.mubr.bf16.gmra.mrb[116].mxu1 %v2776_v63  ;;  %v2551_v20 = vmax.f32 %v1767_v6, 0.0 }
 0x1e9   :  { %4126 = vst [vmem:[%s7644_s5 + $0x48] sm:$0xff] %v3002_v14  ;;  %v1762_v19 = vadd.f32 %v6160_v47, %v1761_v18  ;;  %v2549_v22 = vmax.f32 %v1759_v13, 0.0 }
 0x1ea   :  { %v2552_v21 = vmax.f32 %v1770_v17, 0.0  ;;  %5120 = vmatmul.mubr.bf16.gmra.mrb[228].mxu0 %v5614_v12 }
 0x1eb   :  { %v2550_v23 = vmax.f32 %v1762_v19, 0.0  ;;  %v5209_v24 = vpop.f32.mrb[12].mxu1  ;;  %5123 = vmatprep.mubr.bf16.mxu0 %v5615_v16 }
 0x1ec   :  { %v2778_v25 = vpack.c.bf16 %v2552_v21, %v2551_v20  ;;  %v3023_v26 = vadd.f32 %v5209_v24, %v6185_v9  ;;  %v3014_v27 = vpop.f32.mrb[13].mxu1 }
 0x1ed   :  { %v2777_v28 = vpack.c.bf16 %v2550_v23, %v2549_v22  ;;  %v3015_v29 = vadd.f32 %v6185_v9, %v3014_v27  ;;  %v5017_v30 = vpop.f32.mrb[124].mxu0  ;;  %v5210_v31 = vpop.f32.mrb[14].mxu1  ;;  %v5620_v22 = vld [vmem:[%s7640_s0 + $0x3c8] sm:$0xff]  }
 0x1ee   :  { %4131 = vst [vmem:[%s7644_s5 + $0x70] sm:$0xff] %v3023_v26  ;;  %v1783_v32 = vadd.f32 %v6160_v47, %v5017_v30  ;;  %v3026_v33 = vadd.f32 %v5210_v31, %v6185_v9  ;;  %v1774_v34 = vpop.f32.mrb[125].mxu0  ;;  %v3017_v35 = vpop.f32.mrb[15].mxu1  ;;  %v5621_v26 = vld [vmem:[%s7640_s0 + $0x3d0] sm:$0xff]  }
 0x1ef   :  { %4129 = vst [vmem:[%s7644_s5 + $0x60] sm:$0xff] %v3015_v29  ;;  %v1775_v37 = vadd.f32 %v6160_v47, %v1774_v34  ;;  %v3018_v38 = vadd.f32 %v6185_v9, %v3017_v35  ;;  %v5018_v39 = vpop.f32.mrb[126].mxu0  ;;  %5315 = vmatprep.mubr.bf16.mxu1 %v2777_v28 }
 0x1f0   :  { %4132 = vst [vmem:[%s7644_s5 + $0x78] sm:$0xff] %v3026_v33  ;;  %v1786_v41 = vadd.f32 %v6160_v47, %v5018_v39  ;;  %v1777_v42 = vpop.f32.mrb[127].mxu0  ;;  %5316 = vmatmul.mubr.bf16.gmra.mrb[120].mxu1 %v2778_v25  ;;  %v2555_v44 = vmax.f32 %v1783_v32, 0.0 }
 0x1f1   :  { %4130 = vst [vmem:[%s7644_s5 + $0x68] sm:$0xff] %v3018_v38  ;;  %v1778_v43 = vadd.f32 %v6160_v47, %v1777_v42  ;;  %v2553_v46 = vmax.f32 %v1775_v37, 0.0 }
 0x1f2   :  { %v2556_v45 = vmax.f32 %v1786_v41, 0.0  ;;  %5124 = vmatmul.mubr.bf16.gmra.mrb[232].mxu0 %v5616_v36 }
 0x1f3   :  { %v2554_v48 = vmax.f32 %v1778_v43, 0.0  ;;  %v5213_v49 = vpop.f32.mrb[16].mxu1  ;;  %5127 = vmatprep.mubr.bf16.mxu0 %v5617_v40 }
 0x1f4   :  { %v2780_v7 = vpack.c.bf16 %v2556_v45, %v2555_v44  ;;  %v3039_v50 = vadd.f32 %v5213_v49, %v6185_v9  ;;  %v3030_v51 = vpop.f32.mrb[17].mxu1 }
 0x1f5   :  { %v2779_v52 = vpack.c.bf16 %v2554_v48, %v2553_v46  ;;  %v3031_v53 = vadd.f32 %v6185_v9, %v3030_v51  ;;  %v5021_v54 = vpop.f32.mrb[128].mxu0  ;;  %v5214_v55 = vpop.f32.mrb[18].mxu1  ;;  %v5622_v46 = vld [vmem:[%s7640_s0 + $0x3d8] sm:$0xff]  }
 0x1f6   :  { %4135 = vst [vmem:[%s7644_s5 + $0x90] sm:$0xff] %v3039_v50  ;;  %v1799_v56 = vadd.f32 %v6160_v47, %v5021_v54  ;;  %v3042_v57 = vadd.f32 %v5214_v55, %v6185_v9  ;;  %v1790_v58 = vpop.f32.mrb[129].mxu0  ;;  %v3033_v59 = vpop.f32.mrb[19].mxu1  ;;  %v5623_v50 = vld [vmem:[%s7640_s0 + $0x3e0] sm:$0xff]  }
 0x1f7   :  { %4133 = vst [vmem:[%s7644_s5 + $0x80] sm:$0xff] %v3031_v53  ;;  %v1791_v61 = vadd.f32 %v6160_v47, %v1790_v58  ;;  %v3034_v62 = vadd.f32 %v6185_v9, %v3033_v59  ;;  %v5022_v63 = vpop.f32.mrb[130].mxu0  ;;  %5319 = vmatprep.mubr.bf16.mxu1 %v2779_v52 }
 0x1f8   :  { %4136 = vst [vmem:[%s7644_s5 + $0x98] sm:$0xff] %v3042_v57  ;;  %v1802_v1 = vadd.f32 %v6160_v47, %v5022_v63  ;;  %v1793_v2 = vpop.f32.mrb[131].mxu0  ;;  %5320 = vmatmul.mubr.bf16.gmra.mrb[124].mxu1 %v2780_v7  ;;  %v2559_v4 = vmax.f32 %v1799_v56, 0.0 }
 0x1f9   :  { %4134 = vst [vmem:[%s7644_s5 + $0x88] sm:$0xff] %v3034_v62  ;;  %v1794_v3 = vadd.f32 %v6160_v47, %v1793_v2  ;;  %v2557_v6 = vmax.f32 %v1791_v61, 0.0 }
 0x1fa   :  { %v2560_v5 = vmax.f32 %v1802_v1, 0.0  ;;  %5128 = vmatmul.mubr.bf16.gmra.mrb[236].mxu0 %v5618_v60 }
 0x1fb   :  { %v2558_v8 = vmax.f32 %v1794_v3, 0.0  ;;  %v5217_v10 = vpop.f32.mrb[20].mxu1  ;;  %5131 = vmatprep.mubr.bf16.mxu0 %v5619_v0 }
 0x1fc   :  { %v2782_v11 = vpack.c.bf16 %v2560_v5, %v2559_v4  ;;  %v3055_v12 = vadd.f32 %v5217_v10, %v6185_v9  ;;  %v3046_v13 = vpop.f32.mrb[21].mxu1 }
 0x1fd   :  { %v2781_v14 = vpack.c.bf16 %v2558_v8, %v2557_v6  ;;  %v3047_v15 = vadd.f32 %v6185_v9, %v3046_v13  ;;  %v5025_v16 = vpop.f32.mrb[132].mxu0  ;;  %v5218_v17 = vpop.f32.mrb[22].mxu1  ;;  %v5624_v6 = vld [vmem:[%s7640_s0 + $0x3e8] sm:$0xff]  }
 0x1fe   :  { %4139 = vst [vmem:[%s7644_s5 + $0xb0] sm:$0xff] %v3055_v12  ;;  %v1815_v18 = vadd.f32 %v6160_v47, %v5025_v16  ;;  %v3058_v19 = vadd.f32 %v5218_v17, %v6185_v9  ;;  %v1806_v20 = vpop.f32.mrb[133].mxu0  ;;  %v3049_v21 = vpop.f32.mrb[23].mxu1  ;;  %v5625_v12 = vld [vmem:[%s7640_s0 + $0x3f0] sm:$0xff]  }
 0x1ff   :  { %4137 = vst [vmem:[%s7644_s5 + $0xa0] sm:$0xff] %v3047_v15  ;;  %v1807_v23 = vadd.f32 %v6160_v47, %v1806_v20  ;;  %v3050_v24 = vadd.f32 %v6185_v9, %v3049_v21  ;;  %v5026_v25 = vpop.f32.mrb[134].mxu0  ;;  %5323 = vmatprep.mubr.bf16.mxu1 %v2781_v14 }
 0x200   :  { %4140 = vst [vmem:[%s7644_s5 + $0xb8] sm:$0xff] %v3058_v19  ;;  %v1818_v27 = vadd.f32 %v6160_v47, %v5026_v25  ;;  %v1809_v28 = vpop.f32.mrb[135].mxu0  ;;  %5324 = vmatmul.mubr.bf16.gmra.mrb[128].mxu1 %v2782_v11  ;;  %v2563_v30 = vmax.f32 %v1815_v18, 0.0 }
 0x201   :  { %4138 = vst [vmem:[%s7644_s5 + $0xa8] sm:$0xff] %v3050_v24  ;;  %v1810_v29 = vadd.f32 %v6160_v47, %v1809_v28  ;;  %v2561_v32 = vmax.f32 %v1807_v23, 0.0 }
 0x202   :  { %v2564_v31 = vmax.f32 %v1818_v27, 0.0  ;;  %5132 = vmatmul.mubr.bf16.gmra.mrb[240].mxu0 %v5620_v22 }
 0x203   :  { %v2562_v33 = vmax.f32 %v1810_v29, 0.0  ;;  %v5221_v34 = vpop.f32.mrb[24].mxu1  ;;  %5135 = vmatprep.mubr.bf16.mxu0 %v5621_v26 }
 0x204   :  { %v2784_v35 = vpack.c.bf16 %v2564_v31, %v2563_v30  ;;  %v3071_v36 = vadd.f32 %v5221_v34, %v6185_v9  ;;  %v3062_v37 = vpop.f32.mrb[25].mxu1 }
 0x205   :  { %v2783_v38 = vpack.c.bf16 %v2562_v33, %v2561_v32  ;;  %v3063_v39 = vadd.f32 %v6185_v9, %v3062_v37  ;;  %v5029_v40 = vpop.f32.mrb[136].mxu0  ;;  %v5222_v41 = vpop.f32.mrb[26].mxu1  ;;  %v5626_v32 = vld [vmem:[%s7640_s0 + $0x3f8] sm:$0xff]  }
 0x206   :  { %4143 = vst [vmem:[%s7644_s5 + $0xd0] sm:$0xff] %v3071_v36  ;;  %v1831_v42 = vadd.f32 %v6160_v47, %v5029_v40  ;;  %v3074_v43 = vadd.f32 %v5222_v41, %v6185_v9  ;;  %v1822_v44 = vpop.f32.mrb[137].mxu0  ;;  %v3065_v45 = vpop.f32.mrb[27].mxu1  ;;  %v5627_v36 = vld [vmem:[%s7640_s0 + $0x400] sm:$0xff]  }
 0x207   :  { %4141 = vst [vmem:[%s7644_s5 + $0xc0] sm:$0xff] %v3063_v39  ;;  %v1823_v48 = vadd.f32 %v6160_v47, %v1822_v44  ;;  %v3066_v49 = vadd.f32 %v6185_v9, %v3065_v45  ;;  %v5030_v7 = vpop.f32.mrb[138].mxu0  ;;  %5327 = vmatprep.mubr.bf16.mxu1 %v2783_v38 }
 0x208   :  { %4144 = vst [vmem:[%s7644_s5 + $0xd8] sm:$0xff] %v3074_v43  ;;  %v1834_v51 = vadd.f32 %v6160_v47, %v5030_v7  ;;  %v1825_v52 = vpop.f32.mrb[139].mxu0  ;;  %5328 = vmatmul.mubr.bf16.gmra.mrb[132].mxu1 %v2784_v35  ;;  %v2567_v54 = vmax.f32 %v1831_v42, 0.0 }
 0x209   :  { %4142 = vst [vmem:[%s7644_s5 + $0xc8] sm:$0xff] %v3066_v49  ;;  %v1826_v53 = vadd.f32 %v6160_v47, %v1825_v52  ;;  %v2565_v56 = vmax.f32 %v1823_v48, 0.0 }
 0x20a   :  { %v2568_v55 = vmax.f32 %v1834_v51, 0.0  ;;  %5136 = vmatmul.mubr.bf16.gmra.mrb[244].mxu0 %v5622_v46 }
 0x20b   :  { %v2566_v57 = vmax.f32 %v1826_v53, 0.0  ;;  %v5225_v58 = vpop.f32.mrb[28].mxu1  ;;  %5139 = vmatprep.mubr.bf16.mxu0 %v5623_v50 }
 0x20c   :  { %v2786_v59 = vpack.c.bf16 %v2568_v55, %v2567_v54  ;;  %v3087_v60 = vadd.f32 %v5225_v58, %v6185_v9  ;;  %v3078_v61 = vpop.f32.mrb[29].mxu1 }
 0x20d   :  { %v2785_v62 = vpack.c.bf16 %v2566_v57, %v2565_v56  ;;  %v3079_v63 = vadd.f32 %v6185_v9, %v3078_v61  ;;  %v5033_v0 = vpop.f32.mrb[140].mxu0  ;;  %v5226_v1 = vpop.f32.mrb[30].mxu1  ;;  %v5628_v56 = vld [vmem:[%s7640_s0 + $0x408] sm:$0xff]  }
 0x20e   :  { %4147 = vst [vmem:[%s7644_s5 + $0xf0] sm:$0xff] %v3087_v60  ;;  %v1847_v2 = vadd.f32 %v6160_v47, %v5033_v0  ;;  %v3090_v3 = vadd.f32 %v5226_v1, %v6185_v9  ;;  %v1838_v4 = vpop.f32.mrb[141].mxu0  ;;  %v3081_v5 = vpop.f32.mrb[31].mxu1  ;;  %v5629_v60 = vld [vmem:[%s7640_s0 + $0x410] sm:$0xff]  }
 0x20f   :  { %4145 = vst [vmem:[%s7644_s5 + $0xe0] sm:$0xff] %v3079_v63  ;;  %v1839_v8 = vadd.f32 %v6160_v47, %v1838_v4  ;;  %v3082_v10 = vadd.f32 %v6185_v9, %v3081_v5  ;;  %v5034_v11 = vpop.f32.mrb[142].mxu0  ;;  %5331 = vmatprep.mubr.bf16.mxu1 %v2785_v62 }
 0x210   :  { %4148 = vst [vmem:[%s7644_s5 + $0xf8] sm:$0xff] %v3090_v3  ;;  %v1850_v13 = vadd.f32 %v6160_v47, %v5034_v11  ;;  %v1841_v14 = vpop.f32.mrb[143].mxu0  ;;  %5332 = vmatmul.mubr.bf16.gmra.mrb[136].mxu1 %v2786_v59  ;;  %v2571_v16 = vmax.f32 %v1847_v2, 0.0 }
 0x211   :  { %4146 = vst [vmem:[%s7644_s5 + $0xe8] sm:$0xff] %v3082_v10  ;;  %v1842_v15 = vadd.f32 %v6160_v47, %v1841_v14  ;;  %v2569_v18 = vmax.f32 %v1839_v8, 0.0 }
 0x212   :  { %v2572_v17 = vmax.f32 %v1850_v13, 0.0  ;;  %5140 = vmatmul.mubr.bf16.gmra.mrb[248].mxu0 %v5624_v6 }
 0x213   :  { %v2570_v19 = vmax.f32 %v1842_v15, 0.0  ;;  %v5229_v20 = vpop.f32.mrb[32].mxu1  ;;  %5143 = vmatprep.mubr.bf16.mxu0 %v5625_v12 }
 0x214   :  { %v2788_v21 = vpack.c.bf16 %v2572_v17, %v2571_v16  ;;  %v3103_v22 = vadd.f32 %v5229_v20, %v6185_v9  ;;  %v3094_v23 = vpop.f32.mrb[33].mxu1 }
 0x215   :  { %v2787_v24 = vpack.c.bf16 %v2570_v19, %v2569_v18  ;;  %v3095_v25 = vadd.f32 %v6185_v9, %v3094_v23  ;;  %v5037_v26 = vpop.f32.mrb[144].mxu0  ;;  %v5230_v27 = vpop.f32.mrb[34].mxu1  ;;  %v5630_v18 = vld [vmem:[%s7640_s0 + $0x418] sm:$0xff]  }
 0x216   :  { %4151 = vst [vmem:[%s7644_s5 + $0x110] sm:$0xff] %v3103_v22  ;;  %v1863_v28 = vadd.f32 %v6160_v47, %v5037_v26  ;;  %v3106_v29 = vadd.f32 %v5230_v27, %v6185_v9  ;;  %v1854_v30 = vpop.f32.mrb[145].mxu0  ;;  %v3097_v31 = vpop.f32.mrb[35].mxu1  ;;  %v5631_v22 = vld [vmem:[%s7640_s0 + $0x420] sm:$0xff]  }
 0x217   :  { %4149 = vst [vmem:[%s7644_s5 + $0x100] sm:$0xff] %v3095_v25  ;;  %v1855_v33 = vadd.f32 %v6160_v47, %v1854_v30  ;;  %v3098_v34 = vadd.f32 %v6185_v9, %v3097_v31  ;;  %v5038_v35 = vpop.f32.mrb[146].mxu0  ;;  %5335 = vmatprep.mubr.bf16.mxu1 %v2787_v24 }
 0x218   :  { %4152 = vst [vmem:[%s7644_s5 + $0x118] sm:$0xff] %v3106_v29  ;;  %v1866_v37 = vadd.f32 %v6160_v47, %v5038_v35  ;;  %v1857_v38 = vpop.f32.mrb[147].mxu0  ;;  %5336 = vmatmul.mubr.bf16.gmra.mrb[140].mxu1 %v2788_v21  ;;  %v2575_v40 = vmax.f32 %v1863_v28, 0.0 }
 0x219   :  { %4150 = vst [vmem:[%s7644_s5 + $0x108] sm:$0xff] %v3098_v34  ;;  %v1858_v39 = vadd.f32 %v6160_v47, %v1857_v38  ;;  %v2573_v42 = vmax.f32 %v1855_v33, 0.0 }
 0x21a   :  { %v2576_v41 = vmax.f32 %v1866_v37, 0.0  ;;  %5144 = vmatmul.mubr.bf16.gmra.mrb[252].mxu0 %v5626_v32 }
 0x21b   :  { %v2574_v43 = vmax.f32 %v1858_v39, 0.0  ;;  %v5233_v44 = vpop.f32.mrb[36].mxu1  ;;  %5147 = vmatprep.mubr.bf16.mxu0 %v5627_v36 }
 0x21c   :  { %v2790_v45 = vpack.c.bf16 %v2576_v41, %v2575_v40  ;;  %v3119_v46 = vadd.f32 %v5233_v44, %v6185_v9  ;;  %v3110_v48 = vpop.f32.mrb[37].mxu1 }
 0x21d   :  { %v2789_v49 = vpack.c.bf16 %v2574_v43, %v2573_v42  ;;  %v3111_v7 = vadd.f32 %v6185_v9, %v3110_v48  ;;  %v5041_v50 = vpop.f32.mrb[148].mxu0  ;;  %v5234_v51 = vpop.f32.mrb[38].mxu1  ;;  %v5632_v42 = vld [vmem:[%s7640_s0 + $0x428] sm:$0xff]  }
 0x21e   :  { %4155 = vst [vmem:[%s7644_s5 + $0x130] sm:$0xff] %v3119_v46  ;;  %v1879_v52 = vadd.f32 %v6160_v47, %v5041_v50  ;;  %v3122_v53 = vadd.f32 %v5234_v51, %v6185_v9  ;;  %v1870_v54 = vpop.f32.mrb[149].mxu0  ;;  %v3113_v55 = vpop.f32.mrb[39].mxu1  ;;  %v5633_v46 = vld [vmem:[%s7640_s0 + $0x430] sm:$0xff]  }
 0x21f   :  { %4153 = vst [vmem:[%s7644_s5 + $0x120] sm:$0xff] %v3111_v7  ;;  %v1871_v57 = vadd.f32 %v6160_v47, %v1870_v54  ;;  %v3114_v58 = vadd.f32 %v6185_v9, %v3113_v55  ;;  %v5042_v59 = vpop.f32.mrb[150].mxu0  ;;  %5339 = vmatprep.mubr.bf16.mxu1 %v2789_v49 }
 0x220   :  { %4156 = vst [vmem:[%s7644_s5 + $0x138] sm:$0xff] %v3122_v53  ;;  %v1882_v61 = vadd.f32 %v6160_v47, %v5042_v59  ;;  %v1873_v62 = vpop.f32.mrb[151].mxu0  ;;  %5340 = vmatmul.mubr.bf16.gmra.mrb[144].mxu1 %v2790_v45  ;;  %v2579_v0 = vmax.f32 %v1879_v52, 0.0 }
 0x221   :  { %4154 = vst [vmem:[%s7644_s5 + $0x128] sm:$0xff] %v3114_v58  ;;  %v1874_v63 = vadd.f32 %v6160_v47, %v1873_v62  ;;  %v2577_v2 = vmax.f32 %v1871_v57, 0.0 }
 0x222   :  { %v2580_v1 = vmax.f32 %v1882_v61, 0.0  ;;  %5148 = vmatmul.mubr.bf16.gmra.mrb[0].mxu0 %v5628_v56 }
 0x223   :  { %v2578_v3 = vmax.f32 %v1874_v63, 0.0  ;;  %v5237_v4 = vpop.f32.mrb[40].mxu1  ;;  %5151 = vmatprep.mubr.bf16.mxu0 %v5629_v60 }
 0x224   :  { %v2792_v5 = vpack.c.bf16 %v2580_v1, %v2579_v0  ;;  %v3135_v6 = vadd.f32 %v5237_v4, %v6185_v9  ;;  %v3126_v8 = vpop.f32.mrb[41].mxu1 }
 0x225   :  { %v2791_v10 = vpack.c.bf16 %v2578_v3, %v2577_v2  ;;  %v3127_v11 = vadd.f32 %v6185_v9, %v3126_v8  ;;  %v5045_v12 = vpop.f32.mrb[152].mxu0  ;;  %v5238_v13 = vpop.f32.mrb[42].mxu1  ;;  %v5634_v2 = vld [vmem:[%s7640_s0 + $0x438] sm:$0xff]  }
 0x226   :  { %4159 = vst [vmem:[%s7644_s5 + $0x150] sm:$0xff] %v3135_v6  ;;  %v1895_v14 = vadd.f32 %v6160_v47, %v5045_v12  ;;  %v3138_v15 = vadd.f32 %v5238_v13, %v6185_v9  ;;  %v1886_v16 = vpop.f32.mrb[153].mxu0  ;;  %v3129_v17 = vpop.f32.mrb[43].mxu1  ;;  %v5635_v6 = vld [vmem:[%s7640_s0 + $0x440] sm:$0xff]  }
 0x227   :  { %4157 = vst [vmem:[%s7644_s5 + $0x140] sm:$0xff] %v3127_v11  ;;  %v1887_v19 = vadd.f32 %v6160_v47, %v1886_v16  ;;  %v3130_v20 = vadd.f32 %v6185_v9, %v3129_v17  ;;  %v5046_v21 = vpop.f32.mrb[154].mxu0  ;;  %5343 = vmatprep.mubr.bf16.mxu1 %v2791_v10 }
 0x228   :  { %4160 = vst [vmem:[%s7644_s5 + $0x158] sm:$0xff] %v3138_v15  ;;  %v1898_v23 = vadd.f32 %v6160_v47, %v5046_v21  ;;  %v1889_v24 = vpop.f32.mrb[155].mxu0  ;;  %5344 = vmatmul.mubr.bf16.gmra.mrb[148].mxu1 %v2792_v5  ;;  %v2583_v26 = vmax.f32 %v1895_v14, 0.0 }
 0x229   :  { %4158 = vst [vmem:[%s7644_s5 + $0x148] sm:$0xff] %v3130_v20  ;;  %v1890_v25 = vadd.f32 %v6160_v47, %v1889_v24  ;;  %v2581_v28 = vmax.f32 %v1887_v19, 0.0 }
 0x22a   :  { %v2584_v27 = vmax.f32 %v1898_v23, 0.0  ;;  %5152 = vmatmul.mubr.bf16.gmra.mrb[4].mxu0 %v5630_v18 }
 0x22b   :  { %v2582_v29 = vmax.f32 %v1890_v25, 0.0  ;;  %v5241_v30 = vpop.f32.mrb[44].mxu1  ;;  %5155 = vmatprep.mubr.bf16.mxu0 %v5631_v22 }
 0x22c   :  { %v2794_v31 = vpack.c.bf16 %v2584_v27, %v2583_v26  ;;  %v3151_v32 = vadd.f32 %v5241_v30, %v6185_v9  ;;  %v3142_v33 = vpop.f32.mrb[45].mxu1 }
 0x22d   :  { %v2793_v34 = vpack.c.bf16 %v2582_v29, %v2581_v28  ;;  %v3143_v35 = vadd.f32 %v6185_v9, %v3142_v33  ;;  %v5049_v36 = vpop.f32.mrb[156].mxu0  ;;  %v5242_v37 = vpop.f32.mrb[46].mxu1  ;;  %v5636_v28 = vld [vmem:[%s7640_s0 + $0x448] sm:$0xff]  }
 0x22e   :  { %4163 = vst [vmem:[%s7644_s5 + $0x170] sm:$0xff] %v3151_v32  ;;  %v1911_v38 = vadd.f32 %v6160_v47, %v5049_v36  ;;  %v3154_v39 = vadd.f32 %v5242_v37, %v6185_v9  ;;  %v1902_v40 = vpop.f32.mrb[157].mxu0  ;;  %v3145_v41 = vpop.f32.mrb[47].mxu1  ;;  %v5637_v32 = vld [vmem:[%s7640_s0 + $0x450] sm:$0xff]  }
 0x22f   :  { %4161 = vst [vmem:[%s7644_s5 + $0x160] sm:$0xff] %v3143_v35  ;;  %v1903_v43 = vadd.f32 %v6160_v47, %v1902_v40  ;;  %v3146_v44 = vadd.f32 %v6185_v9, %v3145_v41  ;;  %v5050_v45 = vpop.f32.mrb[158].mxu0  ;;  %5347 = vmatprep.mubr.bf16.mxu1 %v2793_v34 }
 0x230   :  { %4164 = vst [vmem:[%s7644_s5 + $0x178] sm:$0xff] %v3154_v39  ;;  %v1914_v48 = vadd.f32 %v6160_v47, %v5050_v45  ;;  %v1905_v49 = vpop.f32.mrb[159].mxu0  ;;  %5348 = vmatmul.mubr.bf16.gmra.mrb[152].mxu1 %v2794_v31  ;;  %v2587_v50 = vmax.f32 %v1911_v38, 0.0 }
 0x231   :  { %4162 = vst [vmem:[%s7644_s5 + $0x168] sm:$0xff] %v3146_v44  ;;  %v1906_v7 = vadd.f32 %v6160_v47, %v1905_v49  ;;  %v2585_v52 = vmax.f32 %v1903_v43, 0.0 }
 0x232   :  { %v2588_v51 = vmax.f32 %v1914_v48, 0.0  ;;  %5156 = vmatmul.mubr.bf16.gmra.mrb[8].mxu0 %v5632_v42 }
 0x233   :  { %v2586_v53 = vmax.f32 %v1906_v7, 0.0  ;;  %v5245_v54 = vpop.f32.mrb[48].mxu1  ;;  %5159 = vmatprep.mubr.bf16.mxu0 %v5633_v46 }
 0x234   :  { %v2796_v55 = vpack.c.bf16 %v2588_v51, %v2587_v50  ;;  %v3167_v56 = vadd.f32 %v5245_v54, %v6185_v9  ;;  %v3158_v57 = vpop.f32.mrb[49].mxu1 }
 0x235   :  { %v2795_v58 = vpack.c.bf16 %v2586_v53, %v2585_v52  ;;  %v3159_v59 = vadd.f32 %v6185_v9, %v3158_v57  ;;  %v5053_v60 = vpop.f32.mrb[160].mxu0  ;;  %v5246_v61 = vpop.f32.mrb[50].mxu1  ;;  %v5638_v52 = vld [vmem:[%s7640_s0 + $0x458] sm:$0xff]  }
 0x236   :  { %4167 = vst [vmem:[%s7644_s5 + $0x190] sm:$0xff] %v3167_v56  ;;  %v1927_v62 = vadd.f32 %v6160_v47, %v5053_v60  ;;  %v3170_v63 = vadd.f32 %v5246_v61, %v6185_v9  ;;  %v1918_v0 = vpop.f32.mrb[161].mxu0  ;;  %v3161_v1 = vpop.f32.mrb[51].mxu1  ;;  %v5639_v56 = vld [vmem:[%s7640_s0 + $0x460] sm:$0xff]  }
 0x237   :  { %4165 = vst [vmem:[%s7644_s5 + $0x180] sm:$0xff] %v3159_v59  ;;  %v1919_v3 = vadd.f32 %v6160_v47, %v1918_v0  ;;  %v3162_v4 = vadd.f32 %v6185_v9, %v3161_v1  ;;  %v5054_v5 = vpop.f32.mrb[162].mxu0  ;;  %5351 = vmatprep.mubr.bf16.mxu1 %v2795_v58  ;;  %v6579_v59 = vld [vmem:[%s7642_s2] ss:$0 sm:$0xff] }
 0x238   :  { %4168 = vst [vmem:[%s7644_s5 + $0x198] sm:$0xff] %v3170_v63  ;;  %v1930_v8 = vadd.f32 %v6160_v47, %v5054_v5  ;;  %v1921_v10 = vpop.f32.mrb[163].mxu0  ;;  %5352 = vmatmul.mubr.bf16.gmra.mrb[156].mxu1 %v2796_v55  ;;  %v2591_v12 = vmax.f32 %v1927_v62, 0.0 }
 0x239   :  { %4166 = vst [vmem:[%s7644_s5 + $0x188] sm:$0xff] %v3162_v4  ;;  %v1922_v11 = vadd.f32 %v6160_v47, %v1921_v10  ;;  %v2589_v14 = vmax.f32 %v1919_v3, 0.0 }
 0x23a   :  { %v2592_v13 = vmax.f32 %v1930_v8, 0.0  ;;  %5160 = vmatmul.mubr.bf16.gmra.mrb[12].mxu0 %v5634_v2 }
 0x23b   :  { %v2590_v15 = vmax.f32 %v1922_v11, 0.0  ;;  %v5249_v16 = vpop.f32.mrb[52].mxu1  ;;  %5163 = vmatprep.mubr.bf16.mxu0 %v5635_v6 }
 0x23c   :  { %v2798_v17 = vpack.c.bf16 %v2592_v13, %v2591_v12  ;;  %v3183_v18 = vadd.f32 %v5249_v16, %v6185_v9  ;;  %v3174_v19 = vpop.f32.mrb[53].mxu1 }
 0x23d   :  { %v2797_v20 = vpack.c.bf16 %v2590_v15, %v2589_v14  ;;  %v3175_v21 = vadd.f32 %v6185_v9, %v3174_v19  ;;  %v5057_v22 = vpop.f32.mrb[164].mxu0  ;;  %v5250_v23 = vpop.f32.mrb[54].mxu1  ;;  %v5640_v14 = vld [vmem:[%s7640_s0 + $0x468] sm:$0xff]  }
 0x23e   :  { %4171 = vst [vmem:[%s7644_s5 + $0x1b0] sm:$0xff] %v3183_v18  ;;  %v1943_v24 = vadd.f32 %v6160_v47, %v5057_v22  ;;  %v3186_v25 = vadd.f32 %v5250_v23, %v6185_v9  ;;  %v1934_v26 = vpop.f32.mrb[165].mxu0  ;;  %v3177_v27 = vpop.f32.mrb[55].mxu1  ;;  %v5641_v18 = vld [vmem:[%s7640_s0 + $0x470] sm:$0xff]  }
 0x23f   :  { %4169 = vst [vmem:[%s7644_s5 + $0x1a0] sm:$0xff] %v3175_v21  ;;  %v1935_v29 = vadd.f32 %v6160_v47, %v1934_v26  ;;  %v3178_v30 = vadd.f32 %v6185_v9, %v3177_v27  ;;  %v5058_v31 = vpop.f32.mrb[166].mxu0  ;;  %5355 = vmatprep.mubr.bf16.mxu1 %v2797_v20  ;;  %v6611_v27 = vld [vmem:[%s7643_s4] ss:$0 sm:$0xff] }
 0x240   :  { %4172 = vst [vmem:[%s7644_s5 + $0x1b8] sm:$0xff] %v3186_v25  ;;  %v1946_v33 = vadd.f32 %v6160_v47, %v5058_v31  ;;  %v1937_v34 = vpop.f32.mrb[167].mxu0  ;;  %5356 = vmatmul.mubr.bf16.gmra.mrb[160].mxu1 %v2798_v17  ;;  %v2595_v36 = vmax.f32 %v1943_v24, 0.0 }
 0x241   :  { %4170 = vst [vmem:[%s7644_s5 + $0x1a8] sm:$0xff] %v3178_v30  ;;  %v1938_v35 = vadd.f32 %v6160_v47, %v1937_v34  ;;  %v2593_v38 = vmax.f32 %v1935_v29, 0.0 }
 0x242   :  { %v2596_v37 = vmax.f32 %v1946_v33, 0.0  ;;  %5164 = vmatmul.mubr.bf16.gmra.mrb[16].mxu0 %v5636_v28 }
 0x243   :  { %v2594_v39 = vmax.f32 %v1938_v35, 0.0  ;;  %v5253_v40 = vpop.f32.mrb[56].mxu1  ;;  %5167 = vmatprep.mubr.bf16.mxu0 %v5637_v32 }
 0x244   :  { %v2800_v41 = vpack.c.bf16 %v2596_v37, %v2595_v36  ;;  %v3199_v42 = vadd.f32 %v5253_v40, %v6185_v9  ;;  %v3190_v43 = vpop.f32.mrb[57].mxu1 }
 0x245   :  { %v2799_v44 = vpack.c.bf16 %v2594_v39, %v2593_v38  ;;  %v3191_v45 = vadd.f32 %v6185_v9, %v3190_v43  ;;  %v5061_v46 = vpop.f32.mrb[168].mxu0  ;;  %v5254_v48 = vpop.f32.mrb[58].mxu1  ;;  %v5642_v38 = vld [vmem:[%s7640_s0 + $0x478] sm:$0xff]  }
 0x246   :  { %4175 = vst [vmem:[%s7644_s5 + $0x1d0] sm:$0xff] %v3199_v42  ;;  %v1959_v49 = vadd.f32 %v6160_v47, %v5061_v46  ;;  %v3202_v7 = vadd.f32 %v5254_v48, %v6185_v9  ;;  %v1950_v50 = vpop.f32.mrb[169].mxu0  ;;  %v3193_v51 = vpop.f32.mrb[59].mxu1 }
 0x247   :  { %4173 = vst [vmem:[%s7644_s5 + $0x1c0] sm:$0xff] %v3191_v45  ;;  %v1951_v53 = vadd.f32 %v6160_v47, %v1950_v50  ;;  %v3194_v54 = vadd.f32 %v6185_v9, %v3193_v51  ;;  %v5062_v55 = vpop.f32.mrb[170].mxu0  ;;  %5359 = vmatprep.mubr.bf16.mxu1 %v2799_v44 }
 0x248   :  { %4176 = vst [vmem:[%s7644_s5 + $0x1d8] sm:$0xff] %v3202_v7  ;;  %v1962_v57 = vadd.f32 %v6160_v47, %v5062_v55  ;;  %v1953_v58 = vpop.f32.mrb[171].mxu0  ;;  %5360 = vmatmul.mubr.bf16.gmra.mrb[164].mxu1 %v2800_v41  ;;  %v2599_v61 = vmax.f32 %v1959_v49, 0.0 }
 0x249   :  { %4174 = vst [vmem:[%s7644_s5 + $0x1c8] sm:$0xff] %v3194_v54  ;;  %v1954_v60 = vadd.f32 %v6579_v59, %v1953_v58  ;;  %v2597_v63 = vmax.f32 %v1951_v53, 0.0 }
 0x24a   :  { %v2600_v62 = vmax.f32 %v1962_v57, 0.0  ;;  %5168 = vmatmul.mubr.bf16.gmra.mrb[20].mxu0 %v5638_v52 }
 0x24b   :  { %v2598_v0 = vmax.f32 %v1954_v60, 0.0  ;;  %v5257_v1 = vpop.f32.mrb[60].mxu1  ;;  %5171 = vmatprep.mubr.bf16.mxu0 %v5639_v56 }
 0x24c   :  { %v2802_v47 = vpack.c.bf16 %v2600_v62, %v2599_v61  ;;  %v3215_v2 = vadd.f32 %v5257_v1, %v6185_v9  ;;  %v3206_v3 = vpop.f32.mrb[61].mxu1 }
 0x24d   :  { %v2801_v4 = vpack.c.bf16 %v2598_v0, %v2597_v63  ;;  %v3207_v5 = vadd.f32 %v6185_v9, %v3206_v3  ;;  %v5065_v6 = vpop.f32.mrb[172].mxu0  ;;  %v5258_v8 = vpop.f32.mrb[62].mxu1 }
 0x24e   :  { %4179 = vst [vmem:[%s7644_s5 + $0x1f0] sm:$0xff] %v3215_v2  ;;  %v1975_v10 = vadd.f32 %v6579_v59, %v5065_v6  ;;  %v3218_v11 = vadd.f32 %v5258_v8, %v6185_v9  ;;  %v1966_v12 = vpop.f32.mrb[173].mxu0  ;;  %v3209_v13 = vpop.f32.mrb[63].mxu1 }
 0x24f   :  { %4177 = vst [vmem:[%s7644_s5 + $0x1e0] sm:$0xff] %v3207_v5  ;;  %v1967_v15 = vadd.f32 %v6579_v59, %v1966_v12  ;;  %v3210_v16 = vadd.f32 %v6185_v9, %v3209_v13  ;;  %v5066_v17 = vpop.f32.mrb[174].mxu0  ;;  %5363 = vmatprep.mubr.bf16.mxu1 %v2801_v4 }
 0x250   :  { %4180 = vst [vmem:[%s7644_s5 + $0x1f8] sm:$0xff] %v3218_v11  ;;  %v1978_v19 = vadd.f32 %v6579_v59, %v5066_v17  ;;  %v1969_v20 = vpop.f32.mrb[175].mxu0  ;;  %5364 = vmatmul.mubr.bf16.gmra.mrb[168].mxu1 %v2802_v47  ;;  %v2603_v21 = vmax.f32 %v1975_v10, 0.0 }
 0x251   :  { %4178 = vst [vmem:[%s7644_s5 + $0x1e8] sm:$0xff] %v3210_v16  ;;  %v1970_v9 = vadd.f32 %v6579_v59, %v1969_v20  ;;  %v2601_v23 = vmax.f32 %v1967_v15, 0.0 }
 0x252   :  { %v2604_v22 = vmax.f32 %v1978_v19, 0.0  ;;  %5172 = vmatmul.mubr.bf16.gmra.mrb[24].mxu0 %v5640_v14 }
 0x253   :  { %v2602_v24 = vmax.f32 %v1970_v9, 0.0  ;;  %v5261_v25 = vpop.f32.mrb[64].mxu1  ;;  %5175 = vmatprep.mubr.bf16.mxu0 %v5641_v18 }
 0x254   :  { %v2804_v26 = vpack.c.bf16 %v2604_v22, %v2603_v21  ;;  %v3231_v28 = vadd.f32 %v6611_v27, %v5261_v25  ;;  %v3222_v29 = vpop.f32.mrb[65].mxu1 }
 0x255   :  { %v2803_v30 = vpack.c.bf16 %v2602_v24, %v2601_v23  ;;  %v3223_v31 = vadd.f32 %v6611_v27, %v3222_v29  ;;  %v5069_v32 = vpop.f32.mrb[176].mxu0  ;;  %v5262_v33 = vpop.f32.mrb[66].mxu1 }
 0x256   :  { %4183 = vst [vmem:[%s7644_s5 + $0x210] sm:$0xff] %v3231_v28  ;;  %v1991_v34 = vadd.f32 %v6579_v59, %v5069_v32  ;;  %v3234_v35 = vadd.f32 %v6611_v27, %v5262_v33  ;;  %v1982_v36 = vpop.f32.mrb[177].mxu0  ;;  %v3225_v37 = vpop.f32.mrb[67].mxu1 }
 0x257   :  { %4181 = vst [vmem:[%s7644_s5 + $0x200] sm:$0xff] %v3223_v31  ;;  %v1983_v39 = vadd.f32 %v6579_v59, %v1982_v36  ;;  %v3226_v40 = vadd.f32 %v6611_v27, %v3225_v37  ;;  %v5070_v41 = vpop.f32.mrb[178].mxu0  ;;  %5367 = vmatprep.mubr.bf16.mxu1 %v2803_v30 }
 0x258   :  { %4184 = vst [vmem:[%s7644_s5 + $0x218] sm:$0xff] %v3234_v35  ;;  %v1994_v42 = vadd.f32 %v6579_v59, %v5070_v41  ;;  %v1985_v43 = vpop.f32.mrb[179].mxu0  ;;  %5368 = vmatmul.mubr.bf16.gmra.mrb[172].mxu1 %v2804_v26  ;;  %v2607_v45 = vmax.f32 %v1991_v34, 0.0 }
 0x259   :  { %4182 = vst [vmem:[%s7644_s5 + $0x208] sm:$0xff] %v3226_v40  ;;  %v1986_v44 = vadd.f32 %v6579_v59, %v1985_v43  ;;  %v2605_v48 = vmax.f32 %v1983_v39, 0.0 }
 0x25a   :  { %v2608_v46 = vmax.f32 %v1994_v42, 0.0  ;;  %5176 = vmatmul.mubr.bf16.gmra.mrb[28].mxu0 %v5642_v38 }
 0x25b   :  { %v2606_v49 = vmax.f32 %v1986_v44, 0.0  ;;  %v5265_v7 = vpop.f32.mrb[68].mxu1 }
 0x25c   :  { %v2806_v50 = vpack.c.bf16 %v2608_v46, %v2607_v45  ;;  %v3247_v51 = vadd.f32 %v6611_v27, %v5265_v7  ;;  %v3238_v52 = vpop.f32.mrb[69].mxu1 }
 0x25d   :  { %v2805_v53 = vpack.c.bf16 %v2606_v49, %v2605_v48  ;;  %v3239_v54 = vadd.f32 %v6611_v27, %v3238_v52  ;;  %v5073_v55 = vpop.f32.mrb[180].mxu0  ;;  %v5266_v56 = vpop.f32.mrb[70].mxu1 }
 0x25e   :  { %4187 = vst [vmem:[%s7644_s5 + $0x230] sm:$0xff] %v3247_v51  ;;  %v2007_v57 = vadd.f32 %v6579_v59, %v5073_v55  ;;  %v3250_v58 = vadd.f32 %v6611_v27, %v5266_v56  ;;  %v1998_v60 = vpop.f32.mrb[181].mxu0  ;;  %v3241_v61 = vpop.f32.mrb[71].mxu1 }
 0x25f   :  { %4185 = vst [vmem:[%s7644_s5 + $0x220] sm:$0xff] %v3239_v54  ;;  %v1999_v62 = vadd.f32 %v6579_v59, %v1998_v60  ;;  %v3242_v63 = vadd.f32 %v6611_v27, %v3241_v61  ;;  %v5074_v0 = vpop.f32.mrb[182].mxu0  ;;  %5371 = vmatprep.mubr.bf16.mxu1 %v2805_v53 }
 0x260   :  { %4188 = vst [vmem:[%s7644_s5 + $0x238] sm:$0xff] %v3250_v58  ;;  %v2010_v1 = vadd.f32 %v6579_v59, %v5074_v0  ;;  %v2001_v47 = vpop.f32.mrb[183].mxu0  ;;  %5372 = vmatmul.mubr.bf16.gmra.mrb[176].mxu1 %v2806_v50  ;;  %v2611_v3 = vmax.f32 %v2007_v57, 0.0 }
 0x261   :  { %4186 = vst [vmem:[%s7644_s5 + $0x228] sm:$0xff] %v3242_v63  ;;  %v2002_v2 = vadd.f32 %v6579_v59, %v2001_v47  ;;  %v2609_v5 = vmax.f32 %v1999_v62, 0.0 }
 0x262   :  { %v2612_v4 = vmax.f32 %v2010_v1, 0.0 }
 0x263   :  { %v2610_v6 = vmax.f32 %v2002_v2, 0.0  ;;  %v5269_v8 = vpop.f32.mrb[72].mxu1 }
 0x264   :  { %v2808_v10 = vpack.c.bf16 %v2612_v4, %v2611_v3  ;;  %v3263_v11 = vadd.f32 %v6611_v27, %v5269_v8  ;;  %v3254_v12 = vpop.f32.mrb[73].mxu1 }
 0x265   :  { %v2807_v13 = vpack.c.bf16 %v2610_v6, %v2609_v5  ;;  %v3255_v14 = vadd.f32 %v6611_v27, %v3254_v12  ;;  %v5077_v15 = vpop.f32.mrb[184].mxu0  ;;  %v5270_v16 = vpop.f32.mrb[74].mxu1 }
 0x266   :  { %4191 = vst [vmem:[%s7644_s5 + $0x250] sm:$0xff] %v3263_v11  ;;  %v2023_v17 = vadd.f32 %v6579_v59, %v5077_v15  ;;  %v3266_v18 = vadd.f32 %v6611_v27, %v5270_v16  ;;  %v2014_v19 = vpop.f32.mrb[185].mxu0  ;;  %v3257_v20 = vpop.f32.mrb[75].mxu1 }
 0x267   :  { %4189 = vst [vmem:[%s7644_s5 + $0x240] sm:$0xff] %v3255_v14  ;;  %v2015_v9 = vadd.f32 %v6579_v59, %v2014_v19  ;;  %v3258_v21 = vadd.f32 %v6611_v27, %v3257_v20  ;;  %v5078_v22 = vpop.f32.mrb[186].mxu0  ;;  %5375 = vmatprep.mubr.bf16.mxu1 %v2807_v13 }
 0x268   :  { %4192 = vst [vmem:[%s7644_s5 + $0x258] sm:$0xff] %v3266_v18  ;;  %v2026_v23 = vadd.f32 %v6579_v59, %v5078_v22  ;;  %v2017_v24 = vpop.f32.mrb[187].mxu0  ;;  %5376 = vmatmul.mubr.bf16.gmra.mrb[180].mxu1 %v2808_v10  ;;  %v2615_v26 = vmax.f32 %v2023_v17, 0.0 }
 0x269   :  { %4190 = vst [vmem:[%s7644_s5 + $0x248] sm:$0xff] %v3258_v21  ;;  %v2018_v25 = vadd.f32 %v6579_v59, %v2017_v24  ;;  %v2613_v29 = vmax.f32 %v2015_v9, 0.0 }
 0x26a   :  { %v2616_v28 = vmax.f32 %v2026_v23, 0.0 }
 0x26b   :  { %v2614_v30 = vmax.f32 %v2018_v25, 0.0  ;;  %v5273_v31 = vpop.f32.mrb[76].mxu1 }
 0x26c   :  { %v2810_v32 = vpack.c.bf16 %v2616_v28, %v2615_v26  ;;  %v3279_v33 = vadd.f32 %v6611_v27, %v5273_v31  ;;  %v3270_v34 = vpop.f32.mrb[77].mxu1 }
 0x26d   :  { %v2809_v35 = vpack.c.bf16 %v2614_v30, %v2613_v29  ;;  %v3271_v36 = vadd.f32 %v6611_v27, %v3270_v34  ;;  %v5081_v37 = vpop.f32.mrb[188].mxu0  ;;  %v5274_v38 = vpop.f32.mrb[78].mxu1 }
 0x26e   :  { %4195 = vst [vmem:[%s7644_s5 + $0x270] sm:$0xff] %v3279_v33  ;;  %v2039_v39 = vadd.f32 %v6579_v59, %v5081_v37  ;;  %v3282_v40 = vadd.f32 %v6611_v27, %v5274_v38  ;;  %v2030_v41 = vpop.f32.mrb[189].mxu0  ;;  %v3273_v42 = vpop.f32.mrb[79].mxu1 }
 0x26f   :  { %4193 = vst [vmem:[%s7644_s5 + $0x260] sm:$0xff] %v3271_v36  ;;  %v2031_v43 = vadd.f32 %v6579_v59, %v2030_v41  ;;  %v3274_v44 = vadd.f32 %v6611_v27, %v3273_v42  ;;  %v5082_v45 = vpop.f32.mrb[190].mxu0  ;;  %5379 = vmatprep.mubr.bf16.mxu1 %v2809_v35 }
 0x270   :  { %4196 = vst [vmem:[%s7644_s5 + $0x278] sm:$0xff] %v3282_v40  ;;  %v2042_v46 = vadd.f32 %v6579_v59, %v5082_v45  ;;  %v2033_v48 = vpop.f32.mrb[191].mxu0  ;;  %5380 = vmatmul.mubr.bf16.gmra.mrb[184].mxu1 %v2810_v32  ;;  %v2619_v7 = vmax.f32 %v2039_v39, 0.0 }
 0x271   :  { %4194 = vst [vmem:[%s7644_s5 + $0x268] sm:$0xff] %v3274_v44  ;;  %v2034_v49 = vadd.f32 %v6579_v59, %v2033_v48  ;;  %v2617_v51 = vmax.f32 %v2031_v43, 0.0 }
 0x272   :  { %v2620_v50 = vmax.f32 %v2042_v46, 0.0 }
 0x273   :  { %v2618_v52 = vmax.f32 %v2034_v49, 0.0  ;;  %v5277_v53 = vpop.f32.mrb[80].mxu1 }
 0x274   :  { %v2812_v54 = vpack.c.bf16 %v2620_v50, %v2619_v7  ;;  %v3295_v55 = vadd.f32 %v6611_v27, %v5277_v53  ;;  %v3286_v56 = vpop.f32.mrb[81].mxu1 }
 0x275   :  { %v2811_v57 = vpack.c.bf16 %v2618_v52, %v2617_v51  ;;  %v3287_v58 = vadd.f32 %v6611_v27, %v3286_v56  ;;  %v5085_v60 = vpop.f32.mrb[192].mxu0  ;;  %v5278_v61 = vpop.f32.mrb[82].mxu1 }
 0x276   :  { %4199 = vst [vmem:[%s7644_s5 + $0x290] sm:$0xff] %v3295_v55  ;;  %v2055_v62 = vadd.f32 %v6579_v59, %v5085_v60  ;;  %v3298_v63 = vadd.f32 %v6611_v27, %v5278_v61  ;;  %v2046_v0 = vpop.f32.mrb[193].mxu0  ;;  %v3289_v1 = vpop.f32.mrb[83].mxu1 }
 0x277   :  { %4197 = vst [vmem:[%s7644_s5 + $0x280] sm:$0xff] %v3287_v58  ;;  %v2047_v47 = vadd.f32 %v6579_v59, %v2046_v0  ;;  %v3290_v2 = vadd.f32 %v6611_v27, %v3289_v1  ;;  %v5086_v3 = vpop.f32.mrb[194].mxu0  ;;  %5383 = vmatprep.mubr.bf16.mxu1 %v2811_v57 }
 0x278   :  { %4200 = vst [vmem:[%s7644_s5 + $0x298] sm:$0xff] %v3298_v63  ;;  %v2058_v4 = vadd.f32 %v6579_v59, %v5086_v3  ;;  %v2049_v5 = vpop.f32.mrb[195].mxu0  ;;  %5384 = vmatmul.mubr.bf16.gmra.mrb[188].mxu1 %v2812_v54  ;;  %v2623_v8 = vmax.f32 %v2055_v62, 0.0 }
 0x279   :  { %4198 = vst [vmem:[%s7644_s5 + $0x288] sm:$0xff] %v3290_v2  ;;  %v2050_v6 = vadd.f32 %v6579_v59, %v2049_v5  ;;  %v2621_v11 = vmax.f32 %v2047_v47, 0.0 }
 0x27a   :  { %v2624_v10 = vmax.f32 %v2058_v4, 0.0 }
 0x27b   :  { %v2622_v12 = vmax.f32 %v2050_v6, 0.0  ;;  %v5281_v13 = vpop.f32.mrb[84].mxu1 }
 0x27c   :  { %v2814_v14 = vpack.c.bf16 %v2624_v10, %v2623_v8  ;;  %v3311_v15 = vadd.f32 %v6611_v27, %v5281_v13  ;;  %v3302_v16 = vpop.f32.mrb[85].mxu1 }
 0x27d   :  { %v2813_v17 = vpack.c.bf16 %v2622_v12, %v2621_v11  ;;  %v3303_v18 = vadd.f32 %v6611_v27, %v3302_v16  ;;  %v5089_v19 = vpop.f32.mrb[196].mxu0  ;;  %v5282_v20 = vpop.f32.mrb[86].mxu1 }
 0x27e   :  { %4203 = vst [vmem:[%s7644_s5 + $0x2b0] sm:$0xff] %v3311_v15  ;;  %v2071_v9 = vadd.f32 %v6579_v59, %v5089_v19  ;;  %v3314_v21 = vadd.f32 %v6611_v27, %v5282_v20  ;;  %v2062_v22 = vpop.f32.mrb[197].mxu0  ;;  %v3305_v23 = vpop.f32.mrb[87].mxu1 }
 0x27f   :  { %4201 = vst [vmem:[%s7644_s5 + $0x2a0] sm:$0xff] %v3303_v18  ;;  %v2063_v24 = vadd.f32 %v6579_v59, %v2062_v22  ;;  %v3306_v25 = vadd.f32 %v6611_v27, %v3305_v23  ;;  %v5090_v26 = vpop.f32.mrb[198].mxu0  ;;  %5387 = vmatprep.mubr.bf16.mxu1 %v2813_v17 }
 0x280   :  { %4204 = vst [vmem:[%s7644_s5 + $0x2b8] sm:$0xff] %v3314_v21  ;;  %v2074_v28 = vadd.f32 %v6579_v59, %v5090_v26  ;;  %v2065_v29 = vpop.f32.mrb[199].mxu0  ;;  %5388 = vmatmul.mubr.bf16.gmra.mrb[192].mxu1 %v2814_v14  ;;  %v2627_v31 = vmax.f32 %v2071_v9, 0.0 }
 0x281   :  { %4202 = vst [vmem:[%s7644_s5 + $0x2a8] sm:$0xff] %v3306_v25  ;;  %v2066_v30 = vadd.f32 %v6579_v59, %v2065_v29  ;;  %v2625_v33 = vmax.f32 %v2063_v24, 0.0 }
 0x282   :  { %v2628_v32 = vmax.f32 %v2074_v28, 0.0 }
 0x283   :  { %v2626_v34 = vmax.f32 %v2066_v30, 0.0  ;;  %v5285_v35 = vpop.f32.mrb[88].mxu1 }
 0x284   :  { %v2816_v36 = vpack.c.bf16 %v2628_v32, %v2627_v31  ;;  %v3327_v37 = vadd.f32 %v6611_v27, %v5285_v35  ;;  %v3318_v38 = vpop.f32.mrb[89].mxu1 }
 0x285   :  { %v2815_v39 = vpack.c.bf16 %v2626_v34, %v2625_v33  ;;  %v3319_v40 = vadd.f32 %v6611_v27, %v3318_v38  ;;  %v5093_v41 = vpop.f32.mrb[200].mxu0  ;;  %v5286_v42 = vpop.f32.mrb[90].mxu1 }
 0x286   :  { %4207 = vst [vmem:[%s7644_s5 + $0x2d0] sm:$0xff] %v3327_v37  ;;  %v2087_v43 = vadd.f32 %v6579_v59, %v5093_v41  ;;  %v3330_v44 = vadd.f32 %v6611_v27, %v5286_v42  ;;  %v2078_v45 = vpop.f32.mrb[201].mxu0  ;;  %v3321_v46 = vpop.f32.mrb[91].mxu1 }
 0x287   :  { %4205 = vst [vmem:[%s7644_s5 + $0x2c0] sm:$0xff] %v3319_v40  ;;  %v2079_v48 = vadd.f32 %v6579_v59, %v2078_v45  ;;  %v3322_v49 = vadd.f32 %v6611_v27, %v3321_v46  ;;  %v5094_v7 = vpop.f32.mrb[202].mxu0  ;;  %5391 = vmatprep.mubr.bf16.mxu1 %v2815_v39 }
 0x288   :  { %4208 = vst [vmem:[%s7644_s5 + $0x2d8] sm:$0xff] %v3330_v44  ;;  %v2090_v50 = vadd.f32 %v6579_v59, %v5094_v7  ;;  %v2081_v51 = vpop.f32.mrb[203].mxu0  ;;  %5392 = vmatmul.mubr.bf16.gmra.mrb[196].mxu1 %v2816_v36  ;;  %v2631_v53 = vmax.f32 %v2087_v43, 0.0 }
 0x289   :  { %4206 = vst [vmem:[%s7644_s5 + $0x2c8] sm:$0xff] %v3322_v49  ;;  %v2082_v52 = vadd.f32 %v6579_v59, %v2081_v51  ;;  %v2629_v55 = vmax.f32 %v2079_v48, 0.0 }
 0x28a   :  { %v2632_v54 = vmax.f32 %v2090_v50, 0.0 }
 0x28b   :  { %v2630_v56 = vmax.f32 %v2082_v52, 0.0  ;;  %v5289_v57 = vpop.f32.mrb[92].mxu1 }
 0x28c   :  { %v2818_v58 = vpack.c.bf16 %v2632_v54, %v2631_v53  ;;  %v3343_v60 = vadd.f32 %v6611_v27, %v5289_v57  ;;  %v3334_v61 = vpop.f32.mrb[93].mxu1 }
 0x28d   :  { %v2817_v62 = vpack.c.bf16 %v2630_v56, %v2629_v55  ;;  %v3335_v63 = vadd.f32 %v6611_v27, %v3334_v61  ;;  %v5097_v0 = vpop.f32.mrb[204].mxu0  ;;  %v5290_v1 = vpop.f32.mrb[94].mxu1 }
 0x28e   :  { %4211 = vst [vmem:[%s7644_s5 + $0x2f0] sm:$0xff] %v3343_v60  ;;  %v2103_v47 = vadd.f32 %v6579_v59, %v5097_v0  ;;  %v3346_v2 = vadd.f32 %v6611_v27, %v5290_v1  ;;  %v2094_v3 = vpop.f32.mrb[205].mxu0  ;;  %v3337_v4 = vpop.f32.mrb[95].mxu1 }
 0x28f   :  { %4209 = vst [vmem:[%s7644_s5 + $0x2e0] sm:$0xff] %v3335_v63  ;;  %v2095_v5 = vadd.f32 %v6579_v59, %v2094_v3  ;;  %v3338_v6 = vadd.f32 %v6611_v27, %v3337_v4  ;;  %v5098_v8 = vpop.f32.mrb[206].mxu0  ;;  %5395 = vmatprep.mubr.bf16.mxu1 %v2817_v62 }
 0x290   :  { %4212 = vst [vmem:[%s7644_s5 + $0x2f8] sm:$0xff] %v3346_v2  ;;  %v2106_v10 = vadd.f32 %v6579_v59, %v5098_v8  ;;  %v2097_v11 = vpop.f32.mrb[207].mxu0  ;;  %5396 = vmatmul.mubr.bf16.gmra.mrb[200].mxu1 %v2818_v58  ;;  %v2635_v13 = vmax.f32 %v2103_v47, 0.0 }
 0x291   :  { %4210 = vst [vmem:[%s7644_s5 + $0x2e8] sm:$0xff] %v3338_v6  ;;  %v2098_v12 = vadd.f32 %v6579_v59, %v2097_v11  ;;  %v2633_v15 = vmax.f32 %v2095_v5, 0.0 }
 0x292   :  { %v2636_v14 = vmax.f32 %v2106_v10, 0.0 }
 0x293   :  { %v2634_v16 = vmax.f32 %v2098_v12, 0.0  ;;  %v5293_v17 = vpop.f32.mrb[96].mxu1 }
 0x294   :  { %v2820_v18 = vpack.c.bf16 %v2636_v14, %v2635_v13  ;;  %v3359_v19 = vadd.f32 %v6611_v27, %v5293_v17  ;;  %v3350_v20 = vpop.f32.mrb[97].mxu1 }
 0x295   :  { %v2819_v9 = vpack.c.bf16 %v2634_v16, %v2633_v15  ;;  %v3351_v21 = vadd.f32 %v6611_v27, %v3350_v20  ;;  %v5101_v22 = vpop.f32.mrb[208].mxu0  ;;  %v5294_v23 = vpop.f32.mrb[98].mxu1 }
 0x296   :  { %4215 = vst [vmem:[%s7644_s5 + $0x310] sm:$0xff] %v3359_v19  ;;  %v2119_v24 = vadd.f32 %v6579_v59, %v5101_v22  ;;  %v3362_v25 = vadd.f32 %v6611_v27, %v5294_v23  ;;  %v2110_v26 = vpop.f32.mrb[209].mxu0  ;;  %v3353_v28 = vpop.f32.mrb[99].mxu1 }
 0x297   :  { %4213 = vst [vmem:[%s7644_s5 + $0x300] sm:$0xff] %v3351_v21  ;;  %v2111_v29 = vadd.f32 %v6579_v59, %v2110_v26  ;;  %v3354_v30 = vadd.f32 %v6611_v27, %v3353_v28  ;;  %v5102_v31 = vpop.f32.mrb[210].mxu0  ;;  %5399 = vmatprep.mubr.bf16.mxu1 %v2819_v9 }
 0x298   :  { %4216 = vst [vmem:[%s7644_s5 + $0x318] sm:$0xff] %v3362_v25  ;;  %v2122_v32 = vadd.f32 %v6579_v59, %v5102_v31  ;;  %v2113_v33 = vpop.f32.mrb[211].mxu0  ;;  %5400 = vmatmul.mubr.bf16.gmra.mrb[204].mxu1 %v2820_v18  ;;  %v2639_v35 = vmax.f32 %v2119_v24, 0.0 }
 0x299   :  { %4214 = vst [vmem:[%s7644_s5 + $0x308] sm:$0xff] %v3354_v30  ;;  %v2114_v34 = vadd.f32 %v6579_v59, %v2113_v33  ;;  %v2637_v37 = vmax.f32 %v2111_v29, 0.0 }
 0x29a   :  { %v2640_v36 = vmax.f32 %v2122_v32, 0.0 }
 0x29b   :  { %v2638_v38 = vmax.f32 %v2114_v34, 0.0  ;;  %v5297_v39 = vpop.f32.mrb[100].mxu1 }
 0x29c   :  { %v2822_v40 = vpack.c.bf16 %v2640_v36, %v2639_v35  ;;  %v3375_v41 = vadd.f32 %v6611_v27, %v5297_v39  ;;  %v3366_v42 = vpop.f32.mrb[101].mxu1 }
 0x29d   :  { %v2821_v43 = vpack.c.bf16 %v2638_v38, %v2637_v37  ;;  %v3367_v44 = vadd.f32 %v6611_v27, %v3366_v42  ;;  %v5105_v45 = vpop.f32.mrb[212].mxu0  ;;  %v5298_v46 = vpop.f32.mrb[102].mxu1 }
 0x29e   :  { %4219 = vst [vmem:[%s7644_s5 + $0x330] sm:$0xff] %v3375_v41  ;;  %v2135_v48 = vadd.f32 %v6579_v59, %v5105_v45  ;;  %v3378_v49 = vadd.f32 %v6611_v27, %v5298_v46  ;;  %v2126_v7 = vpop.f32.mrb[213].mxu0  ;;  %v3369_v50 = vpop.f32.mrb[103].mxu1 }
 0x29f   :  { %4217 = vst [vmem:[%s7644_s5 + $0x320] sm:$0xff] %v3367_v44  ;;  %v2127_v51 = vadd.f32 %v6579_v59, %v2126_v7  ;;  %v3370_v52 = vadd.f32 %v6611_v27, %v3369_v50  ;;  %v5106_v53 = vpop.f32.mrb[214].mxu0  ;;  %5403 = vmatprep.mubr.bf16.mxu1 %v2821_v43 }
 0x2a0   :  { %4220 = vst [vmem:[%s7644_s5 + $0x338] sm:$0xff] %v3378_v49  ;;  %v2138_v54 = vadd.f32 %v6579_v59, %v5106_v53  ;;  %v2129_v55 = vpop.f32.mrb[215].mxu0  ;;  %5404 = vmatmul.mubr.bf16.gmra.mrb[208].mxu1 %v2822_v40  ;;  %v2643_v57 = vmax.f32 %v2135_v48, 0.0 }
 0x2a1   :  { %4218 = vst [vmem:[%s7644_s5 + $0x328] sm:$0xff] %v3370_v52  ;;  %v2130_v56 = vadd.f32 %v6579_v59, %v2129_v55  ;;  %v2641_v60 = vmax.f32 %v2127_v51, 0.0 }
 0x2a2   :  { %v2644_v58 = vmax.f32 %v2138_v54, 0.0 }
 0x2a3   :  { %v2642_v61 = vmax.f32 %v2130_v56, 0.0  ;;  %v5301_v62 = vpop.f32.mrb[104].mxu1 }
 0x2a4   :  { %v2824_v63 = vpack.c.bf16 %v2644_v58, %v2643_v57  ;;  %v3391_v0 = vadd.f32 %v6611_v27, %v5301_v62  ;;  %v3382_v1 = vpop.f32.mrb[105].mxu1 }
 0x2a5   :  { %v2823_v47 = vpack.c.bf16 %v2642_v61, %v2641_v60  ;;  %v3383_v2 = vadd.f32 %v6611_v27, %v3382_v1  ;;  %v5109_v3 = vpop.f32.mrb[216].mxu0  ;;  %v5302_v4 = vpop.f32.mrb[106].mxu1 }
 0x2a6   :  { %4223 = vst [vmem:[%s7644_s5 + $0x350] sm:$0xff] %v3391_v0  ;;  %v2151_v5 = vadd.f32 %v6579_v59, %v5109_v3  ;;  %v3394_v6 = vadd.f32 %v6611_v27, %v5302_v4  ;;  %v2142_v8 = vpop.f32.mrb[217].mxu0  ;;  %v3385_v10 = vpop.f32.mrb[107].mxu1 }
 0x2a7   :  { %4221 = vst [vmem:[%s7644_s5 + $0x340] sm:$0xff] %v3383_v2  ;;  %v2143_v11 = vadd.f32 %v6579_v59, %v2142_v8  ;;  %v3386_v12 = vadd.f32 %v6611_v27, %v3385_v10  ;;  %v5110_v13 = vpop.f32.mrb[218].mxu0  ;;  %5407 = vmatprep.mubr.bf16.mxu1 %v2823_v47 }
 0x2a8   :  { %4224 = vst [vmem:[%s7644_s5 + $0x358] sm:$0xff] %v3394_v6  ;;  %v2154_v14 = vadd.f32 %v6579_v59, %v5110_v13  ;;  %v2145_v15 = vpop.f32.mrb[219].mxu0  ;;  %5408 = vmatmul.mubr.bf16.gmra.mrb[212].mxu1 %v2824_v63  ;;  %v2647_v17 = vmax.f32 %v2151_v5, 0.0 }
 0x2a9   :  { %4222 = vst [vmem:[%s7644_s5 + $0x348] sm:$0xff] %v3386_v12  ;;  %v2146_v16 = vadd.f32 %v6579_v59, %v2145_v15  ;;  %v2645_v19 = vmax.f32 %v2143_v11, 0.0 }
 0x2aa   :  { %v2648_v18 = vmax.f32 %v2154_v14, 0.0 }
 0x2ab   :  { %v2646_v20 = vmax.f32 %v2146_v16, 0.0  ;;  %v5305_v9 = vpop.f32.mrb[108].mxu1 }
 0x2ac   :  { %v2826_v21 = vpack.c.bf16 %v2648_v18, %v2647_v17  ;;  %v3407_v22 = vadd.f32 %v6611_v27, %v5305_v9  ;;  %v3398_v23 = vpop.f32.mrb[109].mxu1 }
 0x2ad   :  { %v2825_v24 = vpack.c.bf16 %v2646_v20, %v2645_v19  ;;  %v3399_v25 = vadd.f32 %v6611_v27, %v3398_v23  ;;  %v5113_v26 = vpop.f32.mrb[220].mxu0  ;;  %v5306_v28 = vpop.f32.mrb[110].mxu1 }
 0x2ae   :  { %4227 = vst [vmem:[%s7644_s5 + $0x370] sm:$0xff] %v3407_v22  ;;  %v2167_v29 = vadd.f32 %v6579_v59, %v5113_v26  ;;  %v3410_v30 = vadd.f32 %v6611_v27, %v5306_v28  ;;  %v2158_v31 = vpop.f32.mrb[221].mxu0  ;;  %v3401_v32 = vpop.f32.mrb[111].mxu1 }
 0x2af   :  { %4225 = vst [vmem:[%s7644_s5 + $0x360] sm:$0xff] %v3399_v25  ;;  %v2159_v33 = vadd.f32 %v6579_v59, %v2158_v31  ;;  %v3402_v34 = vadd.f32 %v6611_v27, %v3401_v32  ;;  %v5114_v35 = vpop.f32.mrb[222].mxu0  ;;  %5411 = vmatprep.mubr.bf16.mxu1 %v2825_v24 }
 0x2b0   :  { %4228 = vst [vmem:[%s7644_s5 + $0x378] sm:$0xff] %v3410_v30  ;;  %v2170_v36 = vadd.f32 %v6579_v59, %v5114_v35  ;;  %v2161_v37 = vpop.f32.mrb[223].mxu0  ;;  %5412 = vmatmul.mubr.bf16.gmra.mrb[216].mxu1 %v2826_v21  ;;  %v2651_v39 = vmax.f32 %v2167_v29, 0.0 }
 0x2b1   :  { %4226 = vst [vmem:[%s7644_s5 + $0x368] sm:$0xff] %v3402_v34  ;;  %v2162_v38 = vadd.f32 %v6579_v59, %v2161_v37  ;;  %v2649_v41 = vmax.f32 %v2159_v33, 0.0 }
 0x2b2   :  { %v2652_v40 = vmax.f32 %v2170_v36, 0.0 }
 0x2b3   :  { %v2650_v42 = vmax.f32 %v2162_v38, 0.0  ;;  %v5309_v43 = vpop.f32.mrb[112].mxu1 }
 0x2b4   :  { %v2828_v44 = vpack.c.bf16 %v2652_v40, %v2651_v39  ;;  %v3423_v45 = vadd.f32 %v6611_v27, %v5309_v43  ;;  %v3414_v46 = vpop.f32.mrb[113].mxu1 }
 0x2b5   :  { %v2827_v48 = vpack.c.bf16 %v2650_v42, %v2649_v41  ;;  %v3415_v49 = vadd.f32 %v6611_v27, %v3414_v46  ;;  %v5117_v7 = vpop.f32.mrb[224].mxu0  ;;  %v5310_v50 = vpop.f32.mrb[114].mxu1 }
 0x2b6   :  { %4231 = vst [vmem:[%s7644_s5 + $0x390] sm:$0xff] %v3423_v45  ;;  %v2183_v51 = vadd.f32 %v6579_v59, %v5117_v7  ;;  %v3426_v52 = vadd.f32 %v6611_v27, %v5310_v50  ;;  %v2174_v53 = vpop.f32.mrb[225].mxu0  ;;  %v3417_v54 = vpop.f32.mrb[115].mxu1 }
 0x2b7   :  { %4229 = vst [vmem:[%s7644_s5 + $0x380] sm:$0xff] %v3415_v49  ;;  %v2175_v55 = vadd.f32 %v6579_v59, %v2174_v53  ;;  %v3418_v56 = vadd.f32 %v6611_v27, %v3417_v54  ;;  %v5118_v57 = vpop.f32.mrb[226].mxu0  ;;  %5415 = vmatprep.mubr.bf16.mxu1 %v2827_v48 }
 0x2b8   :  { %4232 = vst [vmem:[%s7644_s5 + $0x398] sm:$0xff] %v3426_v52  ;;  %v2186_v58 = vadd.f32 %v6579_v59, %v5118_v57  ;;  %v2177_v60 = vpop.f32.mrb[227].mxu0  ;;  %5416 = vmatmul.mubr.bf16.gmra.mrb[220].mxu1 %v2828_v44  ;;  %v2655_v62 = vmax.f32 %v2183_v51, 0.0 }
 0x2b9   :  { %4230 = vst [vmem:[%s7644_s5 + $0x388] sm:$0xff] %v3418_v56  ;;  %v2178_v61 = vadd.f32 %v6579_v59, %v2177_v60  ;;  %v2653_v0 = vmax.f32 %v2175_v55, 0.0 }
 0x2ba   :  { %v2656_v63 = vmax.f32 %v2186_v58, 0.0 }
 0x2bb   :  { %v2654_v1 = vmax.f32 %v2178_v61, 0.0  ;;  %v5313_v47 = vpop.f32.mrb[116].mxu1 }
 0x2bc   :  { %v2830_v2 = vpack.c.bf16 %v2656_v63, %v2655_v62  ;;  %v3439_v3 = vadd.f32 %v6611_v27, %v5313_v47  ;;  %v3430_v4 = vpop.f32.mrb[117].mxu1 }
 0x2bd   :  { %v2829_v5 = vpack.c.bf16 %v2654_v1, %v2653_v0  ;;  %v3431_v6 = vadd.f32 %v6611_v27, %v3430_v4  ;;  %v5121_v8 = vpop.f32.mrb[228].mxu0  ;;  %v5314_v10 = vpop.f32.mrb[118].mxu1 }
 0x2be   :  { %4235 = vst [vmem:[%s7644_s5 + $0x3b0] sm:$0xff] %v3439_v3  ;;  %v2199_v11 = vadd.f32 %v6579_v59, %v5121_v8  ;;  %v3442_v12 = vadd.f32 %v6611_v27, %v5314_v10  ;;  %v2190_v13 = vpop.f32.mrb[229].mxu0  ;;  %v3433_v14 = vpop.f32.mrb[119].mxu1 }
 0x2bf   :  { %4233 = vst [vmem:[%s7644_s5 + $0x3a0] sm:$0xff] %v3431_v6  ;;  %v2191_v15 = vadd.f32 %v6579_v59, %v2190_v13  ;;  %v3434_v16 = vadd.f32 %v6611_v27, %v3433_v14  ;;  %v5122_v17 = vpop.f32.mrb[230].mxu0  ;;  %5419 = vmatprep.mubr.bf16.mxu1 %v2829_v5 }
 0x2c0   :  { %4236 = vst [vmem:[%s7644_s5 + $0x3b8] sm:$0xff] %v3442_v12  ;;  %v2202_v18 = vadd.f32 %v6579_v59, %v5122_v17  ;;  %v2193_v19 = vpop.f32.mrb[231].mxu0  ;;  %5420 = vmatmul.mubr.bf16.gmra.mrb[224].mxu1 %v2830_v2  ;;  %v2659_v9 = vmax.f32 %v2199_v11, 0.0 }
 0x2c1   :  { %4234 = vst [vmem:[%s7644_s5 + $0x3a8] sm:$0xff] %v3434_v16  ;;  %v2194_v20 = vadd.f32 %v6579_v59, %v2193_v19  ;;  %v2657_v22 = vmax.f32 %v2191_v15, 0.0 }
 0x2c2   :  { %v2660_v21 = vmax.f32 %v2202_v18, 0.0 }
 0x2c3   :  { %v2658_v23 = vmax.f32 %v2194_v20, 0.0  ;;  %v5317_v24 = vpop.f32.mrb[120].mxu1 }
 0x2c4   :  { %v2832_v25 = vpack.c.bf16 %v2660_v21, %v2659_v9  ;;  %v3455_v26 = vadd.f32 %v6611_v27, %v5317_v24  ;;  %v3446_v28 = vpop.f32.mrb[121].mxu1 }
 0x2c5   :  { %v2831_v29 = vpack.c.bf16 %v2658_v23, %v2657_v22  ;;  %v3447_v30 = vadd.f32 %v6611_v27, %v3446_v28  ;;  %v5125_v31 = vpop.f32.mrb[232].mxu0  ;;  %v5318_v32 = vpop.f32.mrb[122].mxu1  ;;  %v6958_v23 = vld [vmem:[%s7642_s2] ss:$0 sm:$0xff] }
 0x2c6   :  { %4239 = vst [vmem:[%s7644_s5 + $0x3d0] sm:$0xff] %v3455_v26  ;;  %v2215_v33 = vadd.f32 %v6579_v59, %v5125_v31  ;;  %v3458_v34 = vadd.f32 %v6611_v27, %v5318_v32  ;;  %v2206_v35 = vpop.f32.mrb[233].mxu0  ;;  %v3449_v36 = vpop.f32.mrb[123].mxu1 }
 0x2c7   :  { %4237 = vst [vmem:[%s7644_s5 + $0x3c0] sm:$0xff] %v3447_v30  ;;  %v2207_v37 = vadd.f32 %v6579_v59, %v2206_v35  ;;  %v3450_v38 = vadd.f32 %v6611_v27, %v3449_v36  ;;  %v5126_v39 = vpop.f32.mrb[234].mxu0  ;;  %5423 = vmatprep.mubr.bf16.mxu1 %v2831_v29 }
 0x2c8   :  { %4240 = vst [vmem:[%s7644_s5 + $0x3d8] sm:$0xff] %v3458_v34  ;;  %v2218_v40 = vadd.f32 %v6579_v59, %v5126_v39  ;;  %v2209_v41 = vpop.f32.mrb[235].mxu0  ;;  %5424 = vmatmul.mubr.bf16.gmra.mrb[228].mxu1 %v2832_v25  ;;  %v2663_v43 = vmax.f32 %v2215_v33, 0.0 }
 0x2c9   :  { %4238 = vst [vmem:[%s7644_s5 + $0x3c8] sm:$0xff] %v3450_v38  ;;  %v2210_v42 = vadd.f32 %v6579_v59, %v2209_v41  ;;  %v2661_v45 = vmax.f32 %v2207_v37, 0.0 }
 0x2ca   :  { %v2664_v44 = vmax.f32 %v2218_v40, 0.0 }
 0x2cb   :  { %v2662_v46 = vmax.f32 %v2210_v42, 0.0  ;;  %v5321_v48 = vpop.f32.mrb[124].mxu1 }
 0x2cc   :  { %v2834_v49 = vpack.c.bf16 %v2664_v44, %v2663_v43  ;;  %v3471_v7 = vadd.f32 %v6611_v27, %v5321_v48  ;;  %v3462_v50 = vpop.f32.mrb[125].mxu1 }
 0x2cd   :  { %v2833_v51 = vpack.c.bf16 %v2662_v46, %v2661_v45  ;;  %v3463_v52 = vadd.f32 %v6611_v27, %v3462_v50  ;;  %v5129_v53 = vpop.f32.mrb[236].mxu0  ;;  %v5322_v54 = vpop.f32.mrb[126].mxu1 }
 0x2ce   :  { %4243 = vst [vmem:[%s7644_s5 + $0x3f0] sm:$0xff] %v3471_v7  ;;  %v2231_v55 = vadd.f32 %v6579_v59, %v5129_v53  ;;  %v3474_v56 = vadd.f32 %v6611_v27, %v5322_v54  ;;  %v2222_v57 = vpop.f32.mrb[237].mxu0  ;;  %v3465_v58 = vpop.f32.mrb[127].mxu1 }
 0x2cf   :  { %4241 = vst [vmem:[%s7644_s5 + $0x3e0] sm:$0xff] %v3463_v52  ;;  %v2223_v60 = vadd.f32 %v6579_v59, %v2222_v57  ;;  %v3466_v61 = vadd.f32 %v6611_v27, %v3465_v58  ;;  %v5130_v62 = vpop.f32.mrb[238].mxu0  ;;  %5427 = vmatprep.mubr.bf16.mxu1 %v2833_v51 }
 0x2d0   :  { %4244 = vst [vmem:[%s7644_s5 + $0x3f8] sm:$0xff] %v3474_v56  ;;  %v2234_v63 = vadd.f32 %v6579_v59, %v5130_v62  ;;  %v2225_v0 = vpop.f32.mrb[239].mxu0  ;;  %5428 = vmatmul.mubr.bf16.gmra.mrb[232].mxu1 %v2834_v49  ;;  %v2667_v47 = vmax.f32 %v2231_v55, 0.0 }
 0x2d1   :  { %4242 = vst [vmem:[%s7644_s5 + $0x3e8] sm:$0xff] %v3466_v61  ;;  %v2226_v1 = vadd.f32 %v6579_v59, %v2225_v0  ;;  %v2665_v3 = vmax.f32 %v2223_v60, 0.0  ;;  %v6990_v61 = vld [vmem:[%s7643_s4] ss:$0 sm:$0xff] }
 0x2d2   :  { %v2668_v2 = vmax.f32 %v2234_v63, 0.0 }
 0x2d3   :  { %v2666_v4 = vmax.f32 %v2226_v1, 0.0  ;;  %v5325_v5 = vpop.f32.mrb[128].mxu1 }
 0x2d4   :  { %v2836_v6 = vpack.c.bf16 %v2668_v2, %v2667_v47  ;;  %v3487_v8 = vadd.f32 %v6611_v27, %v5325_v5  ;;  %v3478_v10 = vpop.f32.mrb[129].mxu1 }
 0x2d5   :  { %v2835_v11 = vpack.c.bf16 %v2666_v4, %v2665_v3  ;;  %v3479_v12 = vadd.f32 %v6611_v27, %v3478_v10  ;;  %v5133_v13 = vpop.f32.mrb[240].mxu0  ;;  %v5326_v14 = vpop.f32.mrb[130].mxu1 }
 0x2d6   :  { %4247 = vst [vmem:[%s7644_s5 + $0x410] sm:$0xff] %v3487_v8  ;;  %v2247_v15 = vadd.f32 %v6579_v59, %v5133_v13  ;;  %v3490_v16 = vadd.f32 %v6611_v27, %v5326_v14  ;;  %v2238_v17 = vpop.f32.mrb[241].mxu0  ;;  %v3481_v18 = vpop.f32.mrb[131].mxu1 }
 0x2d7   :  { %4245 = vst [vmem:[%s7644_s5 + $0x400] sm:$0xff] %v3479_v12  ;;  %v2239_v19 = vadd.f32 %v6579_v59, %v2238_v17  ;;  %v3482_v20 = vadd.f32 %v6611_v27, %v3481_v18  ;;  %v5134_v9 = vpop.f32.mrb[242].mxu0  ;;  %5431 = vmatprep.mubr.bf16.mxu1 %v2835_v11 }
 0x2d8   :  { %4248 = vst [vmem:[%s7644_s5 + $0x418] sm:$0xff] %v3490_v16  ;;  %v2250_v21 = vadd.f32 %v6579_v59, %v5134_v9  ;;  %v2241_v22 = vpop.f32.mrb[243].mxu0  ;;  %5432 = vmatmul.mubr.bf16.gmra.mrb[236].mxu1 %v2836_v6  ;;  %v2671_v25 = vmax.f32 %v2247_v15, 0.0 }
 0x2d9   :  { %4246 = vst [vmem:[%s7644_s5 + $0x408] sm:$0xff] %v3482_v20  ;;  %v2242_v24 = vadd.f32 %v6958_v23, %v2241_v22  ;;  %v2669_v28 = vmax.f32 %v2239_v19, 0.0 }
 0x2da   :  { %v2672_v26 = vmax.f32 %v2250_v21, 0.0 }
 0x2db   :  { %v2670_v29 = vmax.f32 %v2242_v24, 0.0  ;;  %v5329_v30 = vpop.f32.mrb[132].mxu1 }
 0x2dc   :  { %v2838_v31 = vpack.c.bf16 %v2672_v26, %v2671_v25  ;;  %v3503_v59 = vadd.f32 %v6611_v27, %v5329_v30  ;;  %v3494_v32 = vpop.f32.mrb[133].mxu1 }
 0x2dd   :  { %v2837_v33 = vpack.c.bf16 %v2670_v29, %v2669_v28  ;;  %v3495_v34 = vadd.f32 %v6611_v27, %v3494_v32  ;;  %v5137_v35 = vpop.f32.mrb[244].mxu0  ;;  %v5330_v36 = vpop.f32.mrb[134].mxu1 }
 0x2de   :  { %4251 = vst [vmem:[%s7644_s5 + $0x430] sm:$0xff] %v3503_v59  ;;  %v2263_v37 = vadd.f32 %v6958_v23, %v5137_v35  ;;  %v3506_v38 = vadd.f32 %v6611_v27, %v5330_v36  ;;  %v2254_v39 = vpop.f32.mrb[245].mxu0  ;;  %v3497_v40 = vpop.f32.mrb[135].mxu1 }
 0x2df   :  { %4249 = vst [vmem:[%s7644_s5 + $0x420] sm:$0xff] %v3495_v34  ;;  %v2255_v41 = vadd.f32 %v6958_v23, %v2254_v39  ;;  %v3498_v42 = vadd.f32 %v6611_v27, %v3497_v40  ;;  %v5138_v43 = vpop.f32.mrb[246].mxu0  ;;  %5435 = vmatprep.mubr.bf16.mxu1 %v2837_v33 }
 0x2e0   :  { %4252 = vst [vmem:[%s7644_s5 + $0x438] sm:$0xff] %v3506_v38  ;;  %v2266_v44 = vadd.f32 %v6958_v23, %v5138_v43  ;;  %v2257_v45 = vpop.f32.mrb[247].mxu0  ;;  %5436 = vmatmul.mubr.bf16.gmra.mrb[240].mxu1 %v2838_v31  ;;  %v2675_v48 = vmax.f32 %v2263_v37, 0.0 }
 0x2e1   :  { %4250 = vst [vmem:[%s7644_s5 + $0x428] sm:$0xff] %v3498_v42  ;;  %v2258_v46 = vadd.f32 %v6958_v23, %v2257_v45  ;;  %v2673_v7 = vmax.f32 %v2255_v41, 0.0 }
 0x2e2   :  { %v2676_v49 = vmax.f32 %v2266_v44, 0.0 }
 0x2e3   :  { %v2674_v50 = vmax.f32 %v2258_v46, 0.0  ;;  %v5333_v51 = vpop.f32.mrb[136].mxu1 }
 0x2e4   :  { %v2840_v52 = vpack.c.bf16 %v2676_v49, %v2675_v48  ;;  %v3519_v53 = vadd.f32 %v6611_v27, %v5333_v51  ;;  %v3510_v54 = vpop.f32.mrb[137].mxu1 }
 0x2e5   :  { %v2839_v55 = vpack.c.bf16 %v2674_v50, %v2673_v7  ;;  %v3511_v56 = vadd.f32 %v6611_v27, %v3510_v54  ;;  %v5141_v57 = vpop.f32.mrb[248].mxu0  ;;  %v5334_v58 = vpop.f32.mrb[138].mxu1 }
 0x2e6   :  { %4255 = vst [vmem:[%s7644_s5 + $0x450] sm:$0xff] %v3519_v53  ;;  %v2279_v60 = vadd.f32 %v6958_v23, %v5141_v57  ;;  %v3522_v62 = vadd.f32 %v6990_v61, %v5334_v58  ;;  %v2270_v63 = vpop.f32.mrb[249].mxu0  ;;  %v3513_v0 = vpop.f32.mrb[139].mxu1 }
 0x2e7   :  { %4253 = vst [vmem:[%s7644_s5 + $0x440] sm:$0xff] %v3511_v56  ;;  %v2271_v27 = vadd.f32 %v6958_v23, %v2270_v63  ;;  %v3514_v1 = vadd.f32 %v6990_v61, %v3513_v0  ;;  %v5142_v47 = vpop.f32.mrb[250].mxu0  ;;  %5439 = vmatprep.mubr.bf16.mxu1 %v2839_v55 }
 0x2e8   :  { %4256 = vst [vmem:[%s7644_s5 + $0x458] sm:$0xff] %v3522_v62  ;;  %v2282_v2 = vadd.f32 %v6958_v23, %v5142_v47  ;;  %v2273_v3 = vpop.f32.mrb[251].mxu0  ;;  %5440 = vmatmul.mubr.bf16.gmra.mrb[244].mxu1 %v2840_v52  ;;  %v2679_v5 = vmax.f32 %v2279_v60, 0.0 }
 0x2e9   :  { %4254 = vst [vmem:[%s7644_s5 + $0x448] sm:$0xff] %v3514_v1  ;;  %v2274_v4 = vadd.f32 %v6958_v23, %v2273_v3  ;;  %v2677_v8 = vmax.f32 %v2271_v27, 0.0 }
 0x2ea   :  { %v2680_v6 = vmax.f32 %v2282_v2, 0.0 }
 0x2eb   :  { %v2678_v10 = vmax.f32 %v2274_v4, 0.0  ;;  %v5337_v11 = vpop.f32.mrb[140].mxu1 }
 0x2ec   :  { %v2842_v12 = vpack.c.bf16 %v2680_v6, %v2679_v5  ;;  %v3535_v13 = vadd.f32 %v6990_v61, %v5337_v11  ;;  %v3526_v14 = vpop.f32.mrb[141].mxu1 }
 0x2ed   :  { %v2841_v15 = vpack.c.bf16 %v2678_v10, %v2677_v8  ;;  %v3527_v16 = vadd.f32 %v6990_v61, %v3526_v14  ;;  %v5145_v17 = vpop.f32.mrb[252].mxu0  ;;  %v5338_v18 = vpop.f32.mrb[142].mxu1 }
 0x2ee   :  { %4259 = vst [vmem:[%s7644_s5 + $0x470] sm:$0xff] %v3535_v13  ;;  %v2295_v19 = vadd.f32 %v6958_v23, %v5145_v17  ;;  %v3538_v20 = vadd.f32 %v6990_v61, %v5338_v18  ;;  %v2286_v9 = vpop.f32.mrb[253].mxu0  ;;  %v3529_v21 = vpop.f32.mrb[143].mxu1 }
 0x2ef   :  { %4257 = vst [vmem:[%s7644_s5 + $0x460] sm:$0xff] %v3527_v16  ;;  %v2287_v22 = vadd.f32 %v6958_v23, %v2286_v9  ;;  %v3530_v24 = vadd.f32 %v6990_v61, %v3529_v21  ;;  %v5146_v25 = vpop.f32.mrb[254].mxu0  ;;  %5443 = vmatprep.mubr.bf16.mxu1 %v2841_v15 }
 0x2f0   :  { %4260 = vst [vmem:[%s7644_s5 + $0x478] sm:$0xff] %v3538_v20  ;;  %v2298_v26 = vadd.f32 %v6958_v23, %v5146_v25  ;;  %v2289_v28 = vpop.f32.mrb[255].mxu0  ;;  %5444 = vmatmul.mubr.bf16.gmra.mrb[248].mxu1 %v2842_v12  ;;  %v2683_v30 = vmax.f32 %v2295_v19, 0.0 }
 0x2f1   :  { %4258 = vst [vmem:[%s7644_s5 + $0x468] sm:$0xff] %v3530_v24  ;;  %v2290_v29 = vadd.f32 %v6958_v23, %v2289_v28  ;;  %v2681_v59 = vmax.f32 %v2287_v22, 0.0 }
 0x2f2   :  { %v2684_v31 = vmax.f32 %v2298_v26, 0.0 }
 0x2f3   :  { %v2682_v32 = vmax.f32 %v2290_v29, 0.0  ;;  %v5341_v33 = vpop.f32.mrb[144].mxu1 }
 0x2f4   :  { %v2844_v34 = vpack.c.bf16 %v2684_v31, %v2683_v30  ;;  %v3551_v35 = vadd.f32 %v6990_v61, %v5341_v33  ;;  %v3542_v36 = vpop.f32.mrb[145].mxu1 }
 0x2f5   :  { %v2843_v37 = vpack.c.bf16 %v2682_v32, %v2681_v59  ;;  %v3543_v38 = vadd.f32 %v6990_v61, %v3542_v36  ;;  %v5149_v39 = vpop.f32.mrb[0].mxu0  ;;  %v5342_v40 = vpop.f32.mrb[146].mxu1 }
 0x2f6   :  { %4263 = vst [vmem:[%s7644_s5 + $0x490] sm:$0xff] %v3551_v35  ;;  %v2311_v41 = vadd.f32 %v6958_v23, %v5149_v39  ;;  %v3554_v42 = vadd.f32 %v6990_v61, %v5342_v40  ;;  %v2302_v43 = vpop.f32.mrb[1].mxu0  ;;  %v3545_v44 = vpop.f32.mrb[147].mxu1 }
 0x2f7   :  { %4261 = vst [vmem:[%s7644_s5 + $0x480] sm:$0xff] %v3543_v38  ;;  %v2303_v45 = vadd.f32 %v6958_v23, %v2302_v43  ;;  %v3546_v46 = vadd.f32 %v6990_v61, %v3545_v44  ;;  %v5150_v48 = vpop.f32.mrb[2].mxu0  ;;  %5447 = vmatprep.mubr.bf16.mxu1 %v2843_v37 }
 0x2f8   :  { %4264 = vst [vmem:[%s7644_s5 + $0x498] sm:$0xff] %v3554_v42  ;;  %v2314_v49 = vadd.f32 %v6958_v23, %v5150_v48  ;;  %v2305_v7 = vpop.f32.mrb[3].mxu0  ;;  %5448 = vmatmul.mubr.bf16.gmra.mrb[252].mxu1 %v2844_v34  ;;  %v2687_v51 = vmax.f32 %v2311_v41, 0.0 }
 0x2f9   :  { %4262 = vst [vmem:[%s7644_s5 + $0x488] sm:$0xff] %v3546_v46  ;;  %v2306_v50 = vadd.f32 %v6958_v23, %v2305_v7  ;;  %v2685_v53 = vmax.f32 %v2303_v45, 0.0 }
 0x2fa   :  { %v2688_v52 = vmax.f32 %v2314_v49, 0.0 }
 0x2fb   :  { %v2686_v54 = vmax.f32 %v2306_v50, 0.0  ;;  %v5345_v55 = vpop.f32.mrb[148].mxu1 }
 0x2fc   :  { %v2846_v56 = vpack.c.bf16 %v2688_v52, %v2687_v51  ;;  %v3567_v57 = vadd.f32 %v6990_v61, %v5345_v55  ;;  %v3558_v58 = vpop.f32.mrb[149].mxu1 }
 0x2fd   :  { %v2845_v60 = vpack.c.bf16 %v2686_v54, %v2685_v53  ;;  %v3559_v62 = vadd.f32 %v6990_v61, %v3558_v58  ;;  %v5153_v63 = vpop.f32.mrb[4].mxu0  ;;  %v5346_v0 = vpop.f32.mrb[150].mxu1 }
 0x2fe   :  { %4267 = vst [vmem:[%s7644_s5 + $0x4b0] sm:$0xff] %v3567_v57  ;;  %v2327_v27 = vadd.f32 %v6958_v23, %v5153_v63  ;;  %v3570_v1 = vadd.f32 %v6990_v61, %v5346_v0  ;;  %v2318_v47 = vpop.f32.mrb[5].mxu0  ;;  %v3561_v2 = vpop.f32.mrb[151].mxu1 }
 0x2ff   :  { %4265 = vst [vmem:[%s7644_s5 + $0x4a0] sm:$0xff] %v3559_v62  ;;  %v2319_v3 = vadd.f32 %v6958_v23, %v2318_v47  ;;  %v3562_v4 = vadd.f32 %v6990_v61, %v3561_v2  ;;  %v5154_v5 = vpop.f32.mrb[6].mxu0  ;;  %5451 = vmatprep.mubr.bf16.mxu1 %v2845_v60 }
 0x300   :  { %4268 = vst [vmem:[%s7644_s5 + $0x4b8] sm:$0xff] %v3570_v1  ;;  %v2330_v6 = vadd.f32 %v6958_v23, %v5154_v5  ;;  %v2321_v8 = vpop.f32.mrb[7].mxu0  ;;  %5452 = vmatmul.mubr.bf16.gmra.mrb[0].mxu1 %v2846_v56  ;;  %v2691_v11 = vmax.f32 %v2327_v27, 0.0 }
 0x301   :  { %4266 = vst [vmem:[%s7644_s5 + $0x4a8] sm:$0xff] %v3562_v4  ;;  %v2322_v10 = vadd.f32 %v6958_v23, %v2321_v8  ;;  %v2689_v13 = vmax.f32 %v2319_v3, 0.0 }
 0x302   :  { %v2692_v12 = vmax.f32 %v2330_v6, 0.0 }
 0x303   :  { %v2690_v14 = vmax.f32 %v2322_v10, 0.0  ;;  %v5349_v15 = vpop.f32.mrb[152].mxu1 }
 0x304   :  { %v2848_v16 = vpack.c.bf16 %v2692_v12, %v2691_v11  ;;  %v3583_v17 = vadd.f32 %v6990_v61, %v5349_v15  ;;  %v3574_v18 = vpop.f32.mrb[153].mxu1 }
 0x305   :  { %v2847_v19 = vpack.c.bf16 %v2690_v14, %v2689_v13  ;;  %v3575_v20 = vadd.f32 %v6990_v61, %v3574_v18  ;;  %v5157_v9 = vpop.f32.mrb[8].mxu0  ;;  %v5350_v21 = vpop.f32.mrb[154].mxu1 }
 0x306   :  { %4271 = vst [vmem:[%s7644_s5 + $0x4d0] sm:$0xff] %v3583_v17  ;;  %v2343_v22 = vadd.f32 %v6958_v23, %v5157_v9  ;;  %v3586_v24 = vadd.f32 %v6990_v61, %v5350_v21  ;;  %v2334_v25 = vpop.f32.mrb[9].mxu0  ;;  %v3577_v26 = vpop.f32.mrb[155].mxu1 }
 0x307   :  { %4269 = vst [vmem:[%s7644_s5 + $0x4c0] sm:$0xff] %v3575_v20  ;;  %v2335_v28 = vadd.f32 %v6958_v23, %v2334_v25  ;;  %v3578_v29 = vadd.f32 %v6990_v61, %v3577_v26  ;;  %v5158_v30 = vpop.f32.mrb[10].mxu0  ;;  %5455 = vmatprep.mubr.bf16.mxu1 %v2847_v19 }
 0x308   :  { %4272 = vst [vmem:[%s7644_s5 + $0x4d8] sm:$0xff] %v3586_v24  ;;  %v2346_v31 = vadd.f32 %v6958_v23, %v5158_v30  ;;  %v2337_v59 = vpop.f32.mrb[11].mxu0  ;;  %5456 = vmatmul.mubr.bf16.gmra.mrb[4].mxu1 %v2848_v16  ;;  %v2695_v33 = vmax.f32 %v2343_v22, 0.0 }
 0x309   :  { %4270 = vst [vmem:[%s7644_s5 + $0x4c8] sm:$0xff] %v3578_v29  ;;  %v2338_v32 = vadd.f32 %v6958_v23, %v2337_v59  ;;  %v2693_v35 = vmax.f32 %v2335_v28, 0.0 }
 0x30a   :  { %v2696_v34 = vmax.f32 %v2346_v31, 0.0 }
 0x30b   :  { %v2694_v36 = vmax.f32 %v2338_v32, 0.0  ;;  %v5353_v37 = vpop.f32.mrb[156].mxu1 }
 0x30c   :  { %v2850_v38 = vpack.c.bf16 %v2696_v34, %v2695_v33  ;;  %v3599_v39 = vadd.f32 %v6990_v61, %v5353_v37  ;;  %v3590_v40 = vpop.f32.mrb[157].mxu1 }
 0x30d   :  { %v2849_v41 = vpack.c.bf16 %v2694_v36, %v2693_v35  ;;  %v3591_v42 = vadd.f32 %v6990_v61, %v3590_v40  ;;  %v5161_v43 = vpop.f32.mrb[12].mxu0  ;;  %v5354_v44 = vpop.f32.mrb[158].mxu1 }
 0x30e   :  { %4275 = vst [vmem:[%s7644_s5 + $0x4f0] sm:$0xff] %v3599_v39  ;;  %v2359_v45 = vadd.f32 %v6958_v23, %v5161_v43  ;;  %v3602_v46 = vadd.f32 %v6990_v61, %v5354_v44  ;;  %v2350_v48 = vpop.f32.mrb[13].mxu0  ;;  %v3593_v49 = vpop.f32.mrb[159].mxu1 }
 0x30f   :  { %4273 = vst [vmem:[%s7644_s5 + $0x4e0] sm:$0xff] %v3591_v42  ;;  %v2351_v7 = vadd.f32 %v6958_v23, %v2350_v48  ;;  %v3594_v50 = vadd.f32 %v6990_v61, %v3593_v49  ;;  %v5162_v51 = vpop.f32.mrb[14].mxu0  ;;  %5459 = vmatprep.mubr.bf16.mxu1 %v2849_v41 }
 0x310   :  { %4276 = vst [vmem:[%s7644_s5 + $0x4f8] sm:$0xff] %v3602_v46  ;;  %v2362_v52 = vadd.f32 %v6958_v23, %v5162_v51  ;;  %v2353_v53 = vpop.f32.mrb[15].mxu0  ;;  %5460 = vmatmul.mubr.bf16.gmra.mrb[8].mxu1 %v2850_v38  ;;  %v2699_v55 = vmax.f32 %v2359_v45, 0.0 }
 0x311   :  { %4274 = vst [vmem:[%s7644_s5 + $0x4e8] sm:$0xff] %v3594_v50  ;;  %v2354_v54 = vadd.f32 %v6958_v23, %v2353_v53  ;;  %v2697_v57 = vmax.f32 %v2351_v7, 0.0 }
 0x312   :  { %v2700_v56 = vmax.f32 %v2362_v52, 0.0 }
 0x313   :  { %v2698_v58 = vmax.f32 %v2354_v54, 0.0  ;;  %v5357_v60 = vpop.f32.mrb[160].mxu1 }
 0x314   :  { %v2852_v62 = vpack.c.bf16 %v2700_v56, %v2699_v55  ;;  %v3615_v63 = vadd.f32 %v6990_v61, %v5357_v60  ;;  %v3606_v0 = vpop.f32.mrb[161].mxu1 }
 0x315   :  { %v2851_v27 = vpack.c.bf16 %v2698_v58, %v2697_v57  ;;  %v3607_v1 = vadd.f32 %v6990_v61, %v3606_v0  ;;  %v5165_v47 = vpop.f32.mrb[16].mxu0  ;;  %v5358_v2 = vpop.f32.mrb[162].mxu1 }
 0x316   :  { %4279 = vst [vmem:[%s7644_s5 + $0x510] sm:$0xff] %v3615_v63  ;;  %v2375_v3 = vadd.f32 %v6958_v23, %v5165_v47  ;;  %v3618_v4 = vadd.f32 %v6990_v61, %v5358_v2  ;;  %v2366_v5 = vpop.f32.mrb[17].mxu0  ;;  %v3609_v6 = vpop.f32.mrb[163].mxu1 }
 0x317   :  { %4277 = vst [vmem:[%s7644_s5 + $0x500] sm:$0xff] %v3607_v1  ;;  %v2367_v8 = vadd.f32 %v6958_v23, %v2366_v5  ;;  %v3610_v10 = vadd.f32 %v6990_v61, %v3609_v6  ;;  %v5166_v11 = vpop.f32.mrb[18].mxu0  ;;  %5463 = vmatprep.mubr.bf16.mxu1 %v2851_v27 }
 0x318   :  { %4280 = vst [vmem:[%s7644_s5 + $0x518] sm:$0xff] %v3618_v4  ;;  %v2378_v12 = vadd.f32 %v6958_v23, %v5166_v11  ;;  %v2369_v13 = vpop.f32.mrb[19].mxu0  ;;  %5464 = vmatmul.mubr.bf16.gmra.mrb[12].mxu1 %v2852_v62  ;;  %v2703_v15 = vmax.f32 %v2375_v3, 0.0 }
 0x319   :  { %4278 = vst [vmem:[%s7644_s5 + $0x508] sm:$0xff] %v3610_v10  ;;  %v2370_v14 = vadd.f32 %v6958_v23, %v2369_v13  ;;  %v2701_v17 = vmax.f32 %v2367_v8, 0.0 }
 0x31a   :  { %v2704_v16 = vmax.f32 %v2378_v12, 0.0 }
 0x31b   :  { %v2702_v18 = vmax.f32 %v2370_v14, 0.0  ;;  %v5361_v19 = vpop.f32.mrb[164].mxu1 }
 0x31c   :  { %v2854_v20 = vpack.c.bf16 %v2704_v16, %v2703_v15  ;;  %v3631_v9 = vadd.f32 %v6990_v61, %v5361_v19  ;;  %v3622_v21 = vpop.f32.mrb[165].mxu1 }
 0x31d   :  { %v2853_v22 = vpack.c.bf16 %v2702_v18, %v2701_v17  ;;  %v3623_v24 = vadd.f32 %v6990_v61, %v3622_v21  ;;  %v5169_v25 = vpop.f32.mrb[20].mxu0  ;;  %v5362_v26 = vpop.f32.mrb[166].mxu1 }
 0x31e   :  { %4283 = vst [vmem:[%s7644_s5 + $0x530] sm:$0xff] %v3631_v9  ;;  %v2391_v28 = vadd.f32 %v6958_v23, %v5169_v25  ;;  %v3634_v29 = vadd.f32 %v6990_v61, %v5362_v26  ;;  %v2382_v30 = vpop.f32.mrb[21].mxu0  ;;  %v3625_v31 = vpop.f32.mrb[167].mxu1 }
 0x31f   :  { %4281 = vst [vmem:[%s7644_s5 + $0x520] sm:$0xff] %v3623_v24  ;;  %v2383_v59 = vadd.f32 %v6958_v23, %v2382_v30  ;;  %v3626_v32 = vadd.f32 %v6990_v61, %v3625_v31  ;;  %v5170_v33 = vpop.f32.mrb[22].mxu0  ;;  %5467 = vmatprep.mubr.bf16.mxu1 %v2853_v22 }
 0x320   :  { %4284 = vst [vmem:[%s7644_s5 + $0x538] sm:$0xff] %v3634_v29  ;;  %v2394_v34 = vadd.f32 %v6958_v23, %v5170_v33  ;;  %v2385_v35 = vpop.f32.mrb[23].mxu0  ;;  %5468 = vmatmul.mubr.bf16.gmra.mrb[16].mxu1 %v2854_v20  ;;  %v2707_v37 = vmax.f32 %v2391_v28, 0.0 }
 0x321   :  { %4282 = vst [vmem:[%s7644_s5 + $0x528] sm:$0xff] %v3626_v32  ;;  %v2386_v36 = vadd.f32 %v6958_v23, %v2385_v35  ;;  %v2705_v39 = vmax.f32 %v2383_v59, 0.0 }
 0x322   :  { %v2708_v38 = vmax.f32 %v2394_v34, 0.0 }
 0x323   :  { %v2706_v40 = vmax.f32 %v2386_v36, 0.0  ;;  %v5365_v41 = vpop.f32.mrb[168].mxu1 }
 0x324   :  { %v2856_v42 = vpack.c.bf16 %v2708_v38, %v2707_v37  ;;  %v3647_v43 = vadd.f32 %v6990_v61, %v5365_v41  ;;  %v3638_v44 = vpop.f32.mrb[169].mxu1 }
 0x325   :  { %v2855_v45 = vpack.c.bf16 %v2706_v40, %v2705_v39  ;;  %v3639_v46 = vadd.f32 %v6990_v61, %v3638_v44  ;;  %v5173_v48 = vpop.f32.mrb[24].mxu0  ;;  %v5366_v49 = vpop.f32.mrb[170].mxu1 }
 0x326   :  { %4287 = vst [vmem:[%s7644_s5 + $0x550] sm:$0xff] %v3647_v43  ;;  %v2407_v7 = vadd.f32 %v6958_v23, %v5173_v48  ;;  %v3650_v50 = vadd.f32 %v6990_v61, %v5366_v49  ;;  %v2398_v51 = vpop.f32.mrb[25].mxu0  ;;  %v3641_v52 = vpop.f32.mrb[171].mxu1 }
 0x327   :  { %4285 = vst [vmem:[%s7644_s5 + $0x540] sm:$0xff] %v3639_v46  ;;  %v2399_v53 = vadd.f32 %v6958_v23, %v2398_v51  ;;  %v3642_v54 = vadd.f32 %v6990_v61, %v3641_v52  ;;  %v5174_v55 = vpop.f32.mrb[26].mxu0  ;;  %5471 = vmatprep.mubr.bf16.mxu1 %v2855_v45 }
 0x328   :  { %4288 = vst [vmem:[%s7644_s5 + $0x558] sm:$0xff] %v3650_v50  ;;  %v2410_v56 = vadd.f32 %v6958_v23, %v5174_v55  ;;  %v2401_v57 = vpop.f32.mrb[27].mxu0  ;;  %5472 = vmatmul.mubr.bf16.gmra.mrb[20].mxu1 %v2856_v42  ;;  %v2711_v60 = vmax.f32 %v2407_v7, 0.0 }
 0x329   :  { %4286 = vst [vmem:[%s7644_s5 + $0x548] sm:$0xff] %v3642_v54  ;;  %v2402_v58 = vadd.f32 %v6958_v23, %v2401_v57  ;;  %v2709_v63 = vmax.f32 %v2399_v53, 0.0 }
 0x32a   :  { %v2712_v62 = vmax.f32 %v2410_v56, 0.0 }
 0x32b   :  { %v2710_v0 = vmax.f32 %v2402_v58, 0.0  ;;  %v5369_v27 = vpop.f32.mrb[172].mxu1 }
 0x32c   :  { %v2858_v1 = vpack.c.bf16 %v2712_v62, %v2711_v60  ;;  %v3663_v47 = vadd.f32 %v6990_v61, %v5369_v27  ;;  %v3654_v2 = vpop.f32.mrb[173].mxu1 }
 0x32d   :  { %v2857_v3 = vpack.c.bf16 %v2710_v0, %v2709_v63  ;;  %v3655_v4 = vadd.f32 %v6990_v61, %v3654_v2  ;;  %v5177_v5 = vpop.f32.mrb[28].mxu0  ;;  %v5370_v6 = vpop.f32.mrb[174].mxu1 }
 0x32e   :  { %4291 = vst [vmem:[%s7644_s5 + $0x570] sm:$0xff] %v3663_v47  ;;  %v2423_v8 = vadd.f32 %v6958_v23, %v5177_v5  ;;  %v3666_v10 = vadd.f32 %v6990_v61, %v5370_v6  ;;  %v2414_v11 = vpop.f32.mrb[29].mxu0  ;;  %v3657_v12 = vpop.f32.mrb[175].mxu1 }
 0x32f   :  { %4289 = vst [vmem:[%s7644_s5 + $0x560] sm:$0xff] %v3655_v4  ;;  %v2415_v13 = vadd.f32 %v6958_v23, %v2414_v11  ;;  %v3658_v14 = vadd.f32 %v6990_v61, %v3657_v12  ;;  %v5178_v15 = vpop.f32.mrb[30].mxu0  ;;  %5475 = vmatprep.mubr.bf16.mxu1 %v2857_v3 }
 0x330   :  { %4292 = vst [vmem:[%s7644_s5 + $0x578] sm:$0xff] %v3666_v10  ;;  %v2426_v16 = vadd.f32 %v6958_v23, %v5178_v15  ;;  %v2417_v17 = vpop.f32.mrb[31].mxu0  ;;  %5476 = vmatmul.mubr.bf16.gmra.mrb[24].mxu1 %v2858_v1  ;;  %v2715_v19 = vmax.f32 %v2423_v8, 0.0 }
 0x331   :  { %4290 = vst [vmem:[%s7644_s5 + $0x568] sm:$0xff] %v3658_v14  ;;  %v2418_v18 = vadd.f32 %v6958_v23, %v2417_v17  ;;  %v2713_v9 = vmax.f32 %v2415_v13, 0.0 }
 0x332   :  { %v2716_v20 = vmax.f32 %v2426_v16, 0.0 }
 0x333   :  { %v2714_v21 = vmax.f32 %v2418_v18, 0.0  ;;  %v5373_v22 = vpop.f32.mrb[176].mxu1 }
 0x334   :  { %v2860_v24 = vpack.c.bf16 %v2716_v20, %v2715_v19  ;;  %v3679_v25 = vadd.f32 %v6990_v61, %v5373_v22  ;;  %v3670_v26 = vpop.f32.mrb[177].mxu1 }
 0x335   :  { %v2859_v28 = vpack.c.bf16 %v2714_v21, %v2713_v9  ;;  %v3671_v29 = vadd.f32 %v6990_v61, %v3670_v26  ;;  %v5374_v30 = vpop.f32.mrb[178].mxu1 }
 0x336   :  { %4295 = vst [vmem:[%s7644_s5 + $0x590] sm:$0xff] %v3679_v25  ;;  %v3682_v31 = vadd.f32 %v6990_v61, %v5374_v30  ;;  %v3673_v23 = vpop.f32.mrb[179].mxu1 }
 0x337   :  { %4293 = vst [vmem:[%s7644_s5 + $0x580] sm:$0xff] %v3671_v29  ;;  %v3674_v59 = vadd.f32 %v6990_v61, %v3673_v23  ;;  %5479 = vmatprep.mubr.bf16.mxu1 %v2859_v28 }
 0x338   :  { %4296 = vst [vmem:[%s7644_s5 + $0x598] sm:$0xff] %v3682_v31  ;;  %5480 = vmatmul.mubr.bf16.gmra.mrb[28].mxu1 %v2860_v24 }
 0x339   :  { %4294 = vst [vmem:[%s7644_s5 + $0x588] sm:$0xff] %v3674_v59 }
 0x33b   :  { %v5377_v32 = vpop.f32.mrb[180].mxu1 }
 0x33c   :  { %v3695_v33 = vadd.f32 %v6990_v61, %v5377_v32  ;;  %v3686_v34 = vpop.f32.mrb[181].mxu1 }
 0x33d   :  { %v3687_v35 = vadd.f32 %v6990_v61, %v3686_v34  ;;  %v5378_v36 = vpop.f32.mrb[182].mxu1 }
 0x33e   :  { %4299 = vst [vmem:[%s7644_s5 + $0x5b0] sm:$0xff] %v3695_v33  ;;  %v3698_v37 = vadd.f32 %v6990_v61, %v5378_v36  ;;  %v3689_v38 = vpop.f32.mrb[183].mxu1 }
 0x33f   :  { %4297 = vst [vmem:[%s7644_s5 + $0x5a0] sm:$0xff] %v3687_v35  ;;  %v3690_v39 = vadd.f32 %v6990_v61, %v3689_v38 }
 0x340   :  { %4300 = vst [vmem:[%s7644_s5 + $0x5b8] sm:$0xff] %v3698_v37 }
 0x341   :  { %4298 = vst [vmem:[%s7644_s5 + $0x5a8] sm:$0xff] %v3690_v39 }
 0x343   :  { %v5381_v40 = vpop.f32.mrb[184].mxu1 }
 0x344   :  { %v3711_v41 = vadd.f32 %v6990_v61, %v5381_v40  ;;  %v3702_v42 = vpop.f32.mrb[185].mxu1 }
 0x345   :  { %v3703_v43 = vadd.f32 %v6990_v61, %v3702_v42  ;;  %v5382_v44 = vpop.f32.mrb[186].mxu1 }
 0x346   :  { %4303 = vst [vmem:[%s7644_s5 + $0x5d0] sm:$0xff] %v3711_v41  ;;  %v3714_v45 = vadd.f32 %v6990_v61, %v5382_v44  ;;  %v3705_v46 = vpop.f32.mrb[187].mxu1 }
 0x347   :  { %4301 = vst [vmem:[%s7644_s5 + $0x5c0] sm:$0xff] %v3703_v43  ;;  %v3706_v48 = vadd.f32 %v6990_v61, %v3705_v46 }
 0x348   :  { %4304 = vst [vmem:[%s7644_s5 + $0x5d8] sm:$0xff] %v3714_v45 }
 0x349   :  { %4302 = vst [vmem:[%s7644_s5 + $0x5c8] sm:$0xff] %v3706_v48 }
 0x34b   :  { %v5385_v49 = vpop.f32.mrb[188].mxu1 }
 0x34c   :  { %v3727_v7 = vadd.f32 %v6990_v61, %v5385_v49  ;;  %v3718_v50 = vpop.f32.mrb[189].mxu1 }
 0x34d   :  { %v3719_v51 = vadd.f32 %v6990_v61, %v3718_v50  ;;  %v5386_v52 = vpop.f32.mrb[190].mxu1 }
 0x34e   :  { %4307 = vst [vmem:[%s7644_s5 + $0x5f0] sm:$0xff] %v3727_v7  ;;  %v3730_v53 = vadd.f32 %v6990_v61, %v5386_v52  ;;  %v3721_v54 = vpop.f32.mrb[191].mxu1 }
 0x34f   :  { %4305 = vst [vmem:[%s7644_s5 + $0x5e0] sm:$0xff] %v3719_v51  ;;  %v3722_v55 = vadd.f32 %v6990_v61, %v3721_v54 }
 0x350   :  { %4308 = vst [vmem:[%s7644_s5 + $0x5f8] sm:$0xff] %v3730_v53 }
 0x351   :  { %4306 = vst [vmem:[%s7644_s5 + $0x5e8] sm:$0xff] %v3722_v55 }
 0x353   :  { %v5389_v56 = vpop.f32.mrb[192].mxu1 }
 0x354   :  { %v3743_v57 = vadd.f32 %v6990_v61, %v5389_v56  ;;  %v3734_v58 = vpop.f32.mrb[193].mxu1 }
 0x355   :  { %v3735_v60 = vadd.f32 %v6990_v61, %v3734_v58  ;;  %v5390_v62 = vpop.f32.mrb[194].mxu1 }
 0x356   :  { %4311 = vst [vmem:[%s7644_s5 + $0x610] sm:$0xff] %v3743_v57  ;;  %v3746_v63 = vadd.f32 %v6990_v61, %v5390_v62  ;;  %v3737_v0 = vpop.f32.mrb[195].mxu1 }
 0x357   :  { %4309 = vst [vmem:[%s7644_s5 + $0x600] sm:$0xff] %v3735_v60  ;;  %v3738_v27 = vadd.f32 %v6990_v61, %v3737_v0 }
 0x358   :  { %4312 = vst [vmem:[%s7644_s5 + $0x618] sm:$0xff] %v3746_v63 }
 0x359   :  { %4310 = vst [vmem:[%s7644_s5 + $0x608] sm:$0xff] %v3738_v27 }
 0x35b   :  { %v5393_v1 = vpop.f32.mrb[196].mxu1 }
 0x35c   :  { %v3759_v47 = vadd.f32 %v6990_v61, %v5393_v1  ;;  %v3750_v2 = vpop.f32.mrb[197].mxu1 }
 0x35d   :  { %v3751_v3 = vadd.f32 %v6990_v61, %v3750_v2  ;;  %v5394_v4 = vpop.f32.mrb[198].mxu1 }
 0x35e   :  { %4315 = vst [vmem:[%s7644_s5 + $0x630] sm:$0xff] %v3759_v47  ;;  %v3762_v5 = vadd.f32 %v6990_v61, %v5394_v4  ;;  %v3753_v6 = vpop.f32.mrb[199].mxu1 }
 0x35f   :  { %4313 = vst [vmem:[%s7644_s5 + $0x620] sm:$0xff] %v3751_v3  ;;  %v3754_v8 = vadd.f32 %v6990_v61, %v3753_v6 }
 0x360   :  { %4316 = vst [vmem:[%s7644_s5 + $0x638] sm:$0xff] %v3762_v5 }
 0x361   :  { %4314 = vst [vmem:[%s7644_s5 + $0x628] sm:$0xff] %v3754_v8 }
 0x363   :  { %v5397_v10 = vpop.f32.mrb[200].mxu1 }
 0x364   :  { %v3775_v11 = vadd.f32 %v6990_v61, %v5397_v10  ;;  %v3766_v12 = vpop.f32.mrb[201].mxu1 }
 0x365   :  { %v3767_v13 = vadd.f32 %v6990_v61, %v3766_v12  ;;  %v5398_v14 = vpop.f32.mrb[202].mxu1 }
 0x366   :  { %4319 = vst [vmem:[%s7644_s5 + $0x650] sm:$0xff] %v3775_v11  ;;  %v3778_v15 = vadd.f32 %v6990_v61, %v5398_v14  ;;  %v3769_v16 = vpop.f32.mrb[203].mxu1 }
 0x367   :  { %4317 = vst [vmem:[%s7644_s5 + $0x640] sm:$0xff] %v3767_v13  ;;  %v3770_v17 = vadd.f32 %v6990_v61, %v3769_v16 }
 0x368   :  { %4320 = vst [vmem:[%s7644_s5 + $0x658] sm:$0xff] %v3778_v15 }
 0x369   :  { %4318 = vst [vmem:[%s7644_s5 + $0x648] sm:$0xff] %v3770_v17 }
 0x36b   :  { %v5401_v18 = vpop.f32.mrb[204].mxu1 }
 0x36c   :  { %v3791_v19 = vadd.f32 %v6990_v61, %v5401_v18  ;;  %v3782_v20 = vpop.f32.mrb[205].mxu1 }
 0x36d   :  { %v3783_v9 = vadd.f32 %v6990_v61, %v3782_v20  ;;  %v5402_v21 = vpop.f32.mrb[206].mxu1 }
 0x36e   :  { %4323 = vst [vmem:[%s7644_s5 + $0x670] sm:$0xff] %v3791_v19  ;;  %v3794_v22 = vadd.f32 %v6990_v61, %v5402_v21  ;;  %v3785_v24 = vpop.f32.mrb[207].mxu1 }
 0x36f   :  { %4321 = vst [vmem:[%s7644_s5 + $0x660] sm:$0xff] %v3783_v9  ;;  %v3786_v25 = vadd.f32 %v6990_v61, %v3785_v24 }
 0x370   :  { %4324 = vst [vmem:[%s7644_s5 + $0x678] sm:$0xff] %v3794_v22 }
 0x371   :  { %4322 = vst [vmem:[%s7644_s5 + $0x668] sm:$0xff] %v3786_v25 }
 0x373   :  { %v5405_v26 = vpop.f32.mrb[208].mxu1 }
 0x374   :  { %v3807_v28 = vadd.f32 %v6990_v61, %v5405_v26  ;;  %v3798_v29 = vpop.f32.mrb[209].mxu1 }
 0x375   :  { %v3799_v30 = vadd.f32 %v6990_v61, %v3798_v29  ;;  %v5406_v31 = vpop.f32.mrb[210].mxu1 }
 0x376   :  { %4327 = vst [vmem:[%s7644_s5 + $0x690] sm:$0xff] %v3807_v28  ;;  %v3810_v23 = vadd.f32 %v6990_v61, %v5406_v31  ;;  %v3801_v59 = vpop.f32.mrb[211].mxu1 }
 0x377   :  { %4325 = vst [vmem:[%s7644_s5 + $0x680] sm:$0xff] %v3799_v30  ;;  %v3802_v32 = vadd.f32 %v6990_v61, %v3801_v59 }
 0x378   :  { %4328 = vst [vmem:[%s7644_s5 + $0x698] sm:$0xff] %v3810_v23 }
 0x379   :  { %4326 = vst [vmem:[%s7644_s5 + $0x688] sm:$0xff] %v3802_v32 }
 0x37b   :  { %v5409_v33 = vpop.f32.mrb[212].mxu1 }
 0x37c   :  { %v3823_v34 = vadd.f32 %v6990_v61, %v5409_v33  ;;  %v3814_v35 = vpop.f32.mrb[213].mxu1 }
 0x37d   :  { %v3815_v36 = vadd.f32 %v6990_v61, %v3814_v35  ;;  %v5410_v37 = vpop.f32.mrb[214].mxu1 }
 0x37e   :  { %4331 = vst [vmem:[%s7644_s5 + $0x6b0] sm:$0xff] %v3823_v34  ;;  %v3826_v38 = vadd.f32 %v6990_v61, %v5410_v37  ;;  %v3817_v39 = vpop.f32.mrb[215].mxu1 }
 0x37f   :  { %4329 = vst [vmem:[%s7644_s5 + $0x6a0] sm:$0xff] %v3815_v36  ;;  %v3818_v40 = vadd.f32 %v6990_v61, %v3817_v39 }
 0x380   :  { %4332 = vst [vmem:[%s7644_s5 + $0x6b8] sm:$0xff] %v3826_v38 }
 0x381   :  { %4330 = vst [vmem:[%s7644_s5 + $0x6a8] sm:$0xff] %v3818_v40 }
 0x383   :  { %v5413_v41 = vpop.f32.mrb[216].mxu1 }
 0x384   :  { %v3839_v42 = vadd.f32 %v6990_v61, %v5413_v41  ;;  %v3830_v43 = vpop.f32.mrb[217].mxu1 }
 0x385   :  { %v3831_v44 = vadd.f32 %v6990_v61, %v3830_v43  ;;  %v5414_v45 = vpop.f32.mrb[218].mxu1 }
 0x386   :  { %4335 = vst [vmem:[%s7644_s5 + $0x6d0] sm:$0xff] %v3839_v42  ;;  %v3842_v46 = vadd.f32 %v6990_v61, %v5414_v45  ;;  %v3833_v48 = vpop.f32.mrb[219].mxu1 }
 0x387   :  { %4333 = vst [vmem:[%s7644_s5 + $0x6c0] sm:$0xff] %v3831_v44  ;;  %v3834_v49 = vadd.f32 %v6990_v61, %v3833_v48 }
 0x388   :  { %4336 = vst [vmem:[%s7644_s5 + $0x6d8] sm:$0xff] %v3842_v46 }
 0x389   :  { %4334 = vst [vmem:[%s7644_s5 + $0x6c8] sm:$0xff] %v3834_v49 }
 0x38b   :  { %v5417_v7 = vpop.f32.mrb[220].mxu1 }
 0x38c   :  { %v3855_v50 = vadd.f32 %v6990_v61, %v5417_v7  ;;  %v3846_v51 = vpop.f32.mrb[221].mxu1 }
 0x38d   :  { %v3847_v52 = vadd.f32 %v6990_v61, %v3846_v51  ;;  %v5418_v53 = vpop.f32.mrb[222].mxu1 }
 0x38e   :  { %4339 = vst [vmem:[%s7644_s5 + $0x6f0] sm:$0xff] %v3855_v50  ;;  %v3858_v54 = vadd.f32 %v6990_v61, %v5418_v53  ;;  %v3849_v55 = vpop.f32.mrb[223].mxu1 }
 0x38f   :  { %4337 = vst [vmem:[%s7644_s5 + $0x6e0] sm:$0xff] %v3847_v52  ;;  %v3850_v56 = vadd.f32 %v6990_v61, %v3849_v55 }
 0x390   :  { %4340 = vst [vmem:[%s7644_s5 + $0x6f8] sm:$0xff] %v3858_v54 }
 0x391   :  { %4338 = vst [vmem:[%s7644_s5 + $0x6e8] sm:$0xff] %v3850_v56 }
 0x393   :  { %v5421_v57 = vpop.f32.mrb[224].mxu1 }
 0x394   :  { %v3871_v58 = vadd.f32 %v6990_v61, %v5421_v57  ;;  %v3862_v60 = vpop.f32.mrb[225].mxu1 }
 0x395   :  { %v3863_v62 = vadd.f32 %v6990_v61, %v3862_v60  ;;  %v5422_v63 = vpop.f32.mrb[226].mxu1  ;;  %v7509_v60 = vld [vmem:[%s7643_s4] ss:$0 sm:$0xff] }
 0x396   :  { %4343 = vst [vmem:[%s7644_s5 + $0x710] sm:$0xff] %v3871_v58  ;;  %v3874_v0 = vadd.f32 %v6990_v61, %v5422_v63  ;;  %v3865_v27 = vpop.f32.mrb[227].mxu1 }
 0x397   :  { %4341 = vst [vmem:[%s7644_s5 + $0x700] sm:$0xff] %v3863_v62  ;;  %v3866_v1 = vadd.f32 %v6990_v61, %v3865_v27 }
 0x398   :  { %4344 = vst [vmem:[%s7644_s5 + $0x718] sm:$0xff] %v3874_v0 }
 0x399   :  { %4342 = vst [vmem:[%s7644_s5 + $0x708] sm:$0xff] %v3866_v1 }
 0x39b   :  { %v5425_v47 = vpop.f32.mrb[228].mxu1 }
 0x39c   :  { %v3887_v2 = vadd.f32 %v6990_v61, %v5425_v47  ;;  %v3878_v3 = vpop.f32.mrb[229].mxu1 }
 0x39d   :  { %v3879_v4 = vadd.f32 %v6990_v61, %v3878_v3  ;;  %v5426_v5 = vpop.f32.mrb[230].mxu1 }
 0x39e   :  { %4347 = vst [vmem:[%s7644_s5 + $0x730] sm:$0xff] %v3887_v2  ;;  %v3890_v6 = vadd.f32 %v6990_v61, %v5426_v5  ;;  %v3881_v8 = vpop.f32.mrb[231].mxu1 }
 0x39f   :  { %4345 = vst [vmem:[%s7644_s5 + $0x720] sm:$0xff] %v3879_v4  ;;  %v3882_v10 = vadd.f32 %v6990_v61, %v3881_v8 }
 0x3a0   :  { %4348 = vst [vmem:[%s7644_s5 + $0x738] sm:$0xff] %v3890_v6 }
 0x3a1   :  { %4346 = vst [vmem:[%s7644_s5 + $0x728] sm:$0xff] %v3882_v10 }
 0x3a3   :  { %v5429_v11 = vpop.f32.mrb[232].mxu1 }
 0x3a4   :  { %v3903_v12 = vadd.f32 %v6990_v61, %v5429_v11  ;;  %v3894_v13 = vpop.f32.mrb[233].mxu1 }
 0x3a5   :  { %v3895_v14 = vadd.f32 %v6990_v61, %v3894_v13  ;;  %v5430_v15 = vpop.f32.mrb[234].mxu1 }
 0x3a6   :  { %4351 = vst [vmem:[%s7644_s5 + $0x750] sm:$0xff] %v3903_v12  ;;  %v3906_v16 = vadd.f32 %v6990_v61, %v5430_v15  ;;  %v3897_v17 = vpop.f32.mrb[235].mxu1 }
 0x3a7   :  { %4349 = vst [vmem:[%s7644_s5 + $0x740] sm:$0xff] %v3895_v14  ;;  %v3898_v18 = vadd.f32 %v6990_v61, %v3897_v17 }
 0x3a8   :  { %4352 = vst [vmem:[%s7644_s5 + $0x758] sm:$0xff] %v3906_v16 }
 0x3a9   :  { %4350 = vst [vmem:[%s7644_s5 + $0x748] sm:$0xff] %v3898_v18 }
 0x3ab   :  { %v5433_v19 = vpop.f32.mrb[236].mxu1 }
 0x3ac   :  { %v3919_v20 = vadd.f32 %v6990_v61, %v5433_v19  ;;  %v3910_v9 = vpop.f32.mrb[237].mxu1 }
 0x3ad   :  { %v3911_v21 = vadd.f32 %v6990_v61, %v3910_v9  ;;  %v5434_v22 = vpop.f32.mrb[238].mxu1 }
 0x3ae   :  { %4355 = vst [vmem:[%s7644_s5 + $0x770] sm:$0xff] %v3919_v20  ;;  %v3922_v24 = vadd.f32 %v6990_v61, %v5434_v22  ;;  %v3913_v25 = vpop.f32.mrb[239].mxu1 }
 0x3af   :  { %4353 = vst [vmem:[%s7644_s5 + $0x760] sm:$0xff] %v3911_v21  ;;  %v3914_v26 = vadd.f32 %v6990_v61, %v3913_v25 }
 0x3b0   :  { %4356 = vst [vmem:[%s7644_s5 + $0x778] sm:$0xff] %v3922_v24 }
 0x3b1   :  { %4354 = vst [vmem:[%s7644_s5 + $0x768] sm:$0xff] %v3914_v26 }
 0x3b3   :  { %v5437_v28 = vpop.f32.mrb[240].mxu1 }
 0x3b4   :  { %v3935_v29 = vadd.f32 %v6990_v61, %v5437_v28  ;;  %v3926_v30 = vpop.f32.mrb[241].mxu1 }
 0x3b5   :  { %v3927_v31 = vadd.f32 %v6990_v61, %v3926_v30  ;;  %v5438_v23 = vpop.f32.mrb[242].mxu1 }
 0x3b6   :  { %4359 = vst [vmem:[%s7644_s5 + $0x790] sm:$0xff] %v3935_v29  ;;  %v3938_v59 = vadd.f32 %v6990_v61, %v5438_v23  ;;  %v3929_v32 = vpop.f32.mrb[243].mxu1 }
 0x3b7   :  { %4357 = vst [vmem:[%s7644_s5 + $0x780] sm:$0xff] %v3927_v31  ;;  %v3930_v33 = vadd.f32 %v6990_v61, %v3929_v32 }
 0x3b8   :  { %4360 = vst [vmem:[%s7644_s5 + $0x798] sm:$0xff] %v3938_v59 }
 0x3b9   :  { %4358 = vst [vmem:[%s7644_s5 + $0x788] sm:$0xff] %v3930_v33 }
 0x3bb   :  { %v5441_v34 = vpop.f32.mrb[244].mxu1 }
 0x3bc   :  { %v3951_v35 = vadd.f32 %v6990_v61, %v5441_v34  ;;  %v3942_v36 = vpop.f32.mrb[245].mxu1 }
 0x3bd   :  { %v3943_v37 = vadd.f32 %v6990_v61, %v3942_v36  ;;  %v5442_v38 = vpop.f32.mrb[246].mxu1 }
 0x3be   :  { %4363 = vst [vmem:[%s7644_s5 + $0x7b0] sm:$0xff] %v3951_v35  ;;  %v3954_v39 = vadd.f32 %v6990_v61, %v5442_v38  ;;  %v3945_v40 = vpop.f32.mrb[247].mxu1 }
 0x3bf   :  { %4361 = vst [vmem:[%s7644_s5 + $0x7a0] sm:$0xff] %v3943_v37  ;;  %v3946_v41 = vadd.f32 %v6990_v61, %v3945_v40 }
 0x3c0   :  { %4364 = vst [vmem:[%s7644_s5 + $0x7b8] sm:$0xff] %v3954_v39 }
 0x3c1   :  { %4362 = vst [vmem:[%s7644_s5 + $0x7a8] sm:$0xff] %v3946_v41 }
 0x3c3   :  { %v5445_v42 = vpop.f32.mrb[248].mxu1 }
 0x3c4   :  { %v3967_v43 = vadd.f32 %v6990_v61, %v5445_v42  ;;  %v3958_v44 = vpop.f32.mrb[249].mxu1 }
 0x3c5   :  { %v3959_v45 = vadd.f32 %v6990_v61, %v3958_v44  ;;  %v5446_v46 = vpop.f32.mrb[250].mxu1 }
 0x3c6   :  { %4367 = vst [vmem:[%s7644_s5 + $0x7d0] sm:$0xff] %v3967_v43  ;;  %v3970_v48 = vadd.f32 %v6990_v61, %v5446_v46  ;;  %v3961_v49 = vpop.f32.mrb[251].mxu1 }
 0x3c7   :  { %4365 = vst [vmem:[%s7644_s5 + $0x7c0] sm:$0xff] %v3959_v45  ;;  %v3962_v7 = vadd.f32 %v6990_v61, %v3961_v49 }
 0x3c8   :  { %4368 = vst [vmem:[%s7644_s5 + $0x7d8] sm:$0xff] %v3970_v48 }
 0x3c9   :  { %4366 = vst [vmem:[%s7644_s5 + $0x7c8] sm:$0xff] %v3962_v7 }
 0x3cb   :  { %v5449_v50 = vpop.f32.mrb[252].mxu1 }
 0x3cc   :  { %v3983_v51 = vadd.f32 %v6990_v61, %v5449_v50  ;;  %v3974_v52 = vpop.f32.mrb[253].mxu1 }
 0x3cd   :  { %v3975_v53 = vadd.f32 %v6990_v61, %v3974_v52  ;;  %v5450_v54 = vpop.f32.mrb[254].mxu1 }
 0x3ce   :  { %4371 = vst [vmem:[%s7644_s5 + $0x7f0] sm:$0xff] %v3983_v51  ;;  %v3986_v55 = vadd.f32 %v6990_v61, %v5450_v54  ;;  %v3977_v56 = vpop.f32.mrb[255].mxu1 }
 0x3cf   :  { %4369 = vst [vmem:[%s7644_s5 + $0x7e0] sm:$0xff] %v3975_v53  ;;  %v3978_v57 = vadd.f32 %v6990_v61, %v3977_v56 }
 0x3d0   :  { %4372 = vst [vmem:[%s7644_s5 + $0x7f8] sm:$0xff] %v3986_v55 }
 0x3d1   :  { %4370 = vst [vmem:[%s7644_s5 + $0x7e8] sm:$0xff] %v3978_v57 }
 0x3d3   :  { %v5453_v58 = vpop.f32.mrb[0].mxu1 }
 0x3d4   :  { %v3999_v62 = vadd.f32 %v7509_v60, %v5453_v58  ;;  %v3990_v63 = vpop.f32.mrb[1].mxu1 }
 0x3d5   :  { %v3991_v0 = vadd.f32 %v7509_v60, %v3990_v63  ;;  %v5454_v61 = vpop.f32.mrb[2].mxu1 }
 0x3d6   :  { %4375 = vst [vmem:[%s7644_s5 + $0x810] sm:$0xff] %v3999_v62  ;;  %v4002_v27 = vadd.f32 %v7509_v60, %v5454_v61  ;;  %v3993_v1 = vpop.f32.mrb[3].mxu1 }
 0x3d7   :  { %4373 = vst [vmem:[%s7644_s5 + $0x800] sm:$0xff] %v3991_v0  ;;  %v3994_v47 = vadd.f32 %v7509_v60, %v3993_v1 }
 0x3d8   :  { %4376 = vst [vmem:[%s7644_s5 + $0x818] sm:$0xff] %v4002_v27 }
 0x3d9   :  { %4374 = vst [vmem:[%s7644_s5 + $0x808] sm:$0xff] %v3994_v47 }
 0x3db   :  { %v5457_v2 = vpop.f32.mrb[4].mxu1 }
 0x3dc   :  { %v4015_v3 = vadd.f32 %v7509_v60, %v5457_v2  ;;  %v4006_v4 = vpop.f32.mrb[5].mxu1 }
 0x3dd   :  { %v4007_v5 = vadd.f32 %v7509_v60, %v4006_v4  ;;  %v5458_v6 = vpop.f32.mrb[6].mxu1 }
 0x3de   :  { %4379 = vst [vmem:[%s7644_s5 + $0x830] sm:$0xff] %v4015_v3  ;;  %v4018_v8 = vadd.f32 %v7509_v60, %v5458_v6  ;;  %v4009_v10 = vpop.f32.mrb[7].mxu1 }
 0x3df   :  { %4377 = vst [vmem:[%s7644_s5 + $0x820] sm:$0xff] %v4007_v5  ;;  %v4010_v11 = vadd.f32 %v7509_v60, %v4009_v10 }
 0x3e0   :  { %4380 = vst [vmem:[%s7644_s5 + $0x838] sm:$0xff] %v4018_v8 }
 0x3e1   :  { %4378 = vst [vmem:[%s7644_s5 + $0x828] sm:$0xff] %v4010_v11 }
 0x3e3   :  { %v5461_v12 = vpop.f32.mrb[8].mxu1 }
 0x3e4   :  { %v4031_v13 = vadd.f32 %v7509_v60, %v5461_v12  ;;  %v4022_v14 = vpop.f32.mrb[9].mxu1 }
 0x3e5   :  { %v4023_v15 = vadd.f32 %v7509_v60, %v4022_v14  ;;  %v5462_v16 = vpop.f32.mrb[10].mxu1 }
 0x3e6   :  { %4383 = vst [vmem:[%s7644_s5 + $0x850] sm:$0xff] %v4031_v13  ;;  %v4034_v17 = vadd.f32 %v7509_v60, %v5462_v16  ;;  %v4025_v18 = vpop.f32.mrb[11].mxu1 }
 0x3e7   :  { %4381 = vst [vmem:[%s7644_s5 + $0x840] sm:$0xff] %v4023_v15  ;;  %v4026_v19 = vadd.f32 %v7509_v60, %v4025_v18 }
 0x3e8   :  { %4384 = vst [vmem:[%s7644_s5 + $0x858] sm:$0xff] %v4034_v17 }
 0x3e9   :  { %4382 = vst [vmem:[%s7644_s5 + $0x848] sm:$0xff] %v4026_v19 }
 0x3eb   :  { %v5465_v20 = vpop.f32.mrb[12].mxu1 }
 0x3ec   :  { %v4047_v9 = vadd.f32 %v7509_v60, %v5465_v20  ;;  %v4038_v21 = vpop.f32.mrb[13].mxu1 }
 0x3ed   :  { %v4039_v22 = vadd.f32 %v7509_v60, %v4038_v21  ;;  %v5466_v24 = vpop.f32.mrb[14].mxu1 }
 0x3ee   :  { %4387 = vst [vmem:[%s7644_s5 + $0x870] sm:$0xff] %v4047_v9  ;;  %v4050_v25 = vadd.f32 %v7509_v60, %v5466_v24  ;;  %v4041_v26 = vpop.f32.mrb[15].mxu1 }
 0x3ef   :  { %4385 = vst [vmem:[%s7644_s5 + $0x860] sm:$0xff] %v4039_v22  ;;  %v4042_v28 = vadd.f32 %v7509_v60, %v4041_v26 }
 0x3f0   :  { %4388 = vst [vmem:[%s7644_s5 + $0x878] sm:$0xff] %v4050_v25 }
 0x3f1   :  { %4386 = vst [vmem:[%s7644_s5 + $0x868] sm:$0xff] %v4042_v28 }
 0x3f3   :  { %v5469_v29 = vpop.f32.mrb[16].mxu1 }
 0x3f4   :  { %v4063_v30 = vadd.f32 %v7509_v60, %v5469_v29  ;;  %v4054_v31 = vpop.f32.mrb[17].mxu1 }
 0x3f5   :  { %v4055_v23 = vadd.f32 %v7509_v60, %v4054_v31  ;;  %v5470_v59 = vpop.f32.mrb[18].mxu1 }
 0x3f6   :  { %4391 = vst [vmem:[%s7644_s5 + $0x890] sm:$0xff] %v4063_v30  ;;  %v4066_v32 = vadd.f32 %v7509_v60, %v5470_v59  ;;  %v4057_v33 = vpop.f32.mrb[19].mxu1 }
 0x3f7   :  { %4389 = vst [vmem:[%s7644_s5 + $0x880] sm:$0xff] %v4055_v23  ;;  %v4058_v34 = vadd.f32 %v7509_v60, %v4057_v33 }
 0x3f8   :  { %4392 = vst [vmem:[%s7644_s5 + $0x898] sm:$0xff] %v4066_v32 }
 0x3f9   :  { %4390 = vst [vmem:[%s7644_s5 + $0x888] sm:$0xff] %v4058_v34 }
 0x3fb   :  { %v5473_v35 = vpop.f32.mrb[20].mxu1 }
 0x3fc   :  { %v4079_v36 = vadd.f32 %v7509_v60, %v5473_v35  ;;  %v4070_v37 = vpop.f32.mrb[21].mxu1 }
 0x3fd   :  { %v4071_v38 = vadd.f32 %v7509_v60, %v4070_v37  ;;  %v5474_v39 = vpop.f32.mrb[22].mxu1 }
 0x3fe   :  { %4395 = vst [vmem:[%s7644_s5 + $0x8b0] sm:$0xff] %v4079_v36  ;;  %v4082_v40 = vadd.f32 %v7509_v60, %v5474_v39  ;;  %v4073_v41 = vpop.f32.mrb[23].mxu1 }
 0x3ff   :  { %4393 = vst [vmem:[%s7644_s5 + $0x8a0] sm:$0xff] %v4071_v38  ;;  %v4074_v42 = vadd.f32 %v7509_v60, %v4073_v41 }
 0x400   :  { %4396 = vst [vmem:[%s7644_s5 + $0x8b8] sm:$0xff] %v4082_v40 }
 0x401   :  { %4394 = vst [vmem:[%s7644_s5 + $0x8a8] sm:$0xff] %v4074_v42 }
 0x403   :  { %v5477_v43 = vpop.f32.mrb[24].mxu1 }
 0x404   :  { %v4095_v44 = vadd.f32 %v7509_v60, %v5477_v43  ;;  %v4086_v45 = vpop.f32.mrb[25].mxu1 }
 0x405   :  { %v4087_v46 = vadd.f32 %v7509_v60, %v4086_v45  ;;  %v5478_v48 = vpop.f32.mrb[26].mxu1 }
 0x406   :  { %4399 = vst [vmem:[%s7644_s5 + $0x8d0] sm:$0xff] %v4095_v44  ;;  %v4098_v49 = vadd.f32 %v7509_v60, %v5478_v48  ;;  %v4089_v7 = vpop.f32.mrb[27].mxu1 }
 0x407   :  { %4397 = vst [vmem:[%s7644_s5 + $0x8c0] sm:$0xff] %v4087_v46  ;;  %v4090_v50 = vadd.f32 %v7509_v60, %v4089_v7 }
 0x408   :  { %4400 = vst [vmem:[%s7644_s5 + $0x8d8] sm:$0xff] %v4098_v49 }
 0x409   :  { %4398 = vst [vmem:[%s7644_s5 + $0x8c8] sm:$0xff] %v4090_v50 }
 0x40b   :  { %v5481_v51 = vpop.f32.mrb[28].mxu1 }
 0x40c   :  { %v4111_v52 = vadd.f32 %v7509_v60, %v5481_v51  ;;  %v4102_v53 = vpop.f32.mrb[29].mxu1 }
 0x40d   :  { %v4103_v54 = vadd.f32 %v7509_v60, %v4102_v53  ;;  %v5482_v55 = vpop.f32.mrb[30].mxu1 }
 0x40e   :  { %4403 = vst [vmem:[%s7644_s5 + $0x8f0] sm:$0xff] %v4111_v52  ;;  %v4114_v56 = vadd.f32 %v7509_v60, %v5482_v55  ;;  %v4105_v57 = vpop.f32.mrb[31].mxu1 }
 0x40f   :  { %4401 = vst [vmem:[%s7644_s5 + $0x8e0] sm:$0xff] %v4103_v54  ;;  %v4106_v58 = vadd.f32 %v7509_v60, %v4105_v57 }
 0x410   :  { %4404 = vst [vmem:[%s7644_s5 + $0x8f8] sm:$0xff] %v4114_v56 }
 0x411   :  { %4402 = vst [vmem:[%s7644_s5 + $0x8e8] sm:$0xff] %v4106_v58 }

</bundles_post_ra>
